<compile_context>
chip_gen: v7x
topology: tpu7x:2x2x1
jax: 0.10.0
libtpu: 0.0.40
codegen_flags: <defaults>
</compile_context>

<pallas_src>
import functools

import jax
import jax.numpy as jnp
from jax import lax
from jax.experimental import pallas as pl
from jax.experimental.pallas import tpu as pltpu

BN_EPS = 1e-5
NEG_SLOPE = 0.2
LANE = 128
VMEM_LIMIT = 64 * 1024 * 1024  # <= physical VMEM on v5e/v6e/v7x


def _round_up(x, m):
    return (x + m - 1) // m * m


def _pick_row_tile(h, requested):
    t = max(1, min(requested, h))
    while h % t:
        t -= 1
    return t


# ---------------------------------------------------------------------------
# MaxPool2d(2): 4-way elementwise max in Pallas (window extraction in XLA glue).
# ---------------------------------------------------------------------------
def _max4_kernel(a_ref, b_ref, c_ref, d_ref, o_ref):
    o_ref[...] = jnp.maximum(jnp.maximum(a_ref[...], b_ref[...]),
                             jnp.maximum(c_ref[...], d_ref[...]))


def maxpool2x2(x_nhwc):
    n, h, w, c = x_nhwc.shape
    ho, wo = h // 2, w // 2
    a = x_nhwc[:, 0::2, 0::2, :]
    b = x_nhwc[:, 0::2, 1::2, :]
    cc = x_nhwc[:, 1::2, 0::2, :]
    d = x_nhwc[:, 1::2, 1::2, :]
    spec = pl.BlockSpec((1, ho, wo, c), lambda i: (i, 0, 0, 0))
    itemsize = jnp.dtype(x_nhwc.dtype).itemsize
    return pl.pallas_call(
        _max4_kernel,
        out_shape=jax.ShapeDtypeStruct((n, ho, wo, c), x_nhwc.dtype),
        grid=(n,),
        in_specs=[spec, spec, spec, spec],
        out_specs=spec,
        compiler_params=pltpu.CompilerParams(
            dimension_semantics=("parallel",),
            vmem_limit_bytes=VMEM_LIMIT,
        ),
        cost_estimate=pl.CostEstimate(
            flops=3 * n * ho * wo * c,
            transcendentals=0,
            bytes_accessed=5 * n * ho * wo * c * itemsize,
        ),
    )(a, b, cc, d)


# ---------------------------------------------------------------------------
# Pass 1: 3x3 conv (in-kernel tap decomposition) + bias + BN sum / sum-of-squares.
# ---------------------------------------------------------------------------
def _conv3x3_stats_kernel(x_ref, w_ref, b_ref, acc_ref, sum_ref, ssq_ref):
    # x_ref   : (H+2, W+2, Cin)  zero-padded bf16 slab for this image (VMEM resident)
    # w_ref   : (9, Cin, Cout)   bf16 weights, tap-major (dy*3+dx), resident
    # b_ref   : (1, Cout)        f32 conv bias
    # acc_ref : (TR, W, Cout)    f32 pre-BN conv output tile
    # sum_ref, ssq_ref : (1, Cout) f32 running per-channel sum / sum-of-squares
    @pl.when(jnp.logical_and(pl.program_id(0) == 0, pl.program_id(1) == 0))
    def _init():
        sum_ref[...] = jnp.zeros_like(sum_ref)
        ssq_ref[...] = jnp.zeros_like(ssq_ref)

    tr, w_out, cout = acc_ref.shape
    row0 = pl.program_id(1) * tr          # first output row of this tile
    bias = b_ref[...]                     # (1, Cout) f32

    def one_row(t, carry):
        acc = jnp.zeros((w_out, cout), jnp.float32)
        for dy in range(3):
            for dx in range(3):
                # (W, Cin) bf16 tap slab; MXU matmul with f32 accumulation.
                lhs = x_ref[row0 + t + dy, pl.ds(dx, w_out), :]
                acc = acc + jnp.dot(lhs, w_ref[3 * dy + dx],
                                    preferred_element_type=jnp.float32)
        acc = acc + bias                  # (BN makes this a no-op mathematically,
                                          #  kept to mirror the PyTorch forward)
        acc_ref[t] = acc
        sum_ref[...] += jnp.sum(acc, axis=0, keepdims=True)
        ssq_ref[...] += jnp.sum(acc * acc, axis=0, keepdims=True)
        return carry

    lax.fori_loop(0, tr, one_row, 0, unroll=True)


def conv3x3_stats(x_pad, w9, bias, row_tile):
    n, hp, wp, cin = x_pad.shape
    h, w = hp - 2, wp - 2
    cout = w9.shape[-1]
    tr = row_tile
    rt = h // tr
    m = n * h * w
    return pl.pallas_call(
        _conv3x3_stats_kernel,
        out_shape=(
            jax.ShapeDtypeStruct((n, h, w, cout), jnp.float32),   # pre-BN acc
            jax.ShapeDtypeStruct((1, cout), jnp.float32),         # sum
            jax.ShapeDtypeStruct((1, cout), jnp.float32),         # sum of squares
        ),
        grid=(n, rt),
        in_specs=[
            # full padded image per batch element; re-DMA'd only when b changes
            pl.BlockSpec((None, hp, wp, cin), lambda b, r: (b, 0, 0, 0)),
            # weights stay VMEM-resident (constant block index)
            pl.BlockSpec((9, cin, cout), lambda b, r: (0, 0, 0)),
            pl.BlockSpec((1, cout), lambda b, r: (0, 0)),
        ],
        out_specs=(
            pl.BlockSpec((None, tr, w, cout), lambda b, r: (b, r, 0, 0)),
            pl.BlockSpec((1, cout), lambda b, r: (0, 0)),
            pl.BlockSpec((1, cout), lambda b, r: (0, 0)),
        ),
        compiler_params=pltpu.CompilerParams(
            # both axes revisit the resident sum/ssq accumulators -> "arbitrary"
            dimension_semantics=("arbitrary", "arbitrary"),
            vmem_limit_bytes=VMEM_LIMIT,
        ),
        cost_estimate=pl.CostEstimate(
            flops=2 * m * 9 * cin * cout,
            transcendentals=0,
            bytes_accessed=x_pad.size * 2 + w9.size * 2 + m * cout * 4,
        ),
    )(x_pad, w9, bias)


# ---------------------------------------------------------------------------
# Pass 2: fused BatchNorm (folded into scale/shift) + LeakyReLU(0.2).
# ---------------------------------------------------------------------------
def _bn_lrelu_kernel(acc_ref, scale_ref, shift_ref, o_ref):
    y = acc_ref[...] * scale_ref[...] + shift_ref[...]     # one FMA per element
    o_ref[...] = jnp.where(y >= 0.0, y, NEG_SLOPE * y).astype(o_ref.dtype)


def bn_lrelu_apply(acc, scale, shift, row_tile, out_dtype):
    n, h, w, cout = acc.shape
    tr = row_tile
    rt = h // tr
    return pl.pallas_call(
        _bn_lrelu_kernel,
        out_shape=jax.ShapeDtypeStruct((n, h, w, cout), out_dtype),
        grid=(n, rt),
        in_specs=[
            pl.BlockSpec((None, tr, w, cout), lambda b, r: (b, r, 0, 0)),
            pl.BlockSpec((1, cout), lambda b, r: (0, 0)),
            pl.BlockSpec((1, cout), lambda b, r: (0, 0)),
        ],
        out_specs=pl.BlockSpec((None, tr, w, cout), lambda b, r: (b, r, 0, 0)),
        compiler_params=pltpu.CompilerParams(
            dimension_semantics=("parallel", "parallel"),
            vmem_limit_bytes=VMEM_LIMIT,
        ),
        cost_estimate=pl.CostEstimate(
            flops=4 * acc.size,
            transcendentals=0,
            bytes_accessed=acc.size * 4 + acc.size * jnp.dtype(out_dtype).itemsize,
        ),
    )(acc, scale, shift)


# ---------------------------------------------------------------------------
# One Conv3x3 -> BatchNorm2d (training stats) -> LeakyReLU(0.2) layer.
# ---------------------------------------------------------------------------
def _conv_bn_lrelu_layer(x_nhwc, w9, bias, gamma, beta, row_tile, out_dtype):
    # x_nhwc: (N, H, W, Cpad) bf16, channels already zero-padded to a multiple of 128
    n, h, w, _ = x_nhwc.shape
    tr = _pick_row_tile(h, row_tile)
    x_pad = jnp.pad(x_nhwc, ((0, 0), (1, 1), (1, 1), (0, 0)))
    acc, s1, s2 = conv3x3_stats(x_pad, w9, bias, tr)
    m = float(n * h * w)
    mean = s1 / m
    var = jnp.maximum(s2 / m - mean * mean, 0.0)            # biased variance (PyTorch BN)
    scale = gamma * lax.rsqrt(var + BN_EPS)                 # (1, Cpad) f32
    shift = beta - mean * scale                             # (1, Cpad) f32
    return bn_lrelu_apply(acc, scale, shift, tr, out_dtype)


# ---------------------------------------------------------------------------
# Parameters (PyTorch layouts) and kernel-side preparation (padded / bf16).
# ---------------------------------------------------------------------------
def init_down_params(key, in_channels, out_channels):
    # Down: MaxPool2d(2) -> DoubleConv(in, out, None)  =>  mid_channels == out_channels
    mid_channels = out_channels
    k1, k2, k3, k4 = jax.random.split(key, 4)
    w1 = jax.random.normal(k1, (mid_channels, in_channels, 3, 3), jnp.float32) * 0.1
    b1 = jax.random.normal(k2, (mid_channels,), jnp.float32) * 0.1
    w2 = jax.random.normal(k3, (out_channels, mid_channels, 3, 3), jnp.float32) * 0.1
    b2 = jax.random.normal(k4, (out_channels,), jnp.float32) * 0.1
    return dict(
        w1=w1, b1=b1,
        g1=jnp.ones((mid_channels,), jnp.float32),
        be1=jnp.zeros((mid_channels,), jnp.float32),
        w2=w2, b2=b2,
        g2=jnp.ones((out_channels,), jnp.float32),
        be2=jnp.zeros((out_channels,), jnp.float32),
    )


def _prep_conv(w_oihw, bias, gamma, beta, cin_pad, cout_pad):
    cout, cin, kh, kw = w_oihw.shape
    # (Cout, Cin, 3, 3) -> (9, Cin, Cout), tap-major (dy, dx) matching the kernel loops
    w9 = jnp.transpose(w_oihw, (2, 3, 1, 0)).reshape(kh * kw, cin, cout)
    w9 = jnp.pad(w9, ((0, 0), (0, cin_pad - cin), (0, cout_pad - cout)))
    w9 = w9.astype(jnp.bfloat16)
    b_p = jnp.pad(bias, (0, cout_pad - cout)).reshape(1, cout_pad).astype(jnp.float32)
    g_p = jnp.pad(gamma, (0, cout_pad - cout), constant_values=1.0)
    g_p = g_p.reshape(1, cout_pad).astype(jnp.float32)
    be_p = jnp.pad(beta, (0, cout_pad - cout)).reshape(1, cout_pad).astype(jnp.float32)
    return w9, b_p, g_p, be_p


@functools.partial(jax.jit, static_argnames=("row_tile",))
def down_forward(x_nchw, params, row_tile=4):
    n, cin, h, w = x_nchw.shape
    cmid = params["w1"].shape[0]
    cout = params["w2"].shape[0]
    cin_p = _round_up(cin, LANE)
    cmid_p = _round_up(cmid, LANE)
    cout_p = _round_up(cout, LANE)

    w9_1, b1, g1, be1 = _prep_conv(params["w1"], params["b1"],
                                   params["g1"], params["be1"], cin_p, cmid_p)
    w9_2, b2, g2, be2 = _prep_conv(params["w2"], params["b2"],
                                   params["g2"], params["be2"], cmid_p, cout_p)

    # NCHW -> NHWC, lane-dense channel zero-padding, bf16 MXU operands.
    x = jnp.transpose(x_nchw, (0, 2, 3, 1)).astype(jnp.float32)
    x = jnp.pad(x, ((0, 0), (0, 0), (0, 0), (0, cin_p - cin))).astype(jnp.bfloat16)

    xp = maxpool2x2(x)                                                 # (N, H/2, W/2, Cin_p)
    h1 = _conv_bn_lrelu_layer(xp, w9_1, b1, g1, be1, row_tile, jnp.bfloat16)
    h2 = _conv_bn_lrelu_layer(h1, w9_2, b2, g2, be2, row_tile, jnp.float32)
    out = h2[..., :cout]                                               # drop channel padding
    return jnp.transpose(out, (0, 3, 1, 2))                            # back to NCHW


# ---------------------------------------------------------------------------
# Pure-JAX f32 reference mirroring the PyTorch forward (training-mode BN).
# ---------------------------------------------------------------------------
def reference_down(x_nchw, p):
    n, c, h, w = x_nchw.shape
    xp = x_nchw.reshape(n, c, h // 2, 2, w // 2, 2).max(axis=(3, 5))

    def conv(x, wgt, b):
        y = lax.conv_general_dilated(
            x, wgt, window_strides=(1, 1), padding=((1, 1), (1, 1)),
            dimension_numbers=("NCHW", "OIHW", "NCHW"))
        return y + b[None, :, None, None]

    def bn_lrelu(y, g, be):
        mean = jnp.mean(y, axis=(0, 2, 3), keepdims=True)
        var = jnp.mean(jnp.square(y - mean), axis=(0, 2, 3), keepdims=True)
        yh = (y - mean) * lax.rsqrt(var + BN_EPS)
        yh = yh * g[None, :, None, None] + be[None, :, None, None]
        return jnp.where(yh >= 0, yh, NEG_SLOPE * yh)

    y = bn_lrelu(conv(xp, p["w1"], p["b1"]), p["g1"], p["be1"])
    return bn_lrelu(conv(y, p["w2"], p["b2"]), p["g2"], p["be2"])


if __name__ == "__main__":
    key = jax.random.PRNGKey(0)
    kx, kp = jax.random.split(key)
    in_c, out_c = 4, 8
    x = jax.random.normal(kx, (2, in_c, 16, 16), jnp.float32)
    params = init_down_params(kp, in_c, out_c)

    out = jax.block_until_ready(down_forward(x, params, row_tile=4))
    ref = jax.block_until_ready(reference_down(x, params))

    assert out.shape == (2, out_c, 8, 8), out.shape
    # bf16 MXU operands (and a bf16 intermediate activation) vs. an all-f32
    # reference: allow a few bf16 ulps accumulated through two conv+BN layers.
    assert jnp.allclose(out, ref, atol=7e-2, rtol=7e-2), \
        float(jnp.max(jnp.abs(out - ref)))
    print("KERNEL_OK")
</pallas_src>

<mosaic_0001>
module attributes {stable_mosaic.version = 11 : i64} {
  func.func @_max4_kernel(%arg0: i32, %arg1: memref<1x8x8x128xbf16, #tpu.memory_space<vmem>>, %arg2: memref<1x8x8x128xbf16, #tpu.memory_space<vmem>>, %arg3: memref<1x8x8x128xbf16, #tpu.memory_space<vmem>>, %arg4: memref<1x8x8x128xbf16, #tpu.memory_space<vmem>>, %arg5: memref<1x8x8x128xbf16, #tpu.memory_space<vmem>>) attributes {dimension_semantics = [#tpu.dimension_semantics<parallel>], iteration_bounds = array<i64: 2>, scalar_prefetch = 0 : i64, scratch_operands = 0 : i64, tpu.core_type = #tpu.core_type<tc>, window_params = [{transform_indices = @transform_0, window_bounds = array<i64: 1, 8, 8, 128>}, {transform_indices = @transform_1, window_bounds = array<i64: 1, 8, 8, 128>}, {transform_indices = @transform_2, window_bounds = array<i64: 1, 8, 8, 128>}, {transform_indices = @transform_3, window_bounds = array<i64: 1, 8, 8, 128>}, {transform_indices = @transform_4, window_bounds = array<i64: 1, 8, 8, 128>}]} {
    %c0 = arith.constant 0 : index
    %c0_0 = arith.constant 0 : index
    %c0_1 = arith.constant 0 : index
    %c0_2 = arith.constant 0 : index
    %0 = vector.load %arg1[%c0, %c0_0, %c0_1, %c0_2] : memref<1x8x8x128xbf16, #tpu.memory_space<vmem>>, vector<1x8x8x128xbf16>
    %c0_3 = arith.constant 0 : index
    %c0_4 = arith.constant 0 : index
    %c0_5 = arith.constant 0 : index
    %c0_6 = arith.constant 0 : index
    %1 = vector.load %arg2[%c0_3, %c0_4, %c0_5, %c0_6] : memref<1x8x8x128xbf16, #tpu.memory_space<vmem>>, vector<1x8x8x128xbf16>
    %2 = arith.maximumf %0, %1 : vector<1x8x8x128xbf16>
    %c0_7 = arith.constant 0 : index
    %c0_8 = arith.constant 0 : index
    %c0_9 = arith.constant 0 : index
    %c0_10 = arith.constant 0 : index
    %3 = vector.load %arg3[%c0_7, %c0_8, %c0_9, %c0_10] : memref<1x8x8x128xbf16, #tpu.memory_space<vmem>>, vector<1x8x8x128xbf16>
    %c0_11 = arith.constant 0 : index
    %c0_12 = arith.constant 0 : index
    %c0_13 = arith.constant 0 : index
    %c0_14 = arith.constant 0 : index
    %4 = vector.load %arg4[%c0_11, %c0_12, %c0_13, %c0_14] : memref<1x8x8x128xbf16, #tpu.memory_space<vmem>>, vector<1x8x8x128xbf16>
    %5 = arith.maximumf %3, %4 : vector<1x8x8x128xbf16>
    %6 = arith.maximumf %2, %5 : vector<1x8x8x128xbf16>
    %c0_15 = arith.constant 0 : index
    %c0_16 = arith.constant 0 : index
    %c0_17 = arith.constant 0 : index
    %c0_18 = arith.constant 0 : index
    %7 = vector.load %arg5[%c0_15, %c0_16, %c0_17, %c0_18] : memref<1x8x8x128xbf16, #tpu.memory_space<vmem>>, vector<1x8x8x128xbf16>
    tpu.vector_store %arg5[%c0_15, %c0_16, %c0_17, %c0_18], %6 {strides = array<i32>} : memref<1x8x8x128xbf16, #tpu.memory_space<vmem>>, vector<1x8x8x128xbf16>,
    return
  }
  func.func @transform_0(%arg0: i32) -> (i32, i32, i32, i32) {
    %c0_i32 = arith.constant 0 : i32
    %c0_i32_0 = arith.constant 0 : i32
    %c0_i32_1 = arith.constant 0 : i32
    %c0_i32_2 = arith.constant 0 : i32
    return %arg0, %c0_i32, %c0_i32_0, %c0_i32_1 : i32, i32, i32, i32
  }
  func.func @transform_1(%arg0: i32) -> (i32, i32, i32, i32) {
    %c0_i32 = arith.constant 0 : i32
    %c0_i32_0 = arith.constant 0 : i32
    %c0_i32_1 = arith.constant 0 : i32
    %c0_i32_2 = arith.constant 0 : i32
    return %arg0, %c0_i32, %c0_i32_0, %c0_i32_1 : i32, i32, i32, i32
  }
  func.func @transform_2(%arg0: i32) -> (i32, i32, i32, i32) {
    %c0_i32 = arith.constant 0 : i32
    %c0_i32_0 = arith.constant 0 : i32
    %c0_i32_1 = arith.constant 0 : i32
    %c0_i32_2 = arith.constant 0 : i32
    return %arg0, %c0_i32, %c0_i32_0, %c0_i32_1 : i32, i32, i32, i32
  }
  func.func @transform_3(%arg0: i32) -> (i32, i32, i32, i32) {
    %c0_i32 = arith.constant 0 : i32
    %c0_i32_0 = arith.constant 0 : i32
    %c0_i32_1 = arith.constant 0 : i32
    %c0_i32_2 = arith.constant 0 : i32
    return %arg0, %c0_i32, %c0_i32_0, %c0_i32_1 : i32, i32, i32, i32
  }
  func.func @transform_4(%arg0: i32) -> (i32, i32, i32, i32) {
    %c0_i32 = arith.constant 0 : i32
    %c0_i32_0 = arith.constant 0 : i32
    %c0_i32_1 = arith.constant 0 : i32
    %c0_i32_2 = arith.constant 0 : i32
    return %arg0, %c0_i32, %c0_i32_0, %c0_i32_1 : i32, i32, i32, i32
  }
}

module attributes {stable_mosaic.version = 11 : i64} {
  func.func @_bn_lrelu_kernel(%arg0: i32, %arg1: i32, %arg2: memref<1x4x8x128xf32, #tpu.memory_space<vmem>>, %arg3: memref<1x128xf32, #tpu.memory_space<vmem>>, %arg4: memref<1x128xf32, #tpu.memory_space<vmem>>, %arg5: memref<1x4x8x128xbf16, #tpu.memory_space<vmem>>) attributes {dimension_semantics = [#tpu.dimension_semantics<parallel>, #tpu.dimension_semantics<parallel>], iteration_bounds = array<i64: 2, 2>, scalar_prefetch = 0 : i64, scratch_operands = 0 : i64, tpu.core_type = #tpu.core_type<tc>, window_params = [{transform_indices = @transform_0, window_bounds = array<i64: 1, 4, 8, 128>}, {pipeline_mode = #tpu.pipeline_mode<synchronous>, transform_indices = @transform_1, window_bounds = array<i64: 1, 128>}, {pipeline_mode = #tpu.pipeline_mode<synchronous>, transform_indices = @transform_2, window_bounds = array<i64: 1, 128>}, {transform_indices = @transform_3, window_bounds = array<i64: 1, 4, 8, 128>}]} {
    %c0 = arith.constant 0 : index
    %c0_0 = arith.constant 0 : index
    %c0_1 = arith.constant 0 : index
    %c0_2 = arith.constant 0 : index
    %0 = vector.load %arg2[%c0, %c0_0, %c0_1, %c0_2] : memref<1x4x8x128xf32, #tpu.memory_space<vmem>>, vector<1x4x8x128xf32>
    %1 = vector.shape_cast %0 : vector<1x4x8x128xf32> to vector<4x8x128xf32>
    %c0_3 = arith.constant 0 : index
    %c0_4 = arith.constant 0 : index
    %2 = vector.load %arg3[%c0_3, %c0_4] : memref<1x128xf32, #tpu.memory_space<vmem>>, vector<1x128xf32>
    %3 = vector.shape_cast %2 : vector<1x128xf32> to vector<1x1x128xf32>
    %4 = vector.broadcast %3 : vector<1x1x128xf32> to vector<4x8x128xf32>
    %5 = arith.mulf %1, %4 : vector<4x8x128xf32>
    %c0_5 = arith.constant 0 : index
    %c0_6 = arith.constant 0 : index
    %6 = vector.load %arg4[%c0_5, %c0_6] : memref<1x128xf32, #tpu.memory_space<vmem>>, vector<1x128xf32>
    %7 = vector.shape_cast %6 : vector<1x128xf32> to vector<1x1x128xf32>
    %8 = vector.broadcast %7 : vector<1x1x128xf32> to vector<4x8x128xf32>
    %9 = arith.addf %5, %8 : vector<4x8x128xf32>
    %cst = arith.constant 0.000000e+00 : f32
    %10 = vector.broadcast %cst : f32 to vector<4x8x128xf32>
    %11 = arith.cmpf oge, %9, %10 : vector<4x8x128xf32>
    %cst_7 = arith.constant 2.000000e-01 : f32
    %12 = vector.broadcast %cst_7 : f32 to vector<4x8x128xf32>
    %13 = arith.mulf %12, %9 : vector<4x8x128xf32>
    %14 = arith.select %11, %9, %13 : vector<4x8x128xi1>, vector<4x8x128xf32>
    %15 = arith.truncf %14 : vector<4x8x128xf32> to vector<4x8x128xbf16>
    %c0_8 = arith.constant 0 : index
    %c0_9 = arith.constant 0 : index
    %c0_10 = arith.constant 0 : index
    %c0_11 = arith.constant 0 : index
    %16 = vector.load %arg5[%c0_8, %c0_9, %c0_10, %c0_11] : memref<1x4x8x128xbf16, #tpu.memory_space<vmem>>, vector<1x4x8x128xbf16>
    %17 = vector.shape_cast %16 : vector<1x4x8x128xbf16> to vector<4x8x128xbf16>
    %18 = vector.shape_cast %15 : vector<4x8x128xbf16> to vector<1x4x8x128xbf16>
    tpu.vector_store %arg5[%c0_8, %c0_9, %c0_10, %c0_11], %18 {strides = array<i32>} : memref<1x4x8x128xbf16, #tpu.memory_space<vmem>>, vector<1x4x8x128xbf16>,
    return
  }
  func.func @transform_0(%arg0: i32, %arg1: i32) -> (i32, i32, i32, i32) {
    %c0_i32 = arith.constant 0 : i32
    %c0_i32_0 = arith.constant 0 : i32
    %c0_i32_1 = arith.constant 0 : i32
    return %arg0, %arg1, %c0_i32, %c0_i32_0 : i32, i32, i32, i32
  }
  func.func @transform_1(%arg0: i32, %arg1: i32) -> (i32, i32) {
    %c0_i32 = arith.constant 0 : i32
    %c0_i32_0 = arith.constant 0 : i32
    %c0_i32_1 = arith.constant 0 : i32
    return %c0_i32, %c0_i32_0 : i32, i32
  }
  func.func @transform_2(%arg0: i32, %arg1: i32) -> (i32, i32) {
    %c0_i32 = arith.constant 0 : i32
    %c0_i32_0 = arith.constant 0 : i32
    %c0_i32_1 = arith.constant 0 : i32
    return %c0_i32, %c0_i32_0 : i32, i32
  }
  func.func @transform_3(%arg0: i32, %arg1: i32) -> (i32, i32, i32, i32) {
    %c0_i32 = arith.constant 0 : i32
    %c0_i32_0 = arith.constant 0 : i32
    %c0_i32_1 = arith.constant 0 : i32
    return %arg0, %arg1, %c0_i32, %c0_i32_0 : i32, i32, i32, i32
  }
}

module attributes {stable_mosaic.version = 11 : i64} {
  func.func @_conv3x3_stats_kernel(%arg0: i32, %arg1: i32, %arg2: memref<1x10x10x128xbf16, #tpu.memory_space<vmem>>, %arg3: memref<9x128x128xbf16, #tpu.memory_space<vmem>>, %arg4: memref<1x128xf32, #tpu.memory_space<vmem>>, %arg5: memref<1x4x8x128xf32, #tpu.memory_space<vmem>>, %arg6: memref<1x128xf32, #tpu.memory_space<vmem>>, %arg7: memref<1x128xf32, #tpu.memory_space<vmem>>) attributes {dimension_semantics = [#tpu.dimension_semantics<arbitrary>, #tpu.dimension_semantics<arbitrary>], iteration_bounds = array<i64: 2, 2>, scalar_prefetch = 0 : i64, scratch_operands = 0 : i64, tpu.core_type = #tpu.core_type<tc>, window_params = [{transform_indices = @transform_0, window_bounds = array<i64: 1, 10, 10, 128>}, {pipeline_mode = #tpu.pipeline_mode<synchronous>, transform_indices = @transform_1, window_bounds = array<i64: 9, 128, 128>}, {pipeline_mode = #tpu.pipeline_mode<synchronous>, transform_indices = @transform_2, window_bounds = array<i64: 1, 128>}, {transform_indices = @transform_3, window_bounds = array<i64: 1, 4, 8, 128>}, {pipeline_mode = #tpu.pipeline_mode<synchronous>, transform_indices = @transform_4, window_bounds = array<i64: 1, 128>}, {pipeline_mode = #tpu.pipeline_mode<synchronous>, transform_indices = @transform_5, window_bounds = array<i64: 1, 128>}]} {
    %c0_i32 = arith.constant 0 : i32
    %0 = arith.cmpi eq, %arg0, %c0_i32 : i32
    %c0_i32_0 = arith.constant 0 : i32
    %1 = arith.cmpi eq, %arg1, %c0_i32_0 : i32
    %2 = arith.andi %0, %1 : i1
    %3 = arith.extui %2 : i1 to i32
    %c0_i32_1 = arith.constant 0 : i32
    %4 = arith.cmpi ne, %3, %c0_i32_1 : i32
    scf.if %4 {
      %cst_340 = arith.constant 0.000000e+00 : f32
      %403 = vector.broadcast %cst_340 : f32 to vector<1x128xf32>
      %c0_341 = arith.constant 0 : index
      %c0_342 = arith.constant 0 : index
      %404 = vector.load %arg6[%c0_341, %c0_342] : memref<1x128xf32, #tpu.memory_space<vmem>>, vector<1x128xf32>
      tpu.vector_store %arg6[%c0_341, %c0_342], %403 {strides = array<i32>} : memref<1x128xf32, #tpu.memory_space<vmem>>, vector<1x128xf32>,
      %cst_343 = arith.constant 0.000000e+00 : f32
      %405 = vector.broadcast %cst_343 : f32 to vector<1x128xf32>
      %c0_344 = arith.constant 0 : index
      %c0_345 = arith.constant 0 : index
      %406 = vector.load %arg7[%c0_344, %c0_345] : memref<1x128xf32, #tpu.memory_space<vmem>>, vector<1x128xf32>
      tpu.vector_store %arg7[%c0_344, %c0_345], %405 {strides = array<i32>} : memref<1x128xf32, #tpu.memory_space<vmem>>, vector<1x128xf32>,
    } else {
    }
    %c4_i32 = arith.constant 4 : i32
    %5 = arith.muli %arg1, %c4_i32 : i32
    %c0 = arith.constant 0 : index
    %c0_2 = arith.constant 0 : index
    %6 = vector.load %arg4[%c0, %c0_2] : memref<1x128xf32, #tpu.memory_space<vmem>>, vector<1x128xf32>
    %c0_i32_3 = arith.constant 0 : i32
    %cst = arith.constant 0.000000e+00 : f32
    %7 = vector.broadcast %cst : f32 to vector<8x128xf32>
    %8 = arith.addi %5, %c0_i32_3 : i32
    %c0_i32_4 = arith.constant 0 : i32
    %9 = arith.addi %8, %c0_i32_4 : i32
    %c0_5 = arith.constant 0 : index
    %10 = arith.index_cast %9 : i32 to index
    %c0_6 = arith.constant 0 : index
    %c0_7 = arith.constant 0 : index
    %11 = vector.load %arg2[%c0_5, %10, %c0_6, %c0_7] : memref<1x10x10x128xbf16, #tpu.memory_space<vmem>>, vector<1x1x8x128xbf16>
    %12 = vector.shape_cast %11 : vector<1x1x8x128xbf16> to vector<8x128xbf16>
    %c0_8 = arith.constant 0 : index
    %c0_9 = arith.constant 0 : index
    %c0_10 = arith.constant 0 : index
    %13 = vector.load %arg3[%c0_8, %c0_9, %c0_10] : memref<9x128x128xbf16, #tpu.memory_space<vmem>>, vector<1x128x128xbf16>
    %14 = vector.shape_cast %13 : vector<1x128x128xbf16> to vector<128x128xbf16>
    %cst_11 = arith.constant dense<0.000000e+00> : vector<8x128xf32>
    %15 = tpu.matmul %12, %14, %cst_11 {dimension_numbers = #tpu.dot_dimension_numbers<[1], [0], [0], [1], [0, 0, 1, 1], [], []>} : vector<8x128xbf16>, vector<128x128xbf16>, vector<8x128xf32> -> vector<8x128xf32>
    %16 = arith.addf %7, %15 : vector<8x128xf32>
    %17 = arith.addi %5, %c0_i32_3 : i32
    %c0_i32_12 = arith.constant 0 : i32
    %18 = arith.addi %17, %c0_i32_12 : i32
    %c0_13 = arith.constant 0 : index
    %19 = arith.index_cast %18 : i32 to index
    %c1 = arith.constant 1 : index
    %c0_14 = arith.constant 0 : index
    %20 = vector.load %arg2[%c0_13, %19, %c1, %c0_14] : memref<1x10x10x128xbf16, #tpu.memory_space<vmem>>, vector<1x1x8x128xbf16>
    %21 = vector.shape_cast %20 : vector<1x1x8x128xbf16> to vector<8x128xbf16>
    %c1_15 = arith.constant 1 : index
    %c0_16 = arith.constant 0 : index
    %c0_17 = arith.constant 0 : index
    %22 = vector.load %arg3[%c1_15, %c0_16, %c0_17] : memref<9x128x128xbf16, #tpu.memory_space<vmem>>, vector<1x128x128xbf16>
    %23 = vector.shape_cast %22 : vector<1x128x128xbf16> to vector<128x128xbf16>
    %cst_18 = arith.constant dense<0.000000e+00> : vector<8x128xf32>
    %24 = tpu.matmul %21, %23, %cst_18 {dimension_numbers = #tpu.dot_dimension_numbers<[1], [0], [0], [1], [0, 0, 1, 1], [], []>} : vector<8x128xbf16>, vector<128x128xbf16>, vector<8x128xf32> -> vector<8x128xf32>
    %25 = arith.addf %16, %24 : vector<8x128xf32>
    %26 = arith.addi %5, %c0_i32_3 : i32
    %c0_i32_19 = arith.constant 0 : i32
    %27 = arith.addi %26, %c0_i32_19 : i32
    %c0_20 = arith.constant 0 : index
    %28 = arith.index_cast %27 : i32 to index
    %c2 = arith.constant 2 : index
    %c0_21 = arith.constant 0 : index
    %29 = vector.load %arg2[%c0_20, %28, %c2, %c0_21] : memref<1x10x10x128xbf16, #tpu.memory_space<vmem>>, vector<1x1x8x128xbf16>
    %30 = vector.shape_cast %29 : vector<1x1x8x128xbf16> to vector<8x128xbf16>
    %c2_22 = arith.constant 2 : index
    %c0_23 = arith.constant 0 : index
    %c0_24 = arith.constant 0 : index
    %31 = vector.load %arg3[%c2_22, %c0_23, %c0_24] : memref<9x128x128xbf16, #tpu.memory_space<vmem>>, vector<1x128x128xbf16>
    %32 = vector.shape_cast %31 : vector<1x128x128xbf16> to vector<128x128xbf16>
    %cst_25 = arith.constant dense<0.000000e+00> : vector<8x128xf32>
    %33 = tpu.matmul %30, %32, %cst_25 {dimension_numbers = #tpu.dot_dimension_numbers<[1], [0], [0], [1], [0, 0, 1, 1], [], []>} : vector<8x128xbf16>, vector<128x128xbf16>, vector<8x128xf32> -> vector<8x128xf32>
    %34 = arith.addf %25, %33 : vector<8x128xf32>
    %35 = arith.addi %5, %c0_i32_3 : i32
    %c1_i32 = arith.constant 1 : i32
    %36 = arith.addi %35, %c1_i32 : i32
    %c0_26 = arith.constant 0 : index
    %37 = arith.index_cast %36 : i32 to index
    %c0_27 = arith.constant 0 : index
    %c0_28 = arith.constant 0 : index
    %38 = vector.load %arg2[%c0_26, %37, %c0_27, %c0_28] : memref<1x10x10x128xbf16, #tpu.memory_space<vmem>>, vector<1x1x8x128xbf16>
    %39 = vector.shape_cast %38 : vector<1x1x8x128xbf16> to vector<8x128xbf16>
    %c3 = arith.constant 3 : index
    %c0_29 = arith.constant 0 : index
    %c0_30 = arith.constant 0 : index
    %40 = vector.load %arg3[%c3, %c0_29, %c0_30] : memref<9x128x128xbf16, #tpu.memory_space<vmem>>, vector<1x128x128xbf16>
    %41 = vector.shape_cast %40 : vector<1x128x128xbf16> to vector<128x128xbf16>
    %cst_31 = arith.constant dense<0.000000e+00> : vector<8x128xf32>
    %42 = tpu.matmul %39, %41, %cst_31 {dimension_numbers = #tpu.dot_dimension_numbers<[1], [0], [0], [1], [0, 0, 1, 1], [], []>} : vector<8x128xbf16>, vector<128x128xbf16>, vector<8x128xf32> -> vector<8x128xf32>
    %43 = arith.addf %34, %42 : vector<8x128xf32>
    %44 = arith.addi %5, %c0_i32_3 : i32
    %c1_i32_32 = arith.constant 1 : i32
    %45 = arith.addi %44, %c1_i32_32 : i32
    %c0_33 = arith.constant 0 : index
    %46 = arith.index_cast %45 : i32 to index
    %c1_34 = arith.constant 1 : index
    %c0_35 = arith.constant 0 : index
    %47 = vector.load %arg2[%c0_33, %46, %c1_34, %c0_35] : memref<1x10x10x128xbf16, #tpu.memory_space<vmem>>, vector<1x1x8x128xbf16>
    %48 = vector.shape_cast %47 : vector<1x1x8x128xbf16> to vector<8x128xbf16>
    %c4 = arith.constant 4 : index
    %c0_36 = arith.constant 0 : index
    %c0_37 = arith.constant 0 : index
    %49 = vector.load %arg3[%c4, %c0_36, %c0_37] : memref<9x128x128xbf16, #tpu.memory_space<vmem>>, vector<1x128x128xbf16>
    %50 = vector.shape_cast %49 : vector<1x128x128xbf16> to vector<128x128xbf16>
    %cst_38 = arith.constant dense<0.000000e+00> : vector<8x128xf32>
    %51 = tpu.matmul %48, %50, %cst_38 {dimension_numbers = #tpu.dot_dimension_numbers<[1], [0], [0], [1], [0, 0, 1, 1], [], []>} : vector<8x128xbf16>, vector<128x128xbf16>, vector<8x128xf32> -> vector<8x128xf32>
    %52 = arith.addf %43, %51 : vector<8x128xf32>
    %53 = arith.addi %5, %c0_i32_3 : i32
    %c1_i32_39 = arith.constant 1 : i32
    %54 = arith.addi %53, %c1_i32_39 : i32
    %c0_40 = arith.constant 0 : index
    %55 = arith.index_cast %54 : i32 to index
    %c2_41 = arith.constant 2 : index
    %c0_42 = arith.constant 0 : index
    %56 = vector.load %arg2[%c0_40, %55, %c2_41, %c0_42] : memref<1x10x10x128xbf16, #tpu.memory_space<vmem>>, vector<1x1x8x128xbf16>
    %57 = vector.shape_cast %56 : vector<1x1x8x128xbf16> to vector<8x128xbf16>
    %c5 = arith.constant 5 : index
    %c0_43 = arith.constant 0 : index
    %c0_44 = arith.constant 0 : index
    %58 = vector.load %arg3[%c5, %c0_43, %c0_44] : memref<9x128x128xbf16, #tpu.memory_space<vmem>>, vector<1x128x128xbf16>
    %59 = vector.shape_cast %58 : vector<1x128x128xbf16> to vector<128x128xbf16>
    %cst_45 = arith.constant dense<0.000000e+00> : vector<8x128xf32>
    %60 = tpu.matmul %57, %59, %cst_45 {dimension_numbers = #tpu.dot_dimension_numbers<[1], [0], [0], [1], [0, 0, 1, 1], [], []>} : vector<8x128xbf16>, vector<128x128xbf16>, vector<8x128xf32> -> vector<8x128xf32>
    %61 = arith.addf %52, %60 : vector<8x128xf32>
    %62 = arith.addi %5, %c0_i32_3 : i32
    %c2_i32 = arith.constant 2 : i32
    %63 = arith.addi %62, %c2_i32 : i32
    %c0_46 = arith.constant 0 : index
    %64 = arith.index_cast %63 : i32 to index
    %c0_47 = arith.constant 0 : index
    %c0_48 = arith.constant 0 : index
    %65 = vector.load %arg2[%c0_46, %64, %c0_47, %c0_48] : memref<1x10x10x128xbf16, #tpu.memory_space<vmem>>, vector<1x1x8x128xbf16>
    %66 = vector.shape_cast %65 : vector<1x1x8x128xbf16> to vector<8x128xbf16>
    %c6 = arith.constant 6 : index
    %c0_49 = arith.constant 0 : index
    %c0_50 = arith.constant 0 : index
    %67 = vector.load %arg3[%c6, %c0_49, %c0_50] : memref<9x128x128xbf16, #tpu.memory_space<vmem>>, vector<1x128x128xbf16>
    %68 = vector.shape_cast %67 : vector<1x128x128xbf16> to vector<128x128xbf16>
    %cst_51 = arith.constant dense<0.000000e+00> : vector<8x128xf32>
    %69 = tpu.matmul %66, %68, %cst_51 {dimension_numbers = #tpu.dot_dimension_numbers<[1], [0], [0], [1], [0, 0, 1, 1], [], []>} : vector<8x128xbf16>, vector<128x128xbf16>, vector<8x128xf32> -> vector<8x128xf32>
    %70 = arith.addf %61, %69 : vector<8x128xf32>
    %71 = arith.addi %5, %c0_i32_3 : i32
    %c2_i32_52 = arith.constant 2 : i32
    %72 = arith.addi %71, %c2_i32_52 : i32
    %c0_53 = arith.constant 0 : index
    %73 = arith.index_cast %72 : i32 to index
    %c1_54 = arith.constant 1 : index
    %c0_55 = arith.constant 0 : index
    %74 = vector.load %arg2[%c0_53, %73, %c1_54, %c0_55] : memref<1x10x10x128xbf16, #tpu.memory_space<vmem>>, vector<1x1x8x128xbf16>
    %75 = vector.shape_cast %74 : vector<1x1x8x128xbf16> to vector<8x128xbf16>
    %c7 = arith.constant 7 : index
    %c0_56 = arith.constant 0 : index
    %c0_57 = arith.constant 0 : index
    %76 = vector.load %arg3[%c7, %c0_56, %c0_57] : memref<9x128x128xbf16, #tpu.memory_space<vmem>>, vector<1x128x128xbf16>
    %77 = vector.shape_cast %76 : vector<1x128x128xbf16> to vector<128x128xbf16>
    %cst_58 = arith.constant dense<0.000000e+00> : vector<8x128xf32>
    %78 = tpu.matmul %75, %77, %cst_58 {dimension_numbers = #tpu.dot_dimension_numbers<[1], [0], [0], [1], [0, 0, 1, 1], [], []>} : vector<8x128xbf16>, vector<128x128xbf16>, vector<8x128xf32> -> vector<8x128xf32>
    %79 = arith.addf %70, %78 : vector<8x128xf32>
    %80 = arith.addi %5, %c0_i32_3 : i32
    %c2_i32_59 = arith.constant 2 : i32
    %81 = arith.addi %80, %c2_i32_59 : i32
    %c0_60 = arith.constant 0 : index
    %82 = arith.index_cast %81 : i32 to index
    %c2_61 = arith.constant 2 : index
    %c0_62 = arith.constant 0 : index
    %83 = vector.load %arg2[%c0_60, %82, %c2_61, %c0_62] : memref<1x10x10x128xbf16, #tpu.memory_space<vmem>>, vector<1x1x8x128xbf16>
    %84 = vector.shape_cast %83 : vector<1x1x8x128xbf16> to vector<8x128xbf16>
    %c8 = arith.constant 8 : index
    %c0_63 = arith.constant 0 : index
    %c0_64 = arith.constant 0 : index
    %85 = vector.load %arg3[%c8, %c0_63, %c0_64] : memref<9x128x128xbf16, #tpu.memory_space<vmem>>, vector<1x128x128xbf16>
    %86 = vector.shape_cast %85 : vector<1x128x128xbf16> to vector<128x128xbf16>
    %cst_65 = arith.constant dense<0.000000e+00> : vector<8x128xf32>
    %87 = tpu.matmul %84, %86, %cst_65 {dimension_numbers = #tpu.dot_dimension_numbers<[1], [0], [0], [1], [0, 0, 1, 1], [], []>} : vector<8x128xbf16>, vector<128x128xbf16>, vector<8x128xf32> -> vector<8x128xf32>
    %88 = arith.addf %79, %87 : vector<8x128xf32>
    %89 = vector.broadcast %6 : vector<1x128xf32> to vector<8x128xf32>
    %90 = arith.addf %88, %89 : vector<8x128xf32>
    %c0_66 = arith.constant 0 : index
    %91 = arith.index_cast %c0_i32_3 : i32 to index
    %c0_67 = arith.constant 0 : index
    %c0_68 = arith.constant 0 : index
    %92 = vector.load %arg5[%c0_66, %91, %c0_67, %c0_68] : memref<1x4x8x128xf32, #tpu.memory_space<vmem>>, vector<1x1x8x128xf32>
    %93 = vector.shape_cast %92 : vector<1x1x8x128xf32> to vector<8x128xf32>
    %94 = vector.shape_cast %90 : vector<8x128xf32> to vector<1x1x8x128xf32>
    tpu.vector_store %arg5[%c0_66, %91, %c0_67, %c0_68], %94 {strides = array<i32>} : memref<1x4x8x128xf32, #tpu.memory_space<vmem>>, vector<1x1x8x128xf32>,
    %c0_69 = arith.constant 0 : index
    %c0_70 = arith.constant 0 : index
    %95 = vector.load %arg6[%c0_69, %c0_70] : memref<1x128xf32, #tpu.memory_space<vmem>>, vector<1x128xf32>
    %cst_71 = arith.constant dense<0.000000e+00> : vector<128xf32>
    %96 = vector.multi_reduction <add>, %90, %cst_71 [0] : vector<8x128xf32> to vector<128xf32>
    %97 = vector.shape_cast %96 : vector<128xf32> to vector<1x128xf32>
    %98 = arith.addf %95, %97 : vector<1x128xf32>
    %c0_72 = arith.constant 0 : index
    %c0_73 = arith.constant 0 : index
    %99 = vector.load %arg6[%c0_72, %c0_73] : memref<1x128xf32, #tpu.memory_space<vmem>>, vector<1x128xf32>
    tpu.vector_store %arg6[%c0_72, %c0_73], %98 {strides = array<i32>} : memref<1x128xf32, #tpu.memory_space<vmem>>, vector<1x128xf32>,
    %c0_74 = arith.constant 0 : index
    %c0_75 = arith.constant 0 : index
    %100 = vector.load %arg7[%c0_74, %c0_75] : memref<1x128xf32, #tpu.memory_space<vmem>>, vector<1x128xf32>
    %101 = arith.mulf %90, %90 : vector<8x128xf32>
    %cst_76 = arith.constant dense<0.000000e+00> : vector<128xf32>
    %102 = vector.multi_reduction <add>, %101, %cst_76 [0] : vector<8x128xf32> to vector<128xf32>
    %103 = vector.shape_cast %102 : vector<128xf32> to vector<1x128xf32>
    %104 = arith.addf %100, %103 : vector<1x128xf32>
    %c0_77 = arith.constant 0 : index
    %c0_78 = arith.constant 0 : index
    %105 = vector.load %arg7[%c0_77, %c0_78] : memref<1x128xf32, #tpu.memory_space<vmem>>, vector<1x128xf32>
    tpu.vector_store %arg7[%c0_77, %c0_78], %104 {strides = array<i32>} : memref<1x128xf32, #tpu.memory_space<vmem>>, vector<1x128xf32>,
    %c1_i32_79 = arith.constant 1 : i32
    %cst_80 = arith.constant 0.000000e+00 : f32
    %106 = vector.broadcast %cst_80 : f32 to vector<8x128xf32>
    %107 = arith.addi %5, %c1_i32_79 : i32
    %c0_i32_81 = arith.constant 0 : i32
    %108 = arith.addi %107, %c0_i32_81 : i32
    %c0_82 = arith.constant 0 : index
    %109 = arith.index_cast %108 : i32 to index
    %c0_83 = arith.constant 0 : index
    %c0_84 = arith.constant 0 : index
    %110 = vector.load %arg2[%c0_82, %109, %c0_83, %c0_84] : memref<1x10x10x128xbf16, #tpu.memory_space<vmem>>, vector<1x1x8x128xbf16>
    %111 = vector.shape_cast %110 : vector<1x1x8x128xbf16> to vector<8x128xbf16>
    %c0_85 = arith.constant 0 : index
    %c0_86 = arith.constant 0 : index
    %c0_87 = arith.constant 0 : index
    %112 = vector.load %arg3[%c0_85, %c0_86, %c0_87] : memref<9x128x128xbf16, #tpu.memory_space<vmem>>, vector<1x128x128xbf16>
    %113 = vector.shape_cast %112 : vector<1x128x128xbf16> to vector<128x128xbf16>
    %cst_88 = arith.constant dense<0.000000e+00> : vector<8x128xf32>
    %114 = tpu.matmul %111, %113, %cst_88 {dimension_numbers = #tpu.dot_dimension_numbers<[1], [0], [0], [1], [0, 0, 1, 1], [], []>} : vector<8x128xbf16>, vector<128x128xbf16>, vector<8x128xf32> -> vector<8x128xf32>
    %115 = arith.addf %106, %114 : vector<8x128xf32>
    %116 = arith.addi %5, %c1_i32_79 : i32
    %c0_i32_89 = arith.constant 0 : i32
    %117 = arith.addi %116, %c0_i32_89 : i32
    %c0_90 = arith.constant 0 : index
    %118 = arith.index_cast %117 : i32 to index
    %c1_91 = arith.constant 1 : index
    %c0_92 = arith.constant 0 : index
    %119 = vector.load %arg2[%c0_90, %118, %c1_91, %c0_92] : memref<1x10x10x128xbf16, #tpu.memory_space<vmem>>, vector<1x1x8x128xbf16>
    %120 = vector.shape_cast %119 : vector<1x1x8x128xbf16> to vector<8x128xbf16>
    %c1_93 = arith.constant 1 : index
    %c0_94 = arith.constant 0 : index
    %c0_95 = arith.constant 0 : index
    %121 = vector.load %arg3[%c1_93, %c0_94, %c0_95] : memref<9x128x128xbf16, #tpu.memory_space<vmem>>, vector<1x128x128xbf16>
    %122 = vector.shape_cast %121 : vector<1x128x128xbf16> to vector<128x128xbf16>
    %cst_96 = arith.constant dense<0.000000e+00> : vector<8x128xf32>
    %123 = tpu.matmul %120, %122, %cst_96 {dimension_numbers = #tpu.dot_dimension_numbers<[1], [0], [0], [1], [0, 0, 1, 1], [], []>} : vector<8x128xbf16>, vector<128x128xbf16>, vector<8x128xf32> -> vector<8x128xf32>
    %124 = arith.addf %115, %123 : vector<8x128xf32>
    %125 = arith.addi %5, %c1_i32_79 : i32
    %c0_i32_97 = arith.constant 0 : i32
    %126 = arith.addi %125, %c0_i32_97 : i32
    %c0_98 = arith.constant 0 : index
    %127 = arith.index_cast %126 : i32 to index
    %c2_99 = arith.constant 2 : index
    %c0_100 = arith.constant 0 : index
    %128 = vector.load %arg2[%c0_98, %127, %c2_99, %c0_100] : memref<1x10x10x128xbf16, #tpu.memory_space<vmem>>, vector<1x1x8x128xbf16>
    %129 = vector.shape_cast %128 : vector<1x1x8x128xbf16> to vector<8x128xbf16>
    %c2_101 = arith.constant 2 : index
    %c0_102 = arith.constant 0 : index
    %c0_103 = arith.constant 0 : index
    %130 = vector.load %arg3[%c2_101, %c0_102, %c0_103] : memref<9x128x128xbf16, #tpu.memory_space<vmem>>, vector<1x128x128xbf16>
    %131 = vector.shape_cast %130 : vector<1x128x128xbf16> to vector<128x128xbf16>
    %cst_104 = arith.constant dense<0.000000e+00> : vector<8x128xf32>
    %132 = tpu.matmul %129, %131, %cst_104 {dimension_numbers = #tpu.dot_dimension_numbers<[1], [0], [0], [1], [0, 0, 1, 1], [], []>} : vector<8x128xbf16>, vector<128x128xbf16>, vector<8x128xf32> -> vector<8x128xf32>
    %133 = arith.addf %124, %132 : vector<8x128xf32>
    %134 = arith.addi %5, %c1_i32_79 : i32
    %c1_i32_105 = arith.constant 1 : i32
    %135 = arith.addi %134, %c1_i32_105 : i32
    %c0_106 = arith.constant 0 : index
    %136 = arith.index_cast %135 : i32 to index
    %c0_107 = arith.constant 0 : index
    %c0_108 = arith.constant 0 : index
    %137 = vector.load %arg2[%c0_106, %136, %c0_107, %c0_108] : memref<1x10x10x128xbf16, #tpu.memory_space<vmem>>, vector<1x1x8x128xbf16>
    %138 = vector.shape_cast %137 : vector<1x1x8x128xbf16> to vector<8x128xbf16>
    %c3_109 = arith.constant 3 : index
    %c0_110 = arith.constant 0 : index
    %c0_111 = arith.constant 0 : index
    %139 = vector.load %arg3[%c3_109, %c0_110, %c0_111] : memref<9x128x128xbf16, #tpu.memory_space<vmem>>, vector<1x128x128xbf16>
    %140 = vector.shape_cast %139 : vector<1x128x128xbf16> to vector<128x128xbf16>
    %cst_112 = arith.constant dense<0.000000e+00> : vector<8x128xf32>
    %141 = tpu.matmul %138, %140, %cst_112 {dimension_numbers = #tpu.dot_dimension_numbers<[1], [0], [0], [1], [0, 0, 1, 1], [], []>} : vector<8x128xbf16>, vector<128x128xbf16>, vector<8x128xf32> -> vector<8x128xf32>
    %142 = arith.addf %133, %141 : vector<8x128xf32>
    %143 = arith.addi %5, %c1_i32_79 : i32
    %c1_i32_113 = arith.constant 1 : i32
    %144 = arith.addi %143, %c1_i32_113 : i32
    %c0_114 = arith.constant 0 : index
    %145 = arith.index_cast %144 : i32 to index
    %c1_115 = arith.constant 1 : index
    %c0_116 = arith.constant 0 : index
    %146 = vector.load %arg2[%c0_114, %145, %c1_115, %c0_116] : memref<1x10x10x128xbf16, #tpu.memory_space<vmem>>, vector<1x1x8x128xbf16>
    %147 = vector.shape_cast %146 : vector<1x1x8x128xbf16> to vector<8x128xbf16>
    %c4_117 = arith.constant 4 : index
    %c0_118 = arith.constant 0 : index
    %c0_119 = arith.constant 0 : index
    %148 = vector.load %arg3[%c4_117, %c0_118, %c0_119] : memref<9x128x128xbf16, #tpu.memory_space<vmem>>, vector<1x128x128xbf16>
    %149 = vector.shape_cast %148 : vector<1x128x128xbf16> to vector<128x128xbf16>
    %cst_120 = arith.constant dense<0.000000e+00> : vector<8x128xf32>
    %150 = tpu.matmul %147, %149, %cst_120 {dimension_numbers = #tpu.dot_dimension_numbers<[1], [0], [0], [1], [0, 0, 1, 1], [], []>} : vector<8x128xbf16>, vector<128x128xbf16>, vector<8x128xf32> -> vector<8x128xf32>
    %151 = arith.addf %142, %150 : vector<8x128xf32>
    %152 = arith.addi %5, %c1_i32_79 : i32
    %c1_i32_121 = arith.constant 1 : i32
    %153 = arith.addi %152, %c1_i32_121 : i32
    %c0_122 = arith.constant 0 : index
    %154 = arith.index_cast %153 : i32 to index
    %c2_123 = arith.constant 2 : index
    %c0_124 = arith.constant 0 : index
    %155 = vector.load %arg2[%c0_122, %154, %c2_123, %c0_124] : memref<1x10x10x128xbf16, #tpu.memory_space<vmem>>, vector<1x1x8x128xbf16>
    %156 = vector.shape_cast %155 : vector<1x1x8x128xbf16> to vector<8x128xbf16>
    %c5_125 = arith.constant 5 : index
    %c0_126 = arith.constant 0 : index
    %c0_127 = arith.constant 0 : index
    %157 = vector.load %arg3[%c5_125, %c0_126, %c0_127] : memref<9x128x128xbf16, #tpu.memory_space<vmem>>, vector<1x128x128xbf16>
    %158 = vector.shape_cast %157 : vector<1x128x128xbf16> to vector<128x128xbf16>
    %cst_128 = arith.constant dense<0.000000e+00> : vector<8x128xf32>
    %159 = tpu.matmul %156, %158, %cst_128 {dimension_numbers = #tpu.dot_dimension_numbers<[1], [0], [0], [1], [0, 0, 1, 1], [], []>} : vector<8x128xbf16>, vector<128x128xbf16>, vector<8x128xf32> -> vector<8x128xf32>
    %160 = arith.addf %151, %159 : vector<8x128xf32>
    %161 = arith.addi %5, %c1_i32_79 : i32
    %c2_i32_129 = arith.constant 2 : i32
    %162 = arith.addi %161, %c2_i32_129 : i32
    %c0_130 = arith.constant 0 : index
    %163 = arith.index_cast %162 : i32 to index
    %c0_131 = arith.constant 0 : index
    %c0_132 = arith.constant 0 : index
    %164 = vector.load %arg2[%c0_130, %163, %c0_131, %c0_132] : memref<1x10x10x128xbf16, #tpu.memory_space<vmem>>, vector<1x1x8x128xbf16>
    %165 = vector.shape_cast %164 : vector<1x1x8x128xbf16> to vector<8x128xbf16>
    %c6_133 = arith.constant 6 : index
    %c0_134 = arith.constant 0 : index
    %c0_135 = arith.constant 0 : index
    %166 = vector.load %arg3[%c6_133, %c0_134, %c0_135] : memref<9x128x128xbf16, #tpu.memory_space<vmem>>, vector<1x128x128xbf16>
    %167 = vector.shape_cast %166 : vector<1x128x128xbf16> to vector<128x128xbf16>
    %cst_136 = arith.constant dense<0.000000e+00> : vector<8x128xf32>
    %168 = tpu.matmul %165, %167, %cst_136 {dimension_numbers = #tpu.dot_dimension_numbers<[1], [0], [0], [1], [0, 0, 1, 1], [], []>} : vector<8x128xbf16>, vector<128x128xbf16>, vector<8x128xf32> -> vector<8x128xf32>
    %169 = arith.addf %160, %168 : vector<8x128xf32>
    %170 = arith.addi %5, %c1_i32_79 : i32
    %c2_i32_137 = arith.constant 2 : i32
    %171 = arith.addi %170, %c2_i32_137 : i32
    %c0_138 = arith.constant 0 : index
    %172 = arith.index_cast %171 : i32 to index
    %c1_139 = arith.constant 1 : index
    %c0_140 = arith.constant 0 : index
    %173 = vector.load %arg2[%c0_138, %172, %c1_139, %c0_140] : memref<1x10x10x128xbf16, #tpu.memory_space<vmem>>, vector<1x1x8x128xbf16>
    %174 = vector.shape_cast %173 : vector<1x1x8x128xbf16> to vector<8x128xbf16>
    %c7_141 = arith.constant 7 : index
    %c0_142 = arith.constant 0 : index
    %c0_143 = arith.constant 0 : index
    %175 = vector.load %arg3[%c7_141, %c0_142, %c0_143] : memref<9x128x128xbf16, #tpu.memory_space<vmem>>, vector<1x128x128xbf16>
    %176 = vector.shape_cast %175 : vector<1x128x128xbf16> to vector<128x128xbf16>
    %cst_144 = arith.constant dense<0.000000e+00> : vector<8x128xf32>
    %177 = tpu.matmul %174, %176, %cst_144 {dimension_numbers = #tpu.dot_dimension_numbers<[1], [0], [0], [1], [0, 0, 1, 1], [], []>} : vector<8x128xbf16>, vector<128x128xbf16>, vector<8x128xf32> -> vector<8x128xf32>
    %178 = arith.addf %169, %177 : vector<8x128xf32>
    %179 = arith.addi %5, %c1_i32_79 : i32
    %c2_i32_145 = arith.constant 2 : i32
    %180 = arith.addi %179, %c2_i32_145 : i32
    %c0_146 = arith.constant 0 : index
    %181 = arith.index_cast %180 : i32 to index
    %c2_147 = arith.constant 2 : index
    %c0_148 = arith.constant 0 : index
    %182 = vector.load %arg2[%c0_146, %181, %c2_147, %c0_148] : memref<1x10x10x128xbf16, #tpu.memory_space<vmem>>, vector<1x1x8x128xbf16>
    %183 = vector.shape_cast %182 : vector<1x1x8x128xbf16> to vector<8x128xbf16>
    %c8_149 = arith.constant 8 : index
    %c0_150 = arith.constant 0 : index
    %c0_151 = arith.constant 0 : index
    %184 = vector.load %arg3[%c8_149, %c0_150, %c0_151] : memref<9x128x128xbf16, #tpu.memory_space<vmem>>, vector<1x128x128xbf16>
    %185 = vector.shape_cast %184 : vector<1x128x128xbf16> to vector<128x128xbf16>
    %cst_152 = arith.constant dense<0.000000e+00> : vector<8x128xf32>
    %186 = tpu.matmul %183, %185, %cst_152 {dimension_numbers = #tpu.dot_dimension_numbers<[1], [0], [0], [1], [0, 0, 1, 1], [], []>} : vector<8x128xbf16>, vector<128x128xbf16>, vector<8x128xf32> -> vector<8x128xf32>
    %187 = arith.addf %178, %186 : vector<8x128xf32>
    %188 = vector.broadcast %6 : vector<1x128xf32> to vector<8x128xf32>
    %189 = arith.addf %187, %188 : vector<8x128xf32>
    %c0_153 = arith.constant 0 : index
    %190 = arith.index_cast %c1_i32_79 : i32 to index
    %c0_154 = arith.constant 0 : index
    %c0_155 = arith.constant 0 : index
    %191 = vector.load %arg5[%c0_153, %190, %c0_154, %c0_155] : memref<1x4x8x128xf32, #tpu.memory_space<vmem>>, vector<1x1x8x128xf32>
    %192 = vector.shape_cast %191 : vector<1x1x8x128xf32> to vector<8x128xf32>
    %193 = vector.shape_cast %189 : vector<8x128xf32> to vector<1x1x8x128xf32>
    tpu.vector_store %arg5[%c0_153, %190, %c0_154, %c0_155], %193 {strides = array<i32>} : memref<1x4x8x128xf32, #tpu.memory_space<vmem>>, vector<1x1x8x128xf32>,
    %c0_156 = arith.constant 0 : index
    %c0_157 = arith.constant 0 : index
    %194 = vector.load %arg6[%c0_156, %c0_157] : memref<1x128xf32, #tpu.memory_space<vmem>>, vector<1x128xf32>
    %cst_158 = arith.constant dense<0.000000e+00> : vector<128xf32>
    %195 = vector.multi_reduction <add>, %189, %cst_158 [0] : vector<8x128xf32> to vector<128xf32>
    %196 = vector.shape_cast %195 : vector<128xf32> to vector<1x128xf32>
    %197 = arith.addf %194, %196 : vector<1x128xf32>
    %c0_159 = arith.constant 0 : index
    %c0_160 = arith.constant 0 : index
    %198 = vector.load %arg6[%c0_159, %c0_160] : memref<1x128xf32, #tpu.memory_space<vmem>>, vector<1x128xf32>
    tpu.vector_store %arg6[%c0_159, %c0_160], %197 {strides = array<i32>} : memref<1x128xf32, #tpu.memory_space<vmem>>, vector<1x128xf32>,
    %c0_161 = arith.constant 0 : index
    %c0_162 = arith.constant 0 : index
    %199 = vector.load %arg7[%c0_161, %c0_162] : memref<1x128xf32, #tpu.memory_space<vmem>>, vector<1x128xf32>
    %200 = arith.mulf %189, %189 : vector<8x128xf32>
    %cst_163 = arith.constant dense<0.000000e+00> : vector<128xf32>
    %201 = vector.multi_reduction <add>, %200, %cst_163 [0] : vector<8x128xf32> to vector<128xf32>
    %202 = vector.shape_cast %201 : vector<128xf32> to vector<1x128xf32>
    %203 = arith.addf %199, %202 : vector<1x128xf32>
    %c0_164 = arith.constant 0 : index
    %c0_165 = arith.constant 0 : index
    %204 = vector.load %arg7[%c0_164, %c0_165] : memref<1x128xf32, #tpu.memory_space<vmem>>, vector<1x128xf32>
    tpu.vector_store %arg7[%c0_164, %c0_165], %203 {strides = array<i32>} : memref<1x128xf32, #tpu.memory_space<vmem>>, vector<1x128xf32>,
    %c2_i32_166 = arith.constant 2 : i32
    %cst_167 = arith.constant 0.000000e+00 : f32
    %205 = vector.broadcast %cst_167 : f32 to vector<8x128xf32>
    %206 = arith.addi %5, %c2_i32_166 : i32
    %c0_i32_168 = arith.constant 0 : i32
    %207 = arith.addi %206, %c0_i32_168 : i32
    %c0_169 = arith.constant 0 : index
    %208 = arith.index_cast %207 : i32 to index
    %c0_170 = arith.constant 0 : index
    %c0_171 = arith.constant 0 : index
    %209 = vector.load %arg2[%c0_169, %208, %c0_170, %c0_171] : memref<1x10x10x128xbf16, #tpu.memory_space<vmem>>, vector<1x1x8x128xbf16>
    %210 = vector.shape_cast %209 : vector<1x1x8x128xbf16> to vector<8x128xbf16>
    %c0_172 = arith.constant 0 : index
    %c0_173 = arith.constant 0 : index
    %c0_174 = arith.constant 0 : index
    %211 = vector.load %arg3[%c0_172, %c0_173, %c0_174] : memref<9x128x128xbf16, #tpu.memory_space<vmem>>, vector<1x128x128xbf16>
    %212 = vector.shape_cast %211 : vector<1x128x128xbf16> to vector<128x128xbf16>
    %cst_175 = arith.constant dense<0.000000e+00> : vector<8x128xf32>
    %213 = tpu.matmul %210, %212, %cst_175 {dimension_numbers = #tpu.dot_dimension_numbers<[1], [0], [0], [1], [0, 0, 1, 1], [], []>} : vector<8x128xbf16>, vector<128x128xbf16>, vector<8x128xf32> -> vector<8x128xf32>
    %214 = arith.addf %205, %213 : vector<8x128xf32>
    %215 = arith.addi %5, %c2_i32_166 : i32
    %c0_i32_176 = arith.constant 0 : i32
    %216 = arith.addi %215, %c0_i32_176 : i32
    %c0_177 = arith.constant 0 : index
    %217 = arith.index_cast %216 : i32 to index
    %c1_178 = arith.constant 1 : index
    %c0_179 = arith.constant 0 : index
    %218 = vector.load %arg2[%c0_177, %217, %c1_178, %c0_179] : memref<1x10x10x128xbf16, #tpu.memory_space<vmem>>, vector<1x1x8x128xbf16>
    %219 = vector.shape_cast %218 : vector<1x1x8x128xbf16> to vector<8x128xbf16>
    %c1_180 = arith.constant 1 : index
    %c0_181 = arith.constant 0 : index
    %c0_182 = arith.constant 0 : index
    %220 = vector.load %arg3[%c1_180, %c0_181, %c0_182] : memref<9x128x128xbf16, #tpu.memory_space<vmem>>, vector<1x128x128xbf16>
    %221 = vector.shape_cast %220 : vector<1x128x128xbf16> to vector<128x128xbf16>
    %cst_183 = arith.constant dense<0.000000e+00> : vector<8x128xf32>
    %222 = tpu.matmul %219, %221, %cst_183 {dimension_numbers = #tpu.dot_dimension_numbers<[1], [0], [0], [1], [0, 0, 1, 1], [], []>} : vector<8x128xbf16>, vector<128x128xbf16>, vector<8x128xf32> -> vector<8x128xf32>
    %223 = arith.addf %214, %222 : vector<8x128xf32>
    %224 = arith.addi %5, %c2_i32_166 : i32
    %c0_i32_184 = arith.constant 0 : i32
    %225 = arith.addi %224, %c0_i32_184 : i32
    %c0_185 = arith.constant 0 : index
    %226 = arith.index_cast %225 : i32 to index
    %c2_186 = arith.constant 2 : index
    %c0_187 = arith.constant 0 : index
    %227 = vector.load %arg2[%c0_185, %226, %c2_186, %c0_187] : memref<1x10x10x128xbf16, #tpu.memory_space<vmem>>, vector<1x1x8x128xbf16>
    %228 = vector.shape_cast %227 : vector<1x1x8x128xbf16> to vector<8x128xbf16>
    %c2_188 = arith.constant 2 : index
    %c0_189 = arith.constant 0 : index
    %c0_190 = arith.constant 0 : index
    %229 = vector.load %arg3[%c2_188, %c0_189, %c0_190] : memref<9x128x128xbf16, #tpu.memory_space<vmem>>, vector<1x128x128xbf16>
    %230 = vector.shape_cast %229 : vector<1x128x128xbf16> to vector<128x128xbf16>
    %cst_191 = arith.constant dense<0.000000e+00> : vector<8x128xf32>
    %231 = tpu.matmul %228, %230, %cst_191 {dimension_numbers = #tpu.dot_dimension_numbers<[1], [0], [0], [1], [0, 0, 1, 1], [], []>} : vector<8x128xbf16>, vector<128x128xbf16>, vector<8x128xf32> -> vector<8x128xf32>
    %232 = arith.addf %223, %231 : vector<8x128xf32>
    %233 = arith.addi %5, %c2_i32_166 : i32
    %c1_i32_192 = arith.constant 1 : i32
    %234 = arith.addi %233, %c1_i32_192 : i32
    %c0_193 = arith.constant 0 : index
    %235 = arith.index_cast %234 : i32 to index
    %c0_194 = arith.constant 0 : index
    %c0_195 = arith.constant 0 : index
    %236 = vector.load %arg2[%c0_193, %235, %c0_194, %c0_195] : memref<1x10x10x128xbf16, #tpu.memory_space<vmem>>, vector<1x1x8x128xbf16>
    %237 = vector.shape_cast %236 : vector<1x1x8x128xbf16> to vector<8x128xbf16>
    %c3_196 = arith.constant 3 : index
    %c0_197 = arith.constant 0 : index
    %c0_198 = arith.constant 0 : index
    %238 = vector.load %arg3[%c3_196, %c0_197, %c0_198] : memref<9x128x128xbf16, #tpu.memory_space<vmem>>, vector<1x128x128xbf16>
    %239 = vector.shape_cast %238 : vector<1x128x128xbf16> to vector<128x128xbf16>
    %cst_199 = arith.constant dense<0.000000e+00> : vector<8x128xf32>
    %240 = tpu.matmul %237, %239, %cst_199 {dimension_numbers = #tpu.dot_dimension_numbers<[1], [0], [0], [1], [0, 0, 1, 1], [], []>} : vector<8x128xbf16>, vector<128x128xbf16>, vector<8x128xf32> -> vector<8x128xf32>
    %241 = arith.addf %232, %240 : vector<8x128xf32>
    %242 = arith.addi %5, %c2_i32_166 : i32
    %c1_i32_200 = arith.constant 1 : i32
    %243 = arith.addi %242, %c1_i32_200 : i32
    %c0_201 = arith.constant 0 : index
    %244 = arith.index_cast %243 : i32 to index
    %c1_202 = arith.constant 1 : index
    %c0_203 = arith.constant 0 : index
    %245 = vector.load %arg2[%c0_201, %244, %c1_202, %c0_203] : memref<1x10x10x128xbf16, #tpu.memory_space<vmem>>, vector<1x1x8x128xbf16>
    %246 = vector.shape_cast %245 : vector<1x1x8x128xbf16> to vector<8x128xbf16>
    %c4_204 = arith.constant 4 : index
    %c0_205 = arith.constant 0 : index
    %c0_206 = arith.constant 0 : index
    %247 = vector.load %arg3[%c4_204, %c0_205, %c0_206] : memref<9x128x128xbf16, #tpu.memory_space<vmem>>, vector<1x128x128xbf16>
    %248 = vector.shape_cast %247 : vector<1x128x128xbf16> to vector<128x128xbf16>
    %cst_207 = arith.constant dense<0.000000e+00> : vector<8x128xf32>
    %249 = tpu.matmul %246, %248, %cst_207 {dimension_numbers = #tpu.dot_dimension_numbers<[1], [0], [0], [1], [0, 0, 1, 1], [], []>} : vector<8x128xbf16>, vector<128x128xbf16>, vector<8x128xf32> -> vector<8x128xf32>
    %250 = arith.addf %241, %249 : vector<8x128xf32>
    %251 = arith.addi %5, %c2_i32_166 : i32
    %c1_i32_208 = arith.constant 1 : i32
    %252 = arith.addi %251, %c1_i32_208 : i32
    %c0_209 = arith.constant 0 : index
    %253 = arith.index_cast %252 : i32 to index
    %c2_210 = arith.constant 2 : index
    %c0_211 = arith.constant 0 : index
    %254 = vector.load %arg2[%c0_209, %253, %c2_210, %c0_211] : memref<1x10x10x128xbf16, #tpu.memory_space<vmem>>, vector<1x1x8x128xbf16>
    %255 = vector.shape_cast %254 : vector<1x1x8x128xbf16> to vector<8x128xbf16>
    %c5_212 = arith.constant 5 : index
    %c0_213 = arith.constant 0 : index
    %c0_214 = arith.constant 0 : index
    %256 = vector.load %arg3[%c5_212, %c0_213, %c0_214] : memref<9x128x128xbf16, #tpu.memory_space<vmem>>, vector<1x128x128xbf16>
    %257 = vector.shape_cast %256 : vector<1x128x128xbf16> to vector<128x128xbf16>
    %cst_215 = arith.constant dense<0.000000e+00> : vector<8x128xf32>
    %258 = tpu.matmul %255, %257, %cst_215 {dimension_numbers = #tpu.dot_dimension_numbers<[1], [0], [0], [1], [0, 0, 1, 1], [], []>} : vector<8x128xbf16>, vector<128x128xbf16>, vector<8x128xf32> -> vector<8x128xf32>
    %259 = arith.addf %250, %258 : vector<8x128xf32>
    %260 = arith.addi %5, %c2_i32_166 : i32
    %c2_i32_216 = arith.constant 2 : i32
    %261 = arith.addi %260, %c2_i32_216 : i32
    %c0_217 = arith.constant 0 : index
    %262 = arith.index_cast %261 : i32 to index
    %c0_218 = arith.constant 0 : index
    %c0_219 = arith.constant 0 : index
    %263 = vector.load %arg2[%c0_217, %262, %c0_218, %c0_219] : memref<1x10x10x128xbf16, #tpu.memory_space<vmem>>, vector<1x1x8x128xbf16>
    %264 = vector.shape_cast %263 : vector<1x1x8x128xbf16> to vector<8x128xbf16>
    %c6_220 = arith.constant 6 : index
    %c0_221 = arith.constant 0 : index
    %c0_222 = arith.constant 0 : index
    %265 = vector.load %arg3[%c6_220, %c0_221, %c0_222] : memref<9x128x128xbf16, #tpu.memory_space<vmem>>, vector<1x128x128xbf16>
    %266 = vector.shape_cast %265 : vector<1x128x128xbf16> to vector<128x128xbf16>
    %cst_223 = arith.constant dense<0.000000e+00> : vector<8x128xf32>
    %267 = tpu.matmul %264, %266, %cst_223 {dimension_numbers = #tpu.dot_dimension_numbers<[1], [0], [0], [1], [0, 0, 1, 1], [], []>} : vector<8x128xbf16>, vector<128x128xbf16>, vector<8x128xf32> -> vector<8x128xf32>
    %268 = arith.addf %259, %267 : vector<8x128xf32>
    %269 = arith.addi %5, %c2_i32_166 : i32
    %c2_i32_224 = arith.constant 2 : i32
    %270 = arith.addi %269, %c2_i32_224 : i32
    %c0_225 = arith.constant 0 : index
    %271 = arith.index_cast %270 : i32 to index
    %c1_226 = arith.constant 1 : index
    %c0_227 = arith.constant 0 : index
    %272 = vector.load %arg2[%c0_225, %271, %c1_226, %c0_227] : memref<1x10x10x128xbf16, #tpu.memory_space<vmem>>, vector<1x1x8x128xbf16>
    %273 = vector.shape_cast %272 : vector<1x1x8x128xbf16> to vector<8x128xbf16>
    %c7_228 = arith.constant 7 : index
    %c0_229 = arith.constant 0 : index
    %c0_230 = arith.constant 0 : index
    %274 = vector.load %arg3[%c7_228, %c0_229, %c0_230] : memref<9x128x128xbf16, #tpu.memory_space<vmem>>, vector<1x128x128xbf16>
    %275 = vector.shape_cast %274 : vector<1x128x128xbf16> to vector<128x128xbf16>
    %cst_231 = arith.constant dense<0.000000e+00> : vector<8x128xf32>
    %276 = tpu.matmul %273, %275, %cst_231 {dimension_numbers = #tpu.dot_dimension_numbers<[1], [0], [0], [1], [0, 0, 1, 1], [], []>} : vector<8x128xbf16>, vector<128x128xbf16>, vector<8x128xf32> -> vector<8x128xf32>
    %277 = arith.addf %268, %276 : vector<8x128xf32>
    %278 = arith.addi %5, %c2_i32_166 : i32
    %c2_i32_232 = arith.constant 2 : i32
    %279 = arith.addi %278, %c2_i32_232 : i32
    %c0_233 = arith.constant 0 : index
    %280 = arith.index_cast %279 : i32 to index
    %c2_234 = arith.constant 2 : index
    %c0_235 = arith.constant 0 : index
    %281 = vector.load %arg2[%c0_233, %280, %c2_234, %c0_235] : memref<1x10x10x128xbf16, #tpu.memory_space<vmem>>, vector<1x1x8x128xbf16>
    %282 = vector.shape_cast %281 : vector<1x1x8x128xbf16> to vector<8x128xbf16>
    %c8_236 = arith.constant 8 : index
    %c0_237 = arith.constant 0 : index
    %c0_238 = arith.constant 0 : index
    %283 = vector.load %arg3[%c8_236, %c0_237, %c0_238] : memref<9x128x128xbf16, #tpu.memory_space<vmem>>, vector<1x128x128xbf16>
    %284 = vector.shape_cast %283 : vector<1x128x128xbf16> to vector<128x128xbf16>
    %cst_239 = arith.constant dense<0.000000e+00> : vector<8x128xf32>
    %285 = tpu.matmul %282, %284, %cst_239 {dimension_numbers = #tpu.dot_dimension_numbers<[1], [0], [0], [1], [0, 0, 1, 1], [], []>} : vector<8x128xbf16>, vector<128x128xbf16>, vector<8x128xf32> -> vector<8x128xf32>
    %286 = arith.addf %277, %285 : vector<8x128xf32>
    %287 = vector.broadcast %6 : vector<1x128xf32> to vector<8x128xf32>
    %288 = arith.addf %286, %287 : vector<8x128xf32>
    %c0_240 = arith.constant 0 : index
    %289 = arith.index_cast %c2_i32_166 : i32 to index
    %c0_241 = arith.constant 0 : index
    %c0_242 = arith.constant 0 : index
    %290 = vector.load %arg5[%c0_240, %289, %c0_241, %c0_242] : memref<1x4x8x128xf32, #tpu.memory_space<vmem>>, vector<1x1x8x128xf32>
    %291 = vector.shape_cast %290 : vector<1x1x8x128xf32> to vector<8x128xf32>
    %292 = vector.shape_cast %288 : vector<8x128xf32> to vector<1x1x8x128xf32>
    tpu.vector_store %arg5[%c0_240, %289, %c0_241, %c0_242], %292 {strides = array<i32>} : memref<1x4x8x128xf32, #tpu.memory_space<vmem>>, vector<1x1x8x128xf32>,
    %c0_243 = arith.constant 0 : index
    %c0_244 = arith.constant 0 : index
    %293 = vector.load %arg6[%c0_243, %c0_244] : memref<1x128xf32, #tpu.memory_space<vmem>>, vector<1x128xf32>
    %cst_245 = arith.constant dense<0.000000e+00> : vector<128xf32>
    %294 = vector.multi_reduction <add>, %288, %cst_245 [0] : vector<8x128xf32> to vector<128xf32>
    %295 = vector.shape_cast %294 : vector<128xf32> to vector<1x128xf32>
    %296 = arith.addf %293, %295 : vector<1x128xf32>
    %c0_246 = arith.constant 0 : index
    %c0_247 = arith.constant 0 : index
    %297 = vector.load %arg6[%c0_246, %c0_247] : memref<1x128xf32, #tpu.memory_space<vmem>>, vector<1x128xf32>
    tpu.vector_store %arg6[%c0_246, %c0_247], %296 {strides = array<i32>} : memref<1x128xf32, #tpu.memory_space<vmem>>, vector<1x128xf32>,
    %c0_248 = arith.constant 0 : index
    %c0_249 = arith.constant 0 : index
    %298 = vector.load %arg7[%c0_248, %c0_249] : memref<1x128xf32, #tpu.memory_space<vmem>>, vector<1x128xf32>
    %299 = arith.mulf %288, %288 : vector<8x128xf32>
    %cst_250 = arith.constant dense<0.000000e+00> : vector<128xf32>
    %300 = vector.multi_reduction <add>, %299, %cst_250 [0] : vector<8x128xf32> to vector<128xf32>
    %301 = vector.shape_cast %300 : vector<128xf32> to vector<1x128xf32>
    %302 = arith.addf %298, %301 : vector<1x128xf32>
    %c0_251 = arith.constant 0 : index
    %c0_252 = arith.constant 0 : index
    %303 = vector.load %arg7[%c0_251, %c0_252] : memref<1x128xf32, #tpu.memory_space<vmem>>, vector<1x128xf32>
    tpu.vector_store %arg7[%c0_251, %c0_252], %302 {strides = array<i32>} : memref<1x128xf32, #tpu.memory_space<vmem>>, vector<1x128xf32>,
    %c3_i32 = arith.constant 3 : i32
    %cst_253 = arith.constant 0.000000e+00 : f32
    %304 = vector.broadcast %cst_253 : f32 to vector<8x128xf32>
    %305 = arith.addi %5, %c3_i32 : i32
    %c0_i32_254 = arith.constant 0 : i32
    %306 = arith.addi %305, %c0_i32_254 : i32
    %c0_255 = arith.constant 0 : index
    %307 = arith.index_cast %306 : i32 to index
    %c0_256 = arith.constant 0 : index
    %c0_257 = arith.constant 0 : index
    %308 = vector.load %arg2[%c0_255, %307, %c0_256, %c0_257] : memref<1x10x10x128xbf16, #tpu.memory_space<vmem>>, vector<1x1x8x128xbf16>
    %309 = vector.shape_cast %308 : vector<1x1x8x128xbf16> to vector<8x128xbf16>
    %c0_258 = arith.constant 0 : index
    %c0_259 = arith.constant 0 : index
    %c0_260 = arith.constant 0 : index
    %310 = vector.load %arg3[%c0_258, %c0_259, %c0_260] : memref<9x128x128xbf16, #tpu.memory_space<vmem>>, vector<1x128x128xbf16>
    %311 = vector.shape_cast %310 : vector<1x128x128xbf16> to vector<128x128xbf16>
    %cst_261 = arith.constant dense<0.000000e+00> : vector<8x128xf32>
    %312 = tpu.matmul %309, %311, %cst_261 {dimension_numbers = #tpu.dot_dimension_numbers<[1], [0], [0], [1], [0, 0, 1, 1], [], []>} : vector<8x128xbf16>, vector<128x128xbf16>, vector<8x128xf32> -> vector<8x128xf32>
    %313 = arith.addf %304, %312 : vector<8x128xf32>
    %314 = arith.addi %5, %c3_i32 : i32
    %c0_i32_262 = arith.constant 0 : i32
    %315 = arith.addi %314, %c0_i32_262 : i32
    %c0_263 = arith.constant 0 : index
    %316 = arith.index_cast %315 : i32 to index
    %c1_264 = arith.constant 1 : index
    %c0_265 = arith.constant 0 : index
    %317 = vector.load %arg2[%c0_263, %316, %c1_264, %c0_265] : memref<1x10x10x128xbf16, #tpu.memory_space<vmem>>, vector<1x1x8x128xbf16>
    %318 = vector.shape_cast %317 : vector<1x1x8x128xbf16> to vector<8x128xbf16>
    %c1_266 = arith.constant 1 : index
    %c0_267 = arith.constant 0 : index
    %c0_268 = arith.constant 0 : index
    %319 = vector.load %arg3[%c1_266, %c0_267, %c0_268] : memref<9x128x128xbf16, #tpu.memory_space<vmem>>, vector<1x128x128xbf16>
    %320 = vector.shape_cast %319 : vector<1x128x128xbf16> to vector<128x128xbf16>
    %cst_269 = arith.constant dense<0.000000e+00> : vector<8x128xf32>
    %321 = tpu.matmul %318, %320, %cst_269 {dimension_numbers = #tpu.dot_dimension_numbers<[1], [0], [0], [1], [0, 0, 1, 1], [], []>} : vector<8x128xbf16>, vector<128x128xbf16>, vector<8x128xf32> -> vector<8x128xf32>
    %322 = arith.addf %313, %321 : vector<8x128xf32>
    %323 = arith.addi %5, %c3_i32 : i32
    %c0_i32_270 = arith.constant 0 : i32
    %324 = arith.addi %323, %c0_i32_270 : i32
    %c0_271 = arith.constant 0 : index
    %325 = arith.index_cast %324 : i32 to index
    %c2_272 = arith.constant 2 : index
    %c0_273 = arith.constant 0 : index
    %326 = vector.load %arg2[%c0_271, %325, %c2_272, %c0_273] : memref<1x10x10x128xbf16, #tpu.memory_space<vmem>>, vector<1x1x8x128xbf16>
    %327 = vector.shape_cast %326 : vector<1x1x8x128xbf16> to vector<8x128xbf16>
    %c2_274 = arith.constant 2 : index
    %c0_275 = arith.constant 0 : index
    %c0_276 = arith.constant 0 : index
    %328 = vector.load %arg3[%c2_274, %c0_275, %c0_276] : memref<9x128x128xbf16, #tpu.memory_space<vmem>>, vector<1x128x128xbf16>
    %329 = vector.shape_cast %328 : vector<1x128x128xbf16> to vector<128x128xbf16>
    %cst_277 = arith.constant dense<0.000000e+00> : vector<8x128xf32>
    %330 = tpu.matmul %327, %329, %cst_277 {dimension_numbers = #tpu.dot_dimension_numbers<[1], [0], [0], [1], [0, 0, 1, 1], [], []>} : vector<8x128xbf16>, vector<128x128xbf16>, vector<8x128xf32> -> vector<8x128xf32>
    %331 = arith.addf %322, %330 : vector<8x128xf32>
    %332 = arith.addi %5, %c3_i32 : i32
    %c1_i32_278 = arith.constant 1 : i32
    %333 = arith.addi %332, %c1_i32_278 : i32
    %c0_279 = arith.constant 0 : index
    %334 = arith.index_cast %333 : i32 to index
    %c0_280 = arith.constant 0 : index
    %c0_281 = arith.constant 0 : index
    %335 = vector.load %arg2[%c0_279, %334, %c0_280, %c0_281] : memref<1x10x10x128xbf16, #tpu.memory_space<vmem>>, vector<1x1x8x128xbf16>
    %336 = vector.shape_cast %335 : vector<1x1x8x128xbf16> to vector<8x128xbf16>
    %c3_282 = arith.constant 3 : index
    %c0_283 = arith.constant 0 : index
    %c0_284 = arith.constant 0 : index
    %337 = vector.load %arg3[%c3_282, %c0_283, %c0_284] : memref<9x128x128xbf16, #tpu.memory_space<vmem>>, vector<1x128x128xbf16>
    %338 = vector.shape_cast %337 : vector<1x128x128xbf16> to vector<128x128xbf16>
    %cst_285 = arith.constant dense<0.000000e+00> : vector<8x128xf32>
    %339 = tpu.matmul %336, %338, %cst_285 {dimension_numbers = #tpu.dot_dimension_numbers<[1], [0], [0], [1], [0, 0, 1, 1], [], []>} : vector<8x128xbf16>, vector<128x128xbf16>, vector<8x128xf32> -> vector<8x128xf32>
    %340 = arith.addf %331, %339 : vector<8x128xf32>
    %341 = arith.addi %5, %c3_i32 : i32
    %c1_i32_286 = arith.constant 1 : i32
    %342 = arith.addi %341, %c1_i32_286 : i32
    %c0_287 = arith.constant 0 : index
    %343 = arith.index_cast %342 : i32 to index
    %c1_288 = arith.constant 1 : index
    %c0_289 = arith.constant 0 : index
    %344 = vector.load %arg2[%c0_287, %343, %c1_288, %c0_289] : memref<1x10x10x128xbf16, #tpu.memory_space<vmem>>, vector<1x1x8x128xbf16>
    %345 = vector.shape_cast %344 : vector<1x1x8x128xbf16> to vector<8x128xbf16>
    %c4_290 = arith.constant 4 : index
    %c0_291 = arith.constant 0 : index
    %c0_292 = arith.constant 0 : index
    %346 = vector.load %arg3[%c4_290, %c0_291, %c0_292] : memref<9x128x128xbf16, #tpu.memory_space<vmem>>, vector<1x128x128xbf16>
    %347 = vector.shape_cast %346 : vector<1x128x128xbf16> to vector<128x128xbf16>
    %cst_293 = arith.constant dense<0.000000e+00> : vector<8x128xf32>
    %348 = tpu.matmul %345, %347, %cst_293 {dimension_numbers = #tpu.dot_dimension_numbers<[1], [0], [0], [1], [0, 0, 1, 1], [], []>} : vector<8x128xbf16>, vector<128x128xbf16>, vector<8x128xf32> -> vector<8x128xf32>
    %349 = arith.addf %340, %348 : vector<8x128xf32>
    %350 = arith.addi %5, %c3_i32 : i32
    %c1_i32_294 = arith.constant 1 : i32
    %351 = arith.addi %350, %c1_i32_294 : i32
    %c0_295 = arith.constant 0 : index
    %352 = arith.index_cast %351 : i32 to index
    %c2_296 = arith.constant 2 : index
    %c0_297 = arith.constant 0 : index
    %353 = vector.load %arg2[%c0_295, %352, %c2_296, %c0_297] : memref<1x10x10x128xbf16, #tpu.memory_space<vmem>>, vector<1x1x8x128xbf16>
    %354 = vector.shape_cast %353 : vector<1x1x8x128xbf16> to vector<8x128xbf16>
    %c5_298 = arith.constant 5 : index
    %c0_299 = arith.constant 0 : index
    %c0_300 = arith.constant 0 : index
    %355 = vector.load %arg3[%c5_298, %c0_299, %c0_300] : memref<9x128x128xbf16, #tpu.memory_space<vmem>>, vector<1x128x128xbf16>
    %356 = vector.shape_cast %355 : vector<1x128x128xbf16> to vector<128x128xbf16>
    %cst_301 = arith.constant dense<0.000000e+00> : vector<8x128xf32>
    %357 = tpu.matmul %354, %356, %cst_301 {dimension_numbers = #tpu.dot_dimension_numbers<[1], [0], [0], [1], [0, 0, 1, 1], [], []>} : vector<8x128xbf16>, vector<128x128xbf16>, vector<8x128xf32> -> vector<8x128xf32>
    %358 = arith.addf %349, %357 : vector<8x128xf32>
    %359 = arith.addi %5, %c3_i32 : i32
    %c2_i32_302 = arith.constant 2 : i32
    %360 = arith.addi %359, %c2_i32_302 : i32
    %c0_303 = arith.constant 0 : index
    %361 = arith.index_cast %360 : i32 to index
    %c0_304 = arith.constant 0 : index
    %c0_305 = arith.constant 0 : index
    %362 = vector.load %arg2[%c0_303, %361, %c0_304, %c0_305] : memref<1x10x10x128xbf16, #tpu.memory_space<vmem>>, vector<1x1x8x128xbf16>
    %363 = vector.shape_cast %362 : vector<1x1x8x128xbf16> to vector<8x128xbf16>
    %c6_306 = arith.constant 6 : index
    %c0_307 = arith.constant 0 : index
    %c0_308 = arith.constant 0 : index
    %364 = vector.load %arg3[%c6_306, %c0_307, %c0_308] : memref<9x128x128xbf16, #tpu.memory_space<vmem>>, vector<1x128x128xbf16>
    %365 = vector.shape_cast %364 : vector<1x128x128xbf16> to vector<128x128xbf16>
    %cst_309 = arith.constant dense<0.000000e+00> : vector<8x128xf32>
    %366 = tpu.matmul %363, %365, %cst_309 {dimension_numbers = #tpu.dot_dimension_numbers<[1], [0], [0], [1], [0, 0, 1, 1], [], []>} : vector<8x128xbf16>, vector<128x128xbf16>, vector<8x128xf32> -> vector<8x128xf32>
    %367 = arith.addf %358, %366 : vector<8x128xf32>
    %368 = arith.addi %5, %c3_i32 : i32
    %c2_i32_310 = arith.constant 2 : i32
    %369 = arith.addi %368, %c2_i32_310 : i32
    %c0_311 = arith.constant 0 : index
    %370 = arith.index_cast %369 : i32 to index
    %c1_312 = arith.constant 1 : index
    %c0_313 = arith.constant 0 : index
    %371 = vector.load %arg2[%c0_311, %370, %c1_312, %c0_313] : memref<1x10x10x128xbf16, #tpu.memory_space<vmem>>, vector<1x1x8x128xbf16>
    %372 = vector.shape_cast %371 : vector<1x1x8x128xbf16> to vector<8x128xbf16>
    %c7_314 = arith.constant 7 : index
    %c0_315 = arith.constant 0 : index
    %c0_316 = arith.constant 0 : index
    %373 = vector.load %arg3[%c7_314, %c0_315, %c0_316] : memref<9x128x128xbf16, #tpu.memory_space<vmem>>, vector<1x128x128xbf16>
    %374 = vector.shape_cast %373 : vector<1x128x128xbf16> to vector<128x128xbf16>
    %cst_317 = arith.constant dense<0.000000e+00> : vector<8x128xf32>
    %375 = tpu.matmul %372, %374, %cst_317 {dimension_numbers = #tpu.dot_dimension_numbers<[1], [0], [0], [1], [0, 0, 1, 1], [], []>} : vector<8x128xbf16>, vector<128x128xbf16>, vector<8x128xf32> -> vector<8x128xf32>
    %376 = arith.addf %367, %375 : vector<8x128xf32>
    %377 = arith.addi %5, %c3_i32 : i32
    %c2_i32_318 = arith.constant 2 : i32
    %378 = arith.addi %377, %c2_i32_318 : i32
    %c0_319 = arith.constant 0 : index
    %379 = arith.index_cast %378 : i32 to index
    %c2_320 = arith.constant 2 : index
    %c0_321 = arith.constant 0 : index
    %380 = vector.load %arg2[%c0_319, %379, %c2_320, %c0_321] : memref<1x10x10x128xbf16, #tpu.memory_space<vmem>>, vector<1x1x8x128xbf16>
    %381 = vector.shape_cast %380 : vector<1x1x8x128xbf16> to vector<8x128xbf16>
    %c8_322 = arith.constant 8 : index
    %c0_323 = arith.constant 0 : index
    %c0_324 = arith.constant 0 : index
    %382 = vector.load %arg3[%c8_322, %c0_323, %c0_324] : memref<9x128x128xbf16, #tpu.memory_space<vmem>>, vector<1x128x128xbf16>
    %383 = vector.shape_cast %382 : vector<1x128x128xbf16> to vector<128x128xbf16>
    %cst_325 = arith.constant dense<0.000000e+00> : vector<8x128xf32>
    %384 = tpu.matmul %381, %383, %cst_325 {dimension_numbers = #tpu.dot_dimension_numbers<[1], [0], [0], [1], [0, 0, 1, 1], [], []>} : vector<8x128xbf16>, vector<128x128xbf16>, vector<8x128xf32> -> vector<8x128xf32>
    %385 = arith.addf %376, %384 : vector<8x128xf32>
    %386 = vector.broadcast %6 : vector<1x128xf32> to vector<8x128xf32>
    %387 = arith.addf %385, %386 : vector<8x128xf32>
    %c0_326 = arith.constant 0 : index
    %388 = arith.index_cast %c3_i32 : i32 to index
    %c0_327 = arith.constant 0 : index
    %c0_328 = arith.constant 0 : index
    %389 = vector.load %arg5[%c0_326, %388, %c0_327, %c0_328] : memref<1x4x8x128xf32, #tpu.memory_space<vmem>>, vector<1x1x8x128xf32>
    %390 = vector.shape_cast %389 : vector<1x1x8x128xf32> to vector<8x128xf32>
    %391 = vector.shape_cast %387 : vector<8x128xf32> to vector<1x1x8x128xf32>
    tpu.vector_store %arg5[%c0_326, %388, %c0_327, %c0_328], %391 {strides = array<i32>} : memref<1x4x8x128xf32, #tpu.memory_space<vmem>>, vector<1x1x8x128xf32>,
    %c0_329 = arith.constant 0 : index
    %c0_330 = arith.constant 0 : index
    %392 = vector.load %arg6[%c0_329, %c0_330] : memref<1x128xf32, #tpu.memory_space<vmem>>, vector<1x128xf32>
    %cst_331 = arith.constant dense<0.000000e+00> : vector<128xf32>
    %393 = vector.multi_reduction <add>, %387, %cst_331 [0] : vector<8x128xf32> to vector<128xf32>
    %394 = vector.shape_cast %393 : vector<128xf32> to vector<1x128xf32>
    %395 = arith.addf %392, %394 : vector<1x128xf32>
    %c0_332 = arith.constant 0 : index
    %c0_333 = arith.constant 0 : index
    %396 = vector.load %arg6[%c0_332, %c0_333] : memref<1x128xf32, #tpu.memory_space<vmem>>, vector<1x128xf32>
    tpu.vector_store %arg6[%c0_332, %c0_333], %395 {strides = array<i32>} : memref<1x128xf32, #tpu.memory_space<vmem>>, vector<1x128xf32>,
    %c0_334 = arith.constant 0 : index
    %c0_335 = arith.constant 0 : index
    %397 = vector.load %arg7[%c0_334, %c0_335] : memref<1x128xf32, #tpu.memory_space<vmem>>, vector<1x128xf32>
    %398 = arith.mulf %387, %387 : vector<8x128xf32>
    %cst_336 = arith.constant dense<0.000000e+00> : vector<128xf32>
    %399 = vector.multi_reduction <add>, %398, %cst_336 [0] : vector<8x128xf32> to vector<128xf32>
    %400 = vector.shape_cast %399 : vector<128xf32> to vector<1x128xf32>
    %401 = arith.addf %397, %400 : vector<1x128xf32>
    %c0_337 = arith.constant 0 : index
    %c0_338 = arith.constant 0 : index
    %402 = vector.load %arg7[%c0_337, %c0_338] : memref<1x128xf32, #tpu.memory_space<vmem>>, vector<1x128xf32>
    tpu.vector_store %arg7[%c0_337, %c0_338], %401 {strides = array<i32>} : memref<1x128xf32, #tpu.memory_space<vmem>>, vector<1x128xf32>,
    %c4_i32_339 = arith.constant 4 : i32
    return
  }
  func.func @transform_0(%arg0: i32, %arg1: i32) -> (i32, i32, i32, i32) {
    %c0_i32 = arith.constant 0 : i32
    %c0_i32_0 = arith.constant 0 : i32
    %c0_i32_1 = arith.constant 0 : i32
    %c0_i32_2 = arith.constant 0 : i32
    return %arg0, %c0_i32, %c0_i32_0, %c0_i32_1 : i32, i32, i32, i32
  }
  func.func @transform_1(%arg0: i32, %arg1: i32) -> (i32, i32, i32) {
    %c0_i32 = arith.constant 0 : i32
    %c0_i32_0 = arith.constant 0 : i32
    %c0_i32_1 = arith.constant 0 : i32
    %c0_i32_2 = arith.constant 0 : i32
    return %c0_i32, %c0_i32_0, %c0_i32_1 : i32, i32, i32
  }
  func.func @transform_2(%arg0: i32, %arg1: i32) -> (i32, i32) {
    %c0_i32 = arith.constant 0 : i32
    %c0_i32_0 = arith.constant 0 : i32
    %c0_i32_1 = arith.constant 0 : i32
    return %c0_i32, %c0_i32_0 : i32, i32
  }
  func.func @transform_3(%arg0: i32, %arg1: i32) -> (i32, i32, i32, i32) {
    %c0_i32 = arith.constant 0 : i32
    %c0_i32_0 = arith.constant 0 : i32
    %c0_i32_1 = arith.constant 0 : i32
    return %arg0, %arg1, %c0_i32, %c0_i32_0 : i32, i32, i32, i32
  }
  func.func @transform_4(%arg0: i32, %arg1: i32) -> (i32, i32) {
    %c0_i32 = arith.constant 0 : i32
    %c0_i32_0 = arith.constant 0 : i32
    %c0_i32_1 = arith.constant 0 : i32
    return %c0_i32, %c0_i32_0 : i32, i32
  }
  func.func @transform_5(%arg0: i32, %arg1: i32) -> (i32, i32) {
    %c0_i32 = arith.constant 0 : i32
    %c0_i32_0 = arith.constant 0 : i32
    %c0_i32_1 = arith.constant 0 : i32
    return %c0_i32, %c0_i32_0 : i32, i32
  }
}

module attributes {stable_mosaic.version = 11 : i64} {
  func.func @_bn_lrelu_kernel(%arg0: i32, %arg1: i32, %arg2: memref<1x4x8x128xf32, #tpu.memory_space<vmem>>, %arg3: memref<1x128xf32, #tpu.memory_space<vmem>>, %arg4: memref<1x128xf32, #tpu.memory_space<vmem>>, %arg5: memref<1x4x8x128xf32, #tpu.memory_space<vmem>>) attributes {dimension_semantics = [#tpu.dimension_semantics<parallel>, #tpu.dimension_semantics<parallel>], iteration_bounds = array<i64: 2, 2>, scalar_prefetch = 0 : i64, scratch_operands = 0 : i64, tpu.core_type = #tpu.core_type<tc>, window_params = [{transform_indices = @transform_0, window_bounds = array<i64: 1, 4, 8, 128>}, {pipeline_mode = #tpu.pipeline_mode<synchronous>, transform_indices = @transform_1, window_bounds = array<i64: 1, 128>}, {pipeline_mode = #tpu.pipeline_mode<synchronous>, transform_indices = @transform_2, window_bounds = array<i64: 1, 128>}, {transform_indices = @transform_3, window_bounds = array<i64: 1, 4, 8, 128>}]} {
    %c0 = arith.constant 0 : index
    %c0_0 = arith.constant 0 : index
    %c0_1 = arith.constant 0 : index
    %c0_2 = arith.constant 0 : index
    %0 = vector.load %arg2[%c0, %c0_0, %c0_1, %c0_2] : memref<1x4x8x128xf32, #tpu.memory_space<vmem>>, vector<1x4x8x128xf32>
    %1 = vector.shape_cast %0 : vector<1x4x8x128xf32> to vector<4x8x128xf32>
    %c0_3 = arith.constant 0 : index
    %c0_4 = arith.constant 0 : index
    %2 = vector.load %arg3[%c0_3, %c0_4] : memref<1x128xf32, #tpu.memory_space<vmem>>, vector<1x128xf32>
    %3 = vector.shape_cast %2 : vector<1x128xf32> to vector<1x1x128xf32>
    %4 = vector.broadcast %3 : vector<1x1x128xf32> to vector<4x8x128xf32>
    %5 = arith.mulf %1, %4 : vector<4x8x128xf32>
    %c0_5 = arith.constant 0 : index
    %c0_6 = arith.constant 0 : index
    %6 = vector.load %arg4[%c0_5, %c0_6] : memref<1x128xf32, #tpu.memory_space<vmem>>, vector<1x128xf32>
    %7 = vector.shape_cast %6 : vector<1x128xf32> to vector<1x1x128xf32>
    %8 = vector.broadcast %7 : vector<1x1x128xf32> to vector<4x8x128xf32>
    %9 = arith.addf %5, %8 : vector<4x8x128xf32>
    %cst = arith.constant 0.000000e+00 : f32
    %10 = vector.broadcast %cst : f32 to vector<4x8x128xf32>
    %11 = arith.cmpf oge, %9, %10 : vector<4x8x128xf32>
    %cst_7 = arith.constant 2.000000e-01 : f32
    %12 = vector.broadcast %cst_7 : f32 to vector<4x8x128xf32>
    %13 = arith.mulf %12, %9 : vector<4x8x128xf32>
    %14 = arith.select %11, %9, %13 : vector<4x8x128xi1>, vector<4x8x128xf32>
    %c0_8 = arith.constant 0 : index
    %c0_9 = arith.constant 0 : index
    %c0_10 = arith.constant 0 : index
    %c0_11 = arith.constant 0 : index
    %15 = vector.load %arg5[%c0_8, %c0_9, %c0_10, %c0_11] : memref<1x4x8x128xf32, #tpu.memory_space<vmem>>, vector<1x4x8x128xf32>
    %16 = vector.shape_cast %15 : vector<1x4x8x128xf32> to vector<4x8x128xf32>
    %17 = vector.shape_cast %14 : vector<4x8x128xf32> to vector<1x4x8x128xf32>
    tpu.vector_store %arg5[%c0_8, %c0_9, %c0_10, %c0_11], %17 {strides = array<i32>} : memref<1x4x8x128xf32, #tpu.memory_space<vmem>>, vector<1x4x8x128xf32>,
    return
  }
  func.func @transform_0(%arg0: i32, %arg1: i32) -> (i32, i32, i32, i32) {
    %c0_i32 = arith.constant 0 : i32
    %c0_i32_0 = arith.constant 0 : i32
    %c0_i32_1 = arith.constant 0 : i32
    return %arg0, %arg1, %c0_i32, %c0_i32_0 : i32, i32, i32, i32
  }
  func.func @transform_1(%arg0: i32, %arg1: i32) -> (i32, i32) {
    %c0_i32 = arith.constant 0 : i32
    %c0_i32_0 = arith.constant 0 : i32
    %c0_i32_1 = arith.constant 0 : i32
    return %c0_i32, %c0_i32_0 : i32, i32
  }
  func.func @transform_2(%arg0: i32, %arg1: i32) -> (i32, i32) {
    %c0_i32 = arith.constant 0 : i32
    %c0_i32_0 = arith.constant 0 : i32
    %c0_i32_1 = arith.constant 0 : i32
    return %c0_i32, %c0_i32_0 : i32, i32
  }
  func.func @transform_3(%arg0: i32, %arg1: i32) -> (i32, i32, i32, i32) {
    %c0_i32 = arith.constant 0 : i32
    %c0_i32_0 = arith.constant 0 : i32
    %c0_i32_1 = arith.constant 0 : i32
    return %arg0, %arg1, %c0_i32, %c0_i32_0 : i32, i32, i32, i32
  }
}

</mosaic_0001>

<bundles_post_ra>
// kernel: down_forward.5
= control target key start
LH: loop header
LB: loop body
LE: loop exit
PB: predicated region body
PF: predicated region fallthrough
CT: control target
= control target key end

     0   :  { %s1245_s0 = inlined_call_operand.hbm [shape: bf16[2,8,8,128], index: 0, kind: input, shape index: {}]   ;;  %s1246_s1 = inlined_call_operand.hbm [shape: bf16[2,8,8,128], index: 1, kind: input, shape index: {}]   ;;  %s1247_s2 = inlined_call_operand.hbm [shape: bf16[2,8,8,128], index: 2, kind: input, shape index: {}]   ;;  %s1248_s3 = inlined_call_operand.hbm [shape: bf16[2,8,8,128], index: 3, kind: input, shape index: {}]   ;;  %s1249_s4 = inlined_call_operand.hbm [shape: bf16[2,8,8,128], index: 4, kind: output, shape index: {}]  }
   0x1   :  { %1256 = sst [smem:[#allocation16_spill]] %s1245_s0 }
   0x2   :  { %1257 = sst [smem:[#allocation17_spill]] %s1246_s1 }
   0x3   :  { %9 = vsyncpa [#allocation3], 0 }
   0x4   :  { %11 = vsyncpa [#allocation3 + $0x1], 0 }
   0x5   :  { %12 = vsyncpa [#allocation6], 0 }
   0x6   :  { %14 = vsyncpa [#allocation6 + $0x1], 0 }
   0x7   :  { %15 = vsyncpa [#allocation9], 0 }
   0x8   :  { %17 = vsyncpa [#allocation9 + $0x1], 0 }
   0x9   :  { %18 = vsyncpa [#allocation4], 0 }
   0xa   :  { %20 = vsyncpa [#allocation4 + $0x1], 0  ;;  %s903_s15 = smov 0   ;;  %s905_s16 = smov 0  }
   0xb   :  { %s907_s17 = smov 0   ;;  %s909_s18 = smov 0  }
   0xc LB: > { %s924_s19 = sadd.s32 4294967295, %s867_s18   ;;  %s550_s20 = sadd.s32 4294967294, %s867_s18   ;;  %s867_s18 = sphi %s909_s18, %s1279_s18   ;;  %s863_s17 = sphi %s907_s17, %s1278_s17   ;;  %s859_s16 = sphi %s905_s16, %s1277_s16   ;;  %s855_s15 = sphi %s903_s15, %s1276_s15  }
   0xd   : > { %s928_s21 = sadd.s32 1, %s867_s18   ;;  %s33_s22 = sadd.s32 1, %s863_s17 }
   0xe   : > { %s30_s23 = ssub.s32 %s867_s18, %s928_s21  ;;  %p40_p0 = scmp.ne.s32.totalorder %s863_s17, %s859_s16 }
   0xf   : > { %p31_p1 = scmp.eq.s32.totalorder %s30_s23, 0  ;;  %p41_p2 = scmp.eq.s32.totalorder %s867_s18, 0 }
  0x10   : > { %p46_p3 = scmp.ne.s32.totalorder %s859_s16, %s855_s15  ;;  %p47_p4 = scmp.eq.s32.totalorder %s924_s19, 0 }
  0x11   : > { %s940_s24 = scalar_select %p31_p1, %s863_s17, %s33_s22  }
  0x12   : > { %p42_p5 = por %p41_p2, %p40_p0  ;;  %p942_p6 = por %p47_p4, %p46_p3 }
  0x13   : > { %1258 = sst [smem:[#allocation15_spill]] %s940_s24  ;;  %p148_p7 = scmp.eq.s32.totalorder %s924_s19, 1 }
  0x14   : > { %s1259_s25 = scalar_select %p942_p6, 1, 0 }
  0x15   : > { %p154_p8 = scmp.eq.s32.totalorder %s550_s20, 1  ;;  %p635_p10 = scmp.lt.s32.totalorder %s867_s18, 2 }
  0x16   : > { %p949_p11 = por %p148_p7, %p40_p0  ;;  %s958_s28 = sand.u32 1, %s863_s17  }
  0x17   : > { %p953_p12 = por %p154_p8, %p46_p3  ;;  %s961_s29 = sshll.u32 %s867_s18, 9 }
  0x18   : > { %s1260_s26 = scalar_select %p949_p11, 1, 0 }
  0x19   : > { %s1261_s27 = scalar_select %p953_p12, 1, 0 }
  0x1a   : > { %s964_s30 = sshll.u32 %s958_s28, 5  ;;  %p966_p13 = pnand %p635_p10, %p42_p5 }
  0x1b   : > { %s195_s6 = sand.u32 1, %s867_s18   ;;  %s1263_s1 = sld [smem:[#allocation17_spill]] }
  0x1c   : > { %s199_s10 = scalar_lea.vmem [#allocation5], %s964_s30  ;;  %s981_s12 = scalar_lea.sflag [#allocation6], %s195_s6 }
  0x1d   : > { %s206_s11 = sshll.u32 %s199_s10, 4  ;;  %p987_p2 = pneg %p966_p13  ;;  %s978_s11 = int_to_ptr.vmem [resolvable:$true] %s206_s11 }
  0x21   : > { %s975_s9 = scalar_lea.hbm %s1263_s1, %s961_s29  ;;  %s678_s23 = scalar_lea.hbm %s1263_s1, 1024 }
  0x22   : > { %s673_s13 = scalar_lea.hbm %s975_s9, 512  ;;  %p679_p5 = scmp.lt.u32.totalorder %s975_s9, %s1263_s1 }
  0x23   : > { %p674_p1 = scmp.ne.s32.totalorder %s975_s9, %s673_s13  ;;  %p680_p7 = scmp.lt.u32.totalorder %s678_s23, %s673_s13 }
  0x24   : > { %p682_p10 = scmp.lt.u32.totalorder %s673_s13, %s975_s9 }
  0x25   : > { %p676_p3 = pnand %p987_p2, %p674_p1  ;;  %p681_p8 = por %p680_p7, %p679_p5 }
  0x27   : > { %p677_p4 = pneg %p676_p3  ;;  %p683_p9 = por %p682_p10, %p681_p8 }
  0x29   : > { %p684_p0 = pnand %p683_p9, %p677_p4 }
  0x2b   : > { %687 = shalt.err (!%p684_p0)
}
  0x2c   : > { %s688_s6 = scalar_lea.vmem %s978_s11, 512  ;;  %s869_s10 = smov [#allocation5]  }
  0x2d   : > { %p689_p1 = scmp.ne.s32.totalorder %s978_s11, %s688_s6  ;;  %s693_s20 = sshll.u32 %s869_s10, 4  ;;  %s694_s20 = int_to_ptr.vmem [resolvable:$false] %s693_s20 }
  0x2e   : > { %s695_s22 = scalar_lea.vmem %s694_s20, 1024  ;;  %p696_p11 = scmp.lt.s32.totalorder %s978_s11, %s694_s20 }
  0x2f   : > { %p691_p3 = pnand %p689_p1, %p987_p2  ;;  %p697_p6 = scmp.lt.s32.totalorder %s695_s22, %s688_s6 }
  0x31   : > { %p692_p12 = pneg %p691_p3  ;;  %p698_p5 = por %p697_p6, %p696_p11 }
  0x33   : > { %p699_p7 = pnand %p698_p5, %p692_p12 }
  0x35   : > { %702 = shalt.err (!%p699_p7)
}
  0x36   : > { %s1252_s13 = smov 64   ;;  %s1254_s23 = smov 4  }
  0x37   : > { %624 = dma.hbm_to_vmem [thread:$0]  (!%p966_p13), %s975_s9, 512, %s978_s11, %s981_s12, %s1252_s13, %s1252_s13, %s1254_s23  }
  0x38   : > { %p256_p6 = scmp.lt.s32.totalorder %s867_s18, 3  ;;  %s1265_s0 = sld [smem:[#allocation16_spill]] }
  0x39   : > { %p1266_p9 = scmp.ge.s32.totalorder %s867_s18, 1  ;;  %s178_s20 = scalar_lea.vmem [#allocation2], %s964_s30 }
  0x3a   : > { %s185_s22 = sshll.u32 %s178_s20, 4  ;;  %s175_s9 = scalar_lea.sflag [#allocation3], %s958_s28  ;;  %s1028_s22 = int_to_ptr.vmem [resolvable:$true] %s185_s22 }
  0x3b   : > { %p1023_p11 = pnand %p1266_p9, %p256_p6 }
  0x3d   : > { %s1267_s10 = scalar_select %p1023_p11, 1, 0 }
  0x3e   : > { %s1019_s6 = scalar_lea.hbm %s1265_s0, %s961_s29  ;;  %s708_s13 = scalar_lea.hbm %s1265_s0, 1024 }
  0x3f   : > { %s703_s11 = scalar_lea.hbm %s1019_s6, 512  ;;  %p709_p8 = scmp.lt.u32.totalorder %s1019_s6, %s1265_s0 }
  0x40   : > { %p704_p12 = scmp.ne.s32.totalorder %s1019_s6, %s703_s11  ;;  %p710_p10 = scmp.lt.u32.totalorder %s708_s13, %s703_s11 }
  0x41   : > { %p712_p3 = scmp.lt.u32.totalorder %s703_s11, %s1019_s6 }
  0x42   : > { %p706_p0 = pnand %p704_p12, %p987_p2  ;;  %p711_p1 = por %p710_p10, %p709_p8 }
  0x44   : > { %p707_p4 = pneg %p706_p0  ;;  %p713_p5 = por %p712_p3, %p711_p1 }
  0x46   : > { %p714_p7 = pnand %p713_p5, %p707_p4 }
  0x48   : > { %717 = shalt.err (!%p714_p7)
}
  0x49   : > { %s718_s20 = scalar_lea.vmem %s1028_s22, 512  ;;  %s872_s7 = smov [#allocation2]  }
  0x4a   : > { %p719_p6 = scmp.ne.s32.totalorder %s1028_s22, %s718_s20  ;;  %s723_s8 = sshll.u32 %s872_s7, 4  ;;  %s724_s8 = int_to_ptr.vmem [resolvable:$false] %s723_s8 }
  0x4b   : > { %s725_s1 = scalar_lea.vmem %s724_s8, 1024  ;;  %p726_p0 = scmp.lt.s32.totalorder %s1028_s22, %s724_s8 }
  0x4c   : > { %p721_p9 = pnand %p719_p6, %p987_p2  ;;  %p727_p11 = scmp.lt.s32.totalorder %s725_s1, %s718_s20 }
  0x4e   : > { %p722_p12 = pneg %p721_p9  ;;  %p728_p8 = por %p727_p11, %p726_p0 }
  0x50   : > { %p729_p10 = pnand %p728_p8, %p722_p12 }
  0x52   : > { %732 = shalt.err (!%p729_p10)
}
  0x53   : > { %s1268_s13 = smov 4   ;;  %s1269_s23 = smov 64  }
  0x54   : > { %621 = dma.hbm_to_vmem [thread:$0]  (!%p966_p13), %s1019_s6, 512, %s1028_s22, %s175_s9, %s1269_s23, %s1269_s23, %s1268_s13  }
  0x55   : > { %s1061_s20 = scalar_lea.hbm %s1247_s2, %s961_s29  ;;  %s220_s8 = scalar_lea.vmem [#allocation7], %s964_s30 }
  0x56   : > { %s227_s1 = sshll.u32 %s220_s8, 4  ;;  %s733_s0 = scalar_lea.hbm %s1061_s20, 512  ;;  %s1064_s1 = int_to_ptr.vmem [resolvable:$true] %s227_s1 }
  0x57   : > { %p734_p11 = scmp.ne.s32.totalorder %s1061_s20, %s733_s0  ;;  %s738_s22 = scalar_lea.hbm %s1247_s2, 1024 }
  0x58   : > { %p739_p3 = scmp.lt.u32.totalorder %s1061_s20, %s1247_s2  ;;  %p740_p5 = scmp.lt.u32.totalorder %s738_s22, %s733_s0 }
  0x59   : > { %p736_p4 = pnand %p734_p11, %p987_p2  ;;  %p742_p6 = scmp.lt.u32.totalorder %s733_s0, %s1061_s20 }
  0x5a   : > { %p741_p7 = por %p740_p5, %p739_p3 }
  0x5b   : > { %p737_p1 = pneg %p736_p4 }
  0x5c   : > { %p743_p9 = por %p742_p6, %p741_p7 }
  0x5e   : > { %p744_p12 = pnand %p743_p9, %p737_p1 }
  0x60   : > { %747 = shalt.err (!%p744_p12)
}
  0x61   : > { %s748_s7 = scalar_lea.vmem %s1064_s1, 512  ;;  %s873_s24 = smov [#allocation7]  }
  0x62   : > { %p749_p0 = scmp.ne.s32.totalorder %s1064_s1, %s748_s7  ;;  %s753_s8 = sshll.u32 %s873_s24, 4  ;;  %s754_s8 = int_to_ptr.vmem [resolvable:$false] %s753_s8 }
  0x63   : > { %s755_s6 = scalar_lea.vmem %s754_s8, 1024  ;;  %p756_p11 = scmp.lt.s32.totalorder %s1064_s1, %s754_s8 }
  0x64   : > { %p751_p8 = pnand %p749_p0, %p987_p2  ;;  %p757_p4 = scmp.lt.s32.totalorder %s755_s6, %s748_s7 }
  0x66   : > { %p752_p10 = pneg %p751_p8  ;;  %p758_p3 = por %p757_p4, %p756_p11 }
  0x68   : > { %p759_p5 = pnand %p758_p3, %p752_p10 }
  0x6a   : > { %762 = shalt.err (!%p759_p5)
}
  0x6b   : > { %627 = dma.hbm_to_vmem [thread:$0]  (!%p966_p13), %s1061_s20, 512, %s1064_s1, %s981_s12, %s1269_s23, %s1269_s23, %s1268_s13  }
  0x6c   : > { %s1095_s9 = scalar_lea.hbm %s1248_s3, %s961_s29  ;;  %s241_s11 = scalar_lea.vmem [#allocation8], %s964_s30 }
  0x6d   : > { %s248_s7 = sshll.u32 %s241_s11, 4  ;;  %s238_s24 = scalar_lea.sflag [#allocation9], %s958_s28  ;;  %s1098_s7 = int_to_ptr.vmem [resolvable:$true] %s248_s7 }
  0x6e   : > { %s763_s8 = scalar_lea.hbm %s1095_s9, 512  ;;  %s768_s1 = scalar_lea.hbm %s1248_s3, 1024 }
  0x6f   : > { %p764_p1 = scmp.ne.s32.totalorder %s1095_s9, %s763_s8  ;;  %p769_p9 = scmp.lt.u32.totalorder %s1095_s9, %s1248_s3 }
  0x70   : > { %p770_p12 = scmp.lt.u32.totalorder %s768_s1, %s763_s8  ;;  %p772_p8 = scmp.lt.u32.totalorder %s763_s8, %s1095_s9 }
  0x71   : > { %p766_p7 = pnand %p764_p1, %p987_p2 }
  0x72   : > { %p771_p0 = por %p770_p12, %p769_p9 }
  0x73   : > { %p767_p6 = pneg %p766_p7 }
  0x74   : > { %p773_p10 = por %p772_p8, %p771_p0 }
  0x76   : > { %p774_p11 = pnand %p773_p10, %p767_p6 }
  0x78   : > { %777 = shalt.err (!%p774_p11)
}
  0x79   : > { %s778_s30 = scalar_lea.vmem %s1098_s7, 512  ;;  %s874_s0 = smov [#allocation8]  }
  0x7a   : > { %p779_p4 = scmp.ne.s32.totalorder %s1098_s7, %s778_s30  ;;  %s783_s22 = sshll.u32 %s874_s0, 4  ;;  %s784_s22 = int_to_ptr.vmem [resolvable:$false] %s783_s22 }
  0x7b   : > { %s785_s11 = scalar_lea.vmem %s784_s22, 1024  ;;  %p786_p1 = scmp.lt.s32.totalorder %s1098_s7, %s784_s22 }
  0x7c   : > { %p781_p3 = pnand %p779_p4, %p987_p2  ;;  %p787_p7 = scmp.lt.s32.totalorder %s785_s11, %s778_s30 }
  0x7e   : > { %p782_p5 = pneg %p781_p3  ;;  %p788_p9 = por %p787_p7, %p786_p1 }
  0x80   : > { %p789_p12 = pnand %p788_p9, %p782_p5 }
  0x82   : > { %792 = shalt.err (!%p789_p12)
}
  0x83   : > { %630 = dma.hbm_to_vmem [thread:$0]  (!%p966_p13), %s1095_s9, 512, %s1098_s7, %s238_s24, %s1269_s23, %s1269_s23, %s1268_s13  }
  0x84   : > { %p1270_p2 = scmp.ne.s32.totalorder %s1267_s10, 0 }
  0x85   : > { %s1130_s14 = sand.u32 (!%p1270_p2), 1, %s859_s16   ;;  %p1271_p6 = scmp.ne.s32.totalorder (!%p1270_p2), %s1259_s25, 0 }
  0x86   : > { %260 = sbr.rel (%p1270_p2) target bundleno = 183 (0xb7), region = 36  ;;  %s1133_s8 = sshll.u32 (!%p1270_p2), %s1130_s14, 5 }
  0x87   : > { %s263_s5 = scalar_lea.sflag (!%p1270_p2), [#allocation3], %s1130_s14  ;;  %s1137_s12 = scalar_lea.vmem (!%p1270_p2), [#allocation2], %s1133_s8 }
  0x8d   : > { %838 = dma.done.wait (%p1271_p6), %s263_s5, 512  }
  0x8e   : > { %840 = vsyncadd (%p1271_p6), %s263_s5, 4294966784  ;;  %s271_s28 = sand.u32 1, %s924_s19   ;;  %s1145_s13 = scalar_lea.vmem [#allocation5], %s1133_s8 }
  0x8f   : > { %s272_s10 = scalar_lea.sflag [#allocation6], %s271_s28 }
  0x90   : > { %842 = dma.done.wait (%p1271_p6), %s272_s10, 1024  }
  0x91   : > { %844 = vsyncadd (%p1271_p6), %s272_s10, 4294966272  ;;  %s1152_s23 = scalar_lea.vmem [#allocation7], %s1133_s8  ;;  %s290_s9 = scalar_lea.sflag [#allocation9], %s1130_s14 }
  0x92   : > { %s1156_s7 = scalar_lea.vmem [#allocation8], %s1133_s8 }
  0x93   : > { %846 = dma.done.wait (%p1271_p6), %s290_s9, 512  }
  0x94   : > { %848 = vsyncadd (%p1271_p6), %s290_s9, 4294966784  ;;  %v333_v0 = vld [vmem:[%s1137_s12] sm:$0xf]  ;;  %v334_v1 = vld [vmem:[%s1137_s12 + $0x4] sm:$0xf]  ;;  %s332_s25 = scalar_lea.vmem [#allocation10], %s1133_s8 }
  0x95   : > { %v341_v2 = vld [vmem:[%s1145_s13] sm:$0xf]  ;;  %v342_v3 = vld [vmem:[%s1145_s13 + $0x4] sm:$0xf]  ;;  %v335_v10 = vld [vmem:[%s1137_s12 + $0x8] sm:$0xf] }
  0x96   : > { %v349_v4 = vmax.bf16 %v341_v2, %v333_v0  ;;  %v357_v5 = vld [vmem:[%s1152_s23] sm:$0xf]  ;;  %v358_v6 = vld [vmem:[%s1152_s23 + $0x4] sm:$0xf]  ;;  %v350_v7 = vmax.bf16 %v342_v3, %v334_v1  ;;  %v336_v13 = vld [vmem:[%s1137_s12 + $0xc] sm:$0xf] }
  0x97   : > { %v365_v8 = vld [vmem:[%s1156_s7] sm:$0xf]  ;;  %v366_v9 = vld [vmem:[%s1156_s7 + $0x4] sm:$0xf]  ;;  %v343_v14 = vld [vmem:[%s1145_s13 + $0x8] sm:$0xf] }
  0x98   : > { %v373_v11 = vmax.bf16 %v365_v8, %v357_v5  ;;  %v374_v12 = vmax.bf16 %v366_v9, %v358_v6  ;;  %v344_v15 = vld [vmem:[%s1145_s13 + $0xc] sm:$0xf]  ;;  %v351_v16 = vmax.bf16 %v343_v14, %v335_v10  ;;  %v359_v18 = vld [vmem:[%s1152_s23 + $0x8] sm:$0xf]  ;;  %v337_v25 = vld [vmem:[%s1137_s12 + $0x10] sm:$0xf] }
  0x99   : > { %v352_v17 = vmax.bf16 %v344_v15, %v336_v13  ;;  %v360_v19 = vld [vmem:[%s1152_s23 + $0xc] sm:$0xf]  ;;  %v367_v20 = vld [vmem:[%s1156_s7 + $0x8] sm:$0xf]  ;;  %v338_v26 = vld [vmem:[%s1137_s12 + $0x14] sm:$0xf] }
  0x9a   : > { %v381_v21 = vmax.bf16 %v373_v11, %v349_v4  ;;  %v382_v22 = vmax.bf16 %v374_v12, %v350_v7  ;;  %v368_v23 = vld [vmem:[%s1156_s7 + $0xc] sm:$0xf]  ;;  %v375_v24 = vmax.bf16 %v367_v20, %v359_v18  ;;  %v345_v28 = vld [vmem:[%s1145_s13 + $0x10] sm:$0xf]  ;;  %v346_v29 = vld [vmem:[%s1145_s13 + $0x14] sm:$0xf] }
  0x9b   : > { %v376_v27 = vmax.bf16 %v368_v23, %v360_v19  ;;  %v361_v30 = vld [vmem:[%s1152_s23 + $0x10] sm:$0xf]  ;;  %v353_v33 = vmax.bf16 %v345_v28, %v337_v25  ;;  %v354_v34 = vmax.bf16 %v346_v29, %v338_v26  ;;  %v362_v35 = vld [vmem:[%s1152_s23 + $0x14] sm:$0xf]  ;;  %v339_v41 = vld [vmem:[%s1137_s12 + $0x18] sm:$0xf] }
  0x9c   : > { %v601_v31 = vcombine.low %v381_v21, %v382_v22  ;;  %v383_v32 = vmax.bf16 %v375_v24, %v351_v16  ;;  %v369_v36 = vld [vmem:[%s1156_s7 + $0x10] sm:$0xf]  ;;  %v370_v37 = vld [vmem:[%s1156_s7 + $0x14] sm:$0xf]  ;;  %v340_v42 = vld [vmem:[%s1137_s12 + $0x1c] sm:$0xf] }
  0x9d   : > { %v384_v38 = vmax.bf16 %v376_v27, %v352_v17  ;;  %v377_v39 = vmax.bf16 %v369_v36, %v361_v30  ;;  %v378_v40 = vmax.bf16 %v370_v37, %v362_v35  ;;  %v347_v43 = vld [vmem:[%s1145_s13 + $0x18] sm:$0xf]  ;;  %v348_v44 = vld [vmem:[%s1145_s13 + $0x1c] sm:$0xf]  ;;  %s411_s24 = sshll.u32 %s332_s25, 4  ;;  %s580_s20 = sshll.u32 %s924_s19, 9  ;;  %s1196_s24 = int_to_ptr.vmem [resolvable:$true] %s411_s24 }
  0x9e   : > { %585 = vst [vmem:[%s332_s25] sm:$0xff] %v601_v31   ;;  %v355_v45 = vmax.bf16 %v347_v43, %v339_v41  ;;  %v363_v46 = vld [vmem:[%s1152_s23 + $0x18] sm:$0xf]  ;;  %v364_v47 = vld [vmem:[%s1152_s23 + $0x1c] sm:$0xf]  ;;  %v356_v51 = vmax.bf16 %v348_v44, %v340_v42  ;;  %s1201_s6 = scalar_lea.hbm %s1249_s4, %s580_s20  ;;  %s398_s30 = scalar_lea.sflag [#allocation4], %s1130_s14 }
  0x9f   : > { %v602_v48 = vcombine.low %v383_v32, %v384_v38  ;;  %v385_v49 = vmax.bf16 %v377_v39, %v353_v33  ;;  %v386_v50 = vmax.bf16 %v378_v40, %v354_v34  ;;  %v371_v52 = vld [vmem:[%s1156_s7 + $0x18] sm:$0xf]  ;;  %v372_v53 = vld [vmem:[%s1156_s7 + $0x1c] sm:$0xf]  ;;  %s793_s0 = scalar_lea.vmem %s1196_s24, 512  ;;  %p1272_p0 = scmp.ne.s32.totalorder %s1260_s26, 0 }
  0xa0   : > { %v379_v54 = vmax.bf16 %v371_v52, %v363_v46  ;;  %v380_v55 = vmax.bf16 %v372_v53, %v364_v47  ;;  %p794_p13 = scmp.ne.s32.totalorder %s1196_s24, %s793_s0  ;;  %s875_s19 = smov [#allocation10]  }
  0xa1   : > { %603 = vst [vmem:[%s332_s25 + $0x8] sm:$0xff] %v602_v48   ;;  %v604_v56 = vcombine.low %v385_v49, %v386_v50  ;;  %s797_s22 = sshll.u32 %s875_s19, 4  ;;  %s798_s22 = int_to_ptr.vmem [resolvable:$false] %s797_s22 }
  0xa2   : > { %v387_v57 = vmax.bf16 %v379_v54, %v355_v45  ;;  %v388_v58 = vmax.bf16 %v380_v55, %v356_v51  ;;  %p795_p8 = pnand %p794_p13, %p1272_p0  ;;  %s799_s11 = scalar_lea.vmem %s798_s22, 1024 }
  0xa3   : > { %605 = vst [vmem:[%s332_s25 + $0x10] sm:$0xff] %v604_v56   ;;  %p800_p11 = scmp.lt.s32.totalorder %s1196_s24, %s798_s22  ;;  %p801_p4 = scmp.lt.s32.totalorder %s799_s11, %s793_s0 }
  0xa4   : > { %v606_v59 = vcombine.low %v387_v57, %v388_v58  ;;  %p796_p10 = pneg %p795_p8 }
  0xa5   : > { %p802_p3 = por %p801_p4, %p800_p11 }
  0xa6   : > { %607 = vst [vmem:[%s332_s25 + $0x18] sm:$0xff] %v606_v59  }
  0xa7   : > { %p803_p5 = pnand %p802_p3, %p796_p10 }
  0xa9   : > { %806 = shalt.err (!%p803_p5)
}
  0xaa   : > { %s807_s8 = scalar_lea.hbm %s1201_s6, 512  ;;  %s811_s28 = scalar_lea.hbm %s1249_s4, 1024 }
  0xab   : > { %p808_p1 = scmp.ne.s32.totalorder %s1201_s6, %s807_s8  ;;  %p812_p12 = scmp.lt.u32.totalorder %s1201_s6, %s1249_s4 }
  0xac   : > { %p813_p2 = scmp.lt.u32.totalorder %s811_s28, %s807_s8  ;;  %p815_p13 = scmp.lt.u32.totalorder %s807_s8, %s1201_s6 }
  0xad   : > { %p809_p7 = pnand %p808_p1, %p1272_p0 }
  0xae   : > { %p814_p6 = por %p813_p2, %p812_p12 }
  0xaf   : > { %p810_p9 = pneg %p809_p7 }
  0xb0   : > { %p816_p8 = por %p815_p13, %p814_p6 }
  0xb2   : > { %p817_p10 = pnand %p816_p8, %p810_p9 }
  0xb4   : > { %820 = shalt.err (!%p817_p10)
}
  0xb5   : > { %s876_s23 = smov 64   ;;  %s877_s9 = smov 4  }
  0xb6   : > { %616 = dma.vmem_to_hbm [thread:$0]  (%p1272_p0), %s1196_s24, 512, %s1201_s6, %s398_s30, %s876_s23, %s876_s23, %s877_s9  }
  0xb7 PF: > { %s426_s7 = sand.u32 1, %s855_s15   ;;  %p1273_p11 = scmp.ne.s32.totalorder %s1261_s27, 0 }
  0xb8   : > { %p1274_p4 = scmp.ge.s32.totalorder %s867_s18, 2  ;;  %s427_s25 = scalar_lea.sflag [#allocation4], %s426_s7 }
  0xba   : > { %p632_p3 = pnand %p1274_p4, %p1273_p11 }
  0xbc   : > { %850 = dma.done.wait (!%p632_p3), %s427_s25, 512  }
  0xbd   : > { %852 = vsyncadd (!%p632_p3), %s427_s25, 4294966784  ;;  %s1275_s20 = sld [smem:[#allocation15_spill]]  ;;  %p23_p5 = scmp.ge.s32.totalorder %s928_s21, 4  }
  0xbe   : > { %s1276_s15 = smov %s859_s16  ;;  %s1277_s16 = smov %s863_s17 }
  0xbf   : > { %s1279_s18 = smov %s928_s21  ;;  %25 = sbr.rel (!%p23_p5) target bundleno = 12 (0xc), region = 118 }
  0xc3   : > { %s1278_s17 = smov %s1275_s20 }
  0xc6   :  { %432 = vsyncpa [#allocation3], 1 }
  0xc7   :  { %434 = vsyncpa [#allocation3 + $0x1], 1 }
  0xc8   :  { %435 = vsyncpa [#allocation6], 1 }
  0xc9   :  { %437 = vsyncpa [#allocation6 + $0x1], 1 }
  0xca   :  { %438 = vsyncpa [#allocation9], 1 }
  0xcb   :  { %440 = vsyncpa [#allocation9 + $0x1], 1 }
  0xcc   :  { %441 = vsyncpa [#allocation4], 1 }
  0xcd   :  { %443 = vsyncpa [#allocation4 + $0x1], 1 }

// kernel: down_forward.7
= control target key start
LH: loop header
LB: loop body
LE: loop exit
PB: predicated region body
PF: predicated region fallthrough
CT: control target
= control target key end

     0   :  { %s1032_s0 = inlined_call_operand.hbm [shape: f32[2,8,8,128], index: 0, kind: input, shape index: {}]   ;;  %s1033_s1 = inlined_call_operand.hbm [shape: f32[1,128], index: 1, kind: input, shape index: {}]   ;;  %s1034_s2 = inlined_call_operand.hbm [shape: f32[1,128], index: 2, kind: input, shape index: {}]   ;;  %s1035_s3 = inlined_call_operand.hbm [shape: bf16[2,8,8,128], index: 3, kind: output, shape index: {}]  }
   0x1   :  { %1044 = sst [smem:[#allocation14_spill]] %s1033_s1 }
   0x2   :  { %1045 = sst [smem:[#allocation15_spill]] %s1034_s2 }
   0x3   :  { %8 = vsyncpa [#allocation3], 0 }
   0x4   :  { %10 = vsyncpa [#allocation3 + $0x1], 0 }
   0x5   :  { %11 = vsyncpa [#allocation6], 0 }
   0x6   :  { %12 = vsyncpa [#allocation4], 0 }
   0x7   :  { %14 = vsyncpa [#allocation4 + $0x1], 0  ;;  %s760_s12 = smov 0   ;;  %s762_s13 = smov 0  }
   0x8   :  { %s764_s14 = smov 0   ;;  %s766_s15 = smov 0  }
   0x9   :  { %s768_s16 = smov 0   ;;  %s770_s17 = smov 0  }
   0xa   :  { %s772_s18 = smov 0   ;;  %s774_s19 = smov 0  }
   0xb LB: > { %1046 = sst [smem:[#allocation12_spill]] %s722_s17  ;;  %s405_s20 = sadd.s32 4294967295, %s730_s19   ;;  %s730_s19 = sphi %s774_s19, %s20_s19   ;;  %s726_s18 = sphi %s772_s18, %s1071_s18   ;;  %s722_s17 = sphi %s770_s17, %s1066_s17   ;;  %s718_s16 = sphi %s768_s16, %s1070_s16   ;;  %s714_s15 = sphi %s766_s15, %s1065_s15   ;;  %s710_s14 = sphi %s764_s14, %s1069_s14   ;;  %s706_s13 = sphi %s762_s13, %s1068_s13   ;;  %s702_s12 = sphi %s760_s12, %s1067_s12  }
   0xc   : > { %s406_s21 = sadd.s32 4294967294, %s730_s19   ;;  %p48_p0 = scmp.ne.s32.totalorder %s710_s14, %s706_s13 }
   0xd   : > { %p49_p1 = scmp.eq.s32.totalorder %s730_s19, 0  ;;  %p54_p2 = scmp.ne.s32.totalorder %s706_s13, %s702_s12 }
   0xe   : > { %p808_p3 = scmp.eq.s32.totalorder %s405_s20, 0  ;;  %p122_p4 = scmp.eq.s32.totalorder %s405_s20, 3 }
   0xf   : > { %p812_p5 = por %p49_p1, %p48_p0  ;;  %p128_p6 = scmp.eq.s32.totalorder %s406_s21, 3 }
  0x10   : > { %s1047_s23 = scalar_select %p808_p3, 1, 0 }
  0x11   : > { %p818_p7 = por %p808_p3, %p54_p2  ;;  %p822_p8 = por %p122_p4, %p48_p0 }
  0x12   : > { %p826_p9 = por %p128_p6, %p54_p2  ;;  %p407_p10 = scmp.ge.s32.totalorder %s730_s19, 1 }
  0x13   : > { %s1049_s25 = scalar_select %p818_p7, 1, 0 }
  0x14   : > { %s1050_s26 = scalar_select %p822_p8, 1, 0 }
  0x15   : > { %s1051_s27 = scalar_select %p826_p9, 1, 0 }
  0x16   : > { %p135_p11 = scmp.lt.s32.totalorder %s730_s19, 5  ;;  %s732_s29 = smov [#allocation5]  }
  0x17   : > { %s148_s30 = sshll.u32 %s732_s29, 4  ;;  %p468_p13 = scmp.lt.s32.totalorder %s730_s19, 4  ;;  %s149_s30 = int_to_ptr.vmem [resolvable:$true] %s148_s30 }
  0x18   : > { %p832_p12 = pnand %p407_p10, %p135_p11  ;;  %s733_s5 = smov [#allocation7]  }
  0x19   : > { %p841_p1 = pnand %p468_p13, %p812_p5  ;;  %s159_s6 = sshll.u32 %s733_s5, 4  ;;  %s851_s6 = int_to_ptr.vmem [resolvable:$true] %s159_s6 }
  0x1a   : > { %s1052_s28 = scalar_select %p832_p12, 1, 0 }
  0x1b   : > { %p451_p0 = pneg %p832_p12  ;;  %s1055_s1 = sld [smem:[#allocation14_spill]] }
  0x1c   : > { %s1053_s4 = scalar_select %p841_p1, 1, 0 }
  0x1d   : > { %p847_p2 = pnand %p451_p0, %p808_p3 }
  0x1f   : > { %p544_p5 = pneg %p847_p2 }
  0x21   : > { %s542_s10 = scalar_lea.hbm %s1055_s1, 16 }
  0x22   : > { %p543_p4 = scmp.ne.s32.totalorder %s1055_s1, %s542_s10  ;;  %p549_p11 = scmp.lt.u32.totalorder %s542_s10, %s1055_s1 }
  0x24   : > { %p545_p6 = pnand %p544_p5, %p543_p4 }
  0x26   : > { %p546_p10 = pneg %p545_p6 }
  0x28   : > { %p551_p13 = pnand %p549_p11, %p546_p10 }
  0x2a   : > { %554 = shalt.err (!%p551_p13)
}
  0x2b   : > { %s555_s29 = scalar_lea.vmem %s149_s30, 16  ;;  %s562_s5 = scalar_lea.vmem %s149_s30, 32 }
  0x2c   : > { %p556_p0 = scmp.ne.s32.totalorder %s149_s30, %s555_s29  ;;  %p563_p3 = scmp.lt.s32.totalorder %s149_s30, %s149_s30 }
  0x2d   : > { %p564_p7 = scmp.lt.s32.totalorder %s562_s5, %s555_s29 }
  0x2e   : > { %p558_p9 = pnand %p556_p0, %p544_p5 }
  0x2f   : > { %p565_p12 = por %p564_p7, %p563_p3 }
  0x30   : > { %p559_p8 = pneg %p558_p9 }
  0x32   : > { %p566_p1 = pnand %p565_p12, %p559_p8 }
  0x34   : > { %569 = shalt.err (!%p566_p1)
}
  0x35   : > { %454 = dma.hbm_to_vmem [thread:$0]  (!%p847_p2), %s1055_s1, 16, %s149_s30, [#allocation6]  }
  0x36   : > { %s1056_s2 = sld [smem:[#allocation15_spill]] }
  0x3c   : > { %s570_s20 = scalar_lea.hbm %s1056_s2, 16 }
  0x3d   : > { %p571_p9 = scmp.ne.s32.totalorder %s1056_s2, %s570_s20  ;;  %p577_p8 = scmp.lt.u32.totalorder %s570_s20, %s1056_s2 }
  0x3f   : > { %p573_p3 = pnand %p571_p9, %p544_p5 }
  0x41   : > { %p574_p7 = pneg %p573_p3 }
  0x43   : > { %p579_p12 = pnand %p577_p8, %p574_p7 }
  0x45   : > { %582 = shalt.err (!%p579_p12)
}
  0x46   : > { %s583_s30 = scalar_lea.vmem %s851_s6, 16  ;;  %s590_s8 = scalar_lea.vmem %s851_s6, 32 }
  0x47   : > { %p584_p1 = scmp.ne.s32.totalorder %s851_s6, %s583_s30  ;;  %p591_p10 = scmp.lt.s32.totalorder %s851_s6, %s851_s6 }
  0x48   : > { %p592_p11 = scmp.lt.s32.totalorder %s590_s8, %s583_s30 }
  0x49   : > { %p586_p4 = pnand %p584_p1, %p544_p5 }
  0x4a   : > { %p593_p13 = por %p592_p11, %p591_p10 }
  0x4b   : > { %p587_p6 = pneg %p586_p4 }
  0x4d   : > { %p594_p0 = pnand %p593_p13, %p587_p6 }
  0x4f   : > { %597 = shalt.err (!%p594_p0)
}
  0x50   : > { %457 = dma.hbm_to_vmem [thread:$0]  (!%p847_p2), %s1056_s2, 16, %s851_s6, [#allocation6]  }
  0x51   : > { %s29_s11 = sadd.s32 1, %s722_s17  ;;  %s32_s20 = sadd.s32 1, %s726_s18 }
  0x52   : > { %p30_p5 = scmp.ge.s32.totalorder %s29_s11, 2  ;;  %s170_s21 = sand.u32 1, %s710_s14  }
  0x53   : > { %s411_s24 = sshll.u32 %s170_s21, 5  ;;  %s412_s29 = sshll.u32 %s722_s17, 2 }
  0x54   : > { %s1073_s11 = smov (%p30_p5, %s29_s11), 0  ;;  %s1075_s20 = smov (!%p30_p5, %s32_s20), %s726_s18 }
  0x55   : > { %1057 = sst [smem:[#allocation13_spill]] %s1073_s11  ;;  %s37_s7 = ssub.s32 %s722_s17, %s1073_s11 }
  0x56   : > { %p34_p9 = scmp.ge.s32.totalorder %s1075_s20, 2  ;;  %s413_s5 = sshll.u32 %s726_s18, 3 }
  0x57   : > { %s174_s30 = scalar_lea.vmem [#allocation2], %s411_s24  ;;  %s180_s8 = sadd.s32 %s413_s5, %s412_s29 }
  0x58   : > { %s183_s6 = sshll.u32 %s174_s30, 4  ;;  %s1077_s20 = smov (%p34_p9, %s1075_s20), 0  ;;  %s913_s6 = int_to_ptr.vmem [resolvable:$true] %s183_s6 }
  0x59   : > { %s36_s9 = ssub.s32 %s726_s18, %s1077_s20  ;;  %s414_s10 = sshll.u32 %s180_s8, 7 }
  0x5a   : > { %s38_s22 = sor.u32 %s37_s7, %s36_s9  ;;  %s920_s11 = scalar_lea.hbm %s1032_s0, %s414_s10 }
  0x5b   : > { %p39_p2 = scmp.eq.s32.totalorder %s38_s22, 0  ;;  %s1058_s24 = sadd.s32 1, %s710_s14 }
  0x5c   : > { %s927_s17 = scalar_lea.sflag [#allocation3], %s170_s21  ;;  %s598_s29 = scalar_lea.hbm %s920_s11, 512 }
  0x5d   : > { %s925_s30 = scalar_select %p39_p2, %s710_s14, %s1058_s24  }
  0x5e   : > { %p599_p3 = scmp.ne.s32.totalorder %s920_s11, %s598_s29  ;;  %p1059_p7 = scmp.ne.s32.totalorder %s1053_s4, 0 }
  0x5f   : > { %s603_s7 = scalar_lea.hbm %s1032_s0, 2048  ;;  %p604_p4 = scmp.lt.u32.totalorder %s920_s11, %s1032_s0 }
  0x60   : > { %p600_p8 = pneg %p1059_p7  ;;  %p605_p6 = scmp.lt.u32.totalorder %s603_s7, %s598_s29 }
  0x61   : > { %p607_p11 = scmp.lt.u32.totalorder %s598_s29, %s920_s11 }
  0x62   : > { %p601_p12 = pnand %p600_p8, %p599_p3  ;;  %p606_p10 = por %p605_p6, %p604_p4 }
  0x64   : > { %p602_p1 = pneg %p601_p12  ;;  %p608_p13 = por %p607_p11, %p606_p10 }
  0x66   : > { %p609_p0 = pnand %p608_p13, %p602_p1 }
  0x68   : > { %612 = shalt.err (!%p609_p0)
}
  0x69   : > { %s613_s22 = scalar_lea.vmem %s913_s6, 512  ;;  %s734_s21 = smov [#allocation2]  }
  0x6a   : > { %p614_p5 = scmp.ne.s32.totalorder %s913_s6, %s613_s22  ;;  %s618_s9 = sshll.u32 %s734_s21, 4  ;;  %s619_s9 = int_to_ptr.vmem [resolvable:$false] %s618_s9 }
  0x6b   : > { %s620_s10 = scalar_lea.vmem %s619_s9, 1024  ;;  %p621_p3 = scmp.lt.s32.totalorder %s913_s6, %s619_s9 }
  0x6c   : > { %p616_p9 = pnand %p614_p5, %p600_p8  ;;  %p622_p12 = scmp.lt.s32.totalorder %s620_s10, %s613_s22 }
  0x6e   : > { %p617_p2 = pneg %p616_p9  ;;  %p623_p4 = por %p622_p12, %p621_p3 }
  0x70   : > { %p624_p6 = pnand %p623_p4, %p617_p2 }
  0x72   : > { %627 = shalt.err (!%p624_p6)
}
  0x73   : > { %s735_s24 = smov 128   ;;  %s736_s29 = smov 8  }
  0x74   : > { %461 = dma.hbm_to_vmem [thread:$0]  (!%p1059_p7), %s920_s11, 512, %s913_s6, %s927_s17, %s735_s24, %s735_s24, %s736_s29  }
  0x75   : > { %p1060_p8 = scmp.ne.s32.totalorder %s1052_s28, 0 }
  0x76   : > { %s958_s1 = sand.u32 (!%p1060_p8), 1, %s706_s13   ;;  %p1061_p1 = scmp.ne.s32.totalorder (!%p1060_p8), %s1049_s25, 0 }
  0x77   : > { %195 = sbr.rel (%p1060_p8) target bundleno = 161 (0xa1), region = 32  ;;  %s416_s2 = sshll.u32 (!%p1060_p8), %s958_s1, 5 }
  0x78   : > { %s198_s7 = scalar_lea.sflag (!%p1060_p8), [#allocation3], %s958_s1  ;;  %s201_s5 = scalar_lea.vmem (!%p1060_p8), [#allocation2], %s416_s2 }
  0x7e   : > { %689 = dma.done.wait (%p1061_p1), %s198_s7, 512  }
  0x7f   : > { %691 = vsyncadd (%p1061_p1), %s198_s7, 4294966784  ;;  %p1062_p10 = scmp.ne.s32.totalorder %s1047_s23, 0 }
  0x81   : > { %693 = dma.done.wait (%p1062_p10), [#allocation6], 32  }
  0x82   : > { %695 = vsyncadd (%p1062_p10), [#allocation6], 4294967264  ;;  %s419_s17 = sshll.u32 %s958_s1, 4  ;;  %s423_s28 = sshll.u32 %s714_s15, 2  ;;  %v234_v0 = vld [vmem:[%s201_s5] sm:$0xff]  ;;  %v235_v1 = vld [vmem:[%s201_s5 + $0x8] sm:$0xff] }
  0x83   : > { %s424_s4 = sshll.u32 %s718_s16, 3  ;;  %v420_v2 = vld [vmem:[#allocation5] ss:$0 sm:$0xff]  ;;  %v421_v5 = vld [vmem:[#allocation7] ss:$0 sm:$0xff]  ;;  %v236_v6 = vld [vmem:[%s201_s5 + $0x10] sm:$0xff] }
  0x84   : > { %v245_v3 = vmul.f32 %v420_v2, %v234_v0  ;;  %v246_v4 = vmul.f32 %v420_v2, %v235_v1  ;;  %v237_v7 = vld [vmem:[%s201_s5 + $0x18] sm:$0xff]  ;;  %s293_s25 = sadd.s32 %s424_s4, %s423_s28  ;;  %v247_v8 = vmul.f32 %v420_v2, %v236_v6  ;;  %s231_s23 = scalar_lea.vmem [#allocation8], %s419_s17 }
  0x85   : > { %v248_v9 = vmul.f32 %v420_v2, %v237_v7  ;;  %s296_s11 = sshll.u32 %s231_s23, 4  ;;  %s425_s6 = sshll.u32 %s293_s25, 6  ;;  %s973_s11 = int_to_ptr.vmem [resolvable:$true] %s296_s11 }
  0x86   : > { %v256_v10 = vadd.f32 %v421_v5, %v245_v3  ;;  %v257_v11 = vadd.f32 %v421_v5, %v246_v4  ;;  %v258_v12 = vadd.f32 %v421_v5, %v247_v8  ;;  %s978_s8 = scalar_lea.hbm %s1035_s3, %s425_s6  ;;  %s281_s22 = scalar_lea.sflag [#allocation4], %s958_s1 }
  0x87   : > { %v259_v13 = vadd.f32 %v421_v5, %v248_v9  ;;  %s628_s21 = scalar_lea.vmem %s973_s11, 256  ;;  %p1063_p11 = scmp.ne.s32.totalorder %s1050_s26, 0 }
  0x88   : > { %vm260_vm0 = vcmp.ge.f32.partialorder %v256_v10, 0.0  ;;  %vm261_vm1 = vcmp.ge.f32.partialorder %v257_v11, 0.0  ;;  %v264_v14 = vmul.f32 0.2, %v256_v10  ;;  %v265_v15 = vmul.f32 0.2, %v257_v11  ;;  %p629_p7 = scmp.ne.s32.totalorder %s973_s11, %s628_s21 }
  0x89   : > { %vm262_vm2 = vcmp.ge.f32.partialorder %v258_v12, 0.0  ;;  %vm263_vm3 = vcmp.ge.f32.partialorder %v259_v13, 0.0  ;;  %v266_v16 = vmul.f32 0.2, %v258_v12  ;;  %v267_v17 = vmul.f32 0.2, %v259_v13 }
  0x8a   : > { %v268_v18 = vsel %vm260_vm0, %v256_v10, %v264_v14  ;;  %v269_v19 = vsel %vm261_vm1, %v257_v11, %v265_v15  ;;  %p630_p13 = pnand %p629_p7, %p1063_p11  ;;  %s737_s9 = smov [#allocation8]  }
  0x8b   : > { %v431_v20 = vpack.c.bf16 %v269_v19, %v268_v18  ;;  %v270_v21 = vsel %vm262_vm2, %v258_v12, %v266_v16  ;;  %v271_v22 = vsel %vm263_vm3, %v259_v13, %v267_v17  ;;  %s632_s10 = sshll.u32 %s737_s9, 4  ;;  %s633_s10 = int_to_ptr.vmem [resolvable:$false] %s632_s10 }
  0x8c   : > { %v436_v23 = vpack.c.bf16 %v271_v22, %v270_v21  ;;  %p631_p0 = pneg %p630_p13  ;;  %s634_s24 = scalar_lea.vmem %s633_s10, 512 }
  0x8d   : > { %432 = vst [vmem:[%s231_s23] sm:$0xff] %v431_v20   ;;  %p635_p5 = scmp.lt.s32.totalorder %s973_s11, %s633_s10  ;;  %p636_p9 = scmp.lt.s32.totalorder %s634_s24, %s628_s21 }
  0x8e   : > { %438 = vst [vmem:[%s231_s23 + $0x8] sm:$0xff] %v436_v23  }
  0x8f   : > { %p637_p2 = por %p636_p9, %p635_p5 }
  0x91   : > { %p638_p3 = pnand %p637_p2, %p631_p0 }
  0x93   : > { %641 = shalt.err (!%p638_p3)
}
  0x94   : > { %s642_s29 = scalar_lea.hbm %s978_s8, 256  ;;  %s646_s5 = scalar_lea.hbm %s1035_s3, 1024 }
  0x95   : > { %p643_p12 = scmp.ne.s32.totalorder %s978_s8, %s642_s29  ;;  %p647_p8 = scmp.lt.u32.totalorder %s978_s8, %s1035_s3 }
  0x96   : > { %p648_p1 = scmp.lt.u32.totalorder %s646_s5, %s642_s29  ;;  %p650_p7 = scmp.lt.u32.totalorder %s642_s29, %s978_s8 }
  0x97   : > { %p644_p4 = pnand %p643_p12, %p1063_p11 }
  0x98   : > { %p649_p10 = por %p648_p1, %p647_p8 }
  0x99   : > { %p645_p6 = pneg %p644_p4 }
  0x9a   : > { %p651_p13 = por %p650_p7, %p649_p10 }
  0x9c   : > { %p652_p0 = pnand %p651_p13, %p645_p6 }
  0x9e   : > { %655 = shalt.err (!%p652_p0)
}
  0x9f   : > { %s738_s4 = smov 64   ;;  %s739_s25 = smov 4  }
  0xa0   : > { %449 = dma.vmem_to_hbm [thread:$0]  (%p1063_p11), %s973_s11, 256, %s978_s8, %s281_s22, %s738_s4, %s738_s4, %s739_s25  }
  0xa1 PF: > { %p471_p5 = scmp.ge.s32.totalorder %s730_s19, 2  ;;  %s311_s23 = sand.u32 1, %s702_s12  }
  0xa2   : > { %p1064_p9 = scmp.ne.s32.totalorder %s1051_s27, 0  ;;  %s312_s6 = scalar_lea.sflag [#allocation4], %s311_s23 }
  0xa4   : > { %p463_p2 = pnand %p471_p5, %p1064_p9 }
  0xa6   : > { %697 = dma.done.wait (!%p463_p2), %s312_s6, 256  }
  0xa7   : > { %699 = vsyncadd (!%p463_p2), %s312_s6, 4294967040  ;;  %s20_s19 = sadd.s32 1, %s730_s19   ;;  %s1065_s15 = sld [smem:[#allocation12_spill]] }
  0xa8   : > { %p17_p3 = scmp.ge.s32.totalorder %s20_s19, 6   ;;  %s1066_s17 = sld [smem:[#allocation13_spill]] }
  0xa9   : > { %s1067_s12 = smov %s706_s13  ;;  %s1068_s13 = smov %s710_s14 }
  0xaa   : > { %s1069_s14 = smov %s925_s30  ;;  %s1070_s16 = smov %s726_s18 }
  0xab   : > { %s1071_s18 = smov %s1077_s20  ;;  %19 = sbr.rel (!%p17_p3) target bundleno = 11 (0xb), region = 85 }
  0xb2   :  { %317 = vsyncpa [#allocation3], 1 }
  0xb3   :  { %319 = vsyncpa [#allocation3 + $0x1], 1 }
  0xb4   :  { %320 = vsyncpa [#allocation6], 1 }
  0xb5   :  { %321 = vsyncpa [#allocation4], 1 }
  0xb6   :  { %323 = vsyncpa [#allocation4 + $0x1], 1 }

// kernel: down_forward.9
= control target key start
LH: loop header
LB: loop body
LE: loop exit
PB: predicated region body
PF: predicated region fallthrough
CT: control target
= control target key end

     0   :  { %s1016_s0 = inlined_call_operand.hbm [shape: f32[2,8,8,128], index: 0, kind: input, shape index: {}]   ;;  %s1017_s1 = inlined_call_operand.hbm [shape: f32[1,128], index: 1, kind: input, shape index: {}]   ;;  %s1018_s2 = inlined_call_operand.hbm [shape: f32[1,128], index: 2, kind: input, shape index: {}]   ;;  %s1019_s3 = inlined_call_operand.hbm [shape: f32[2,8,8,128], index: 3, kind: output, shape index: {}]  }
   0x1   :  { %1028 = sst [smem:[#allocation14_spill]] %s1017_s1 }
   0x2   :  { %1029 = sst [smem:[#allocation15_spill]] %s1018_s2 }
   0x3   :  { %8 = vsyncpa [#allocation3], 0 }
   0x4   :  { %10 = vsyncpa [#allocation3 + $0x1], 0 }
   0x5   :  { %11 = vsyncpa [#allocation6], 0 }
   0x6   :  { %12 = vsyncpa [#allocation4], 0 }
   0x7   :  { %14 = vsyncpa [#allocation4 + $0x1], 0  ;;  %s745_s12 = smov 0   ;;  %s747_s13 = smov 0  }
   0x8   :  { %s749_s14 = smov 0   ;;  %s751_s15 = smov 0  }
   0x9   :  { %s753_s16 = smov 0   ;;  %s755_s17 = smov 0  }
   0xa   :  { %s757_s18 = smov 0   ;;  %s759_s19 = smov 0  }
   0xb LB: > { %1030 = sst [smem:[#allocation12_spill]] %s707_s17  ;;  %s401_s20 = sadd.s32 4294967295, %s715_s19   ;;  %s715_s19 = sphi %s759_s19, %s20_s19   ;;  %s711_s18 = sphi %s757_s18, %s1055_s18   ;;  %s707_s17 = sphi %s755_s17, %s1050_s17   ;;  %s703_s16 = sphi %s753_s16, %s1054_s16   ;;  %s699_s15 = sphi %s751_s15, %s1049_s15   ;;  %s695_s14 = sphi %s749_s14, %s1053_s14   ;;  %s691_s13 = sphi %s747_s13, %s1052_s13   ;;  %s687_s12 = sphi %s745_s12, %s1051_s12  }
   0xc   : > { %s402_s21 = sadd.s32 4294967294, %s715_s19   ;;  %p48_p0 = scmp.ne.s32.totalorder %s695_s14, %s691_s13 }
   0xd   : > { %p49_p1 = scmp.eq.s32.totalorder %s715_s19, 0  ;;  %p54_p2 = scmp.ne.s32.totalorder %s691_s13, %s687_s12 }
   0xe   : > { %p793_p3 = scmp.eq.s32.totalorder %s401_s20, 0  ;;  %p122_p4 = scmp.eq.s32.totalorder %s401_s20, 3 }
   0xf   : > { %p797_p5 = por %p49_p1, %p48_p0  ;;  %p128_p6 = scmp.eq.s32.totalorder %s402_s21, 3 }
  0x10   : > { %s1031_s23 = scalar_select %p793_p3, 1, 0 }
  0x11   : > { %p803_p7 = por %p793_p3, %p54_p2  ;;  %p807_p8 = por %p122_p4, %p48_p0 }
  0x12   : > { %p811_p9 = por %p128_p6, %p54_p2  ;;  %p403_p10 = scmp.ge.s32.totalorder %s715_s19, 1 }
  0x13   : > { %s1033_s25 = scalar_select %p803_p7, 1, 0 }
  0x14   : > { %s1034_s26 = scalar_select %p807_p8, 1, 0 }
  0x15   : > { %s1035_s27 = scalar_select %p811_p9, 1, 0 }
  0x16   : > { %p135_p11 = scmp.lt.s32.totalorder %s715_s19, 5  ;;  %s717_s29 = smov [#allocation5]  }
  0x17   : > { %s148_s30 = sshll.u32 %s717_s29, 4  ;;  %p453_p13 = scmp.lt.s32.totalorder %s715_s19, 4  ;;  %s149_s30 = int_to_ptr.vmem [resolvable:$true] %s148_s30 }
  0x18   : > { %p817_p12 = pnand %p403_p10, %p135_p11  ;;  %s718_s5 = smov [#allocation7]  }
  0x19   : > { %p826_p1 = pnand %p453_p13, %p797_p5  ;;  %s159_s6 = sshll.u32 %s718_s5, 4  ;;  %s836_s6 = int_to_ptr.vmem [resolvable:$true] %s159_s6 }
  0x1a   : > { %s1036_s28 = scalar_select %p817_p12, 1, 0 }
  0x1b   : > { %p436_p0 = pneg %p817_p12  ;;  %s1039_s1 = sld [smem:[#allocation14_spill]] }
  0x1c   : > { %s1037_s4 = scalar_select %p826_p1, 1, 0 }
  0x1d   : > { %p832_p2 = pnand %p436_p0, %p793_p3 }
  0x1f   : > { %p529_p5 = pneg %p832_p2 }
  0x21   : > { %s527_s10 = scalar_lea.hbm %s1039_s1, 16 }
  0x22   : > { %p528_p4 = scmp.ne.s32.totalorder %s1039_s1, %s527_s10  ;;  %p534_p11 = scmp.lt.u32.totalorder %s527_s10, %s1039_s1 }
  0x24   : > { %p530_p6 = pnand %p529_p5, %p528_p4 }
  0x26   : > { %p531_p10 = pneg %p530_p6 }
  0x28   : > { %p536_p13 = pnand %p534_p11, %p531_p10 }
  0x2a   : > { %539 = shalt.err (!%p536_p13)
}
  0x2b   : > { %s540_s29 = scalar_lea.vmem %s149_s30, 16  ;;  %s547_s5 = scalar_lea.vmem %s149_s30, 32 }
  0x2c   : > { %p541_p0 = scmp.ne.s32.totalorder %s149_s30, %s540_s29  ;;  %p548_p3 = scmp.lt.s32.totalorder %s149_s30, %s149_s30 }
  0x2d   : > { %p549_p7 = scmp.lt.s32.totalorder %s547_s5, %s540_s29 }
  0x2e   : > { %p543_p9 = pnand %p541_p0, %p529_p5 }
  0x2f   : > { %p550_p12 = por %p549_p7, %p548_p3 }
  0x30   : > { %p544_p8 = pneg %p543_p9 }
  0x32   : > { %p551_p1 = pnand %p550_p12, %p544_p8 }
  0x34   : > { %554 = shalt.err (!%p551_p1)
}
  0x35   : > { %439 = dma.hbm_to_vmem [thread:$0]  (!%p832_p2), %s1039_s1, 16, %s149_s30, [#allocation6]  }
  0x36   : > { %s1040_s2 = sld [smem:[#allocation15_spill]] }
  0x3c   : > { %s555_s20 = scalar_lea.hbm %s1040_s2, 16 }
  0x3d   : > { %p556_p9 = scmp.ne.s32.totalorder %s1040_s2, %s555_s20  ;;  %p562_p8 = scmp.lt.u32.totalorder %s555_s20, %s1040_s2 }
  0x3f   : > { %p558_p3 = pnand %p556_p9, %p529_p5 }
  0x41   : > { %p559_p7 = pneg %p558_p3 }
  0x43   : > { %p564_p12 = pnand %p562_p8, %p559_p7 }
  0x45   : > { %567 = shalt.err (!%p564_p12)
}
  0x46   : > { %s568_s30 = scalar_lea.vmem %s836_s6, 16  ;;  %s575_s8 = scalar_lea.vmem %s836_s6, 32 }
  0x47   : > { %p569_p1 = scmp.ne.s32.totalorder %s836_s6, %s568_s30  ;;  %p576_p10 = scmp.lt.s32.totalorder %s836_s6, %s836_s6 }
  0x48   : > { %p577_p11 = scmp.lt.s32.totalorder %s575_s8, %s568_s30 }
  0x49   : > { %p571_p4 = pnand %p569_p1, %p529_p5 }
  0x4a   : > { %p578_p13 = por %p577_p11, %p576_p10 }
  0x4b   : > { %p572_p6 = pneg %p571_p4 }
  0x4d   : > { %p579_p0 = pnand %p578_p13, %p572_p6 }
  0x4f   : > { %582 = shalt.err (!%p579_p0)
}
  0x50   : > { %442 = dma.hbm_to_vmem [thread:$0]  (!%p832_p2), %s1040_s2, 16, %s836_s6, [#allocation6]  }
  0x51   : > { %s29_s11 = sadd.s32 1, %s707_s17  ;;  %s32_s20 = sadd.s32 1, %s711_s18 }
  0x52   : > { %p30_p5 = scmp.ge.s32.totalorder %s29_s11, 2  ;;  %s170_s21 = sand.u32 1, %s695_s14  }
  0x53   : > { %s407_s24 = sshll.u32 %s170_s21, 5  ;;  %s408_s29 = sshll.u32 %s707_s17, 2 }
  0x54   : > { %s1057_s11 = smov (%p30_p5, %s29_s11), 0  ;;  %s1059_s20 = smov (!%p30_p5, %s32_s20), %s711_s18 }
  0x55   : > { %1041 = sst [smem:[#allocation13_spill]] %s1057_s11  ;;  %s37_s7 = ssub.s32 %s707_s17, %s1057_s11 }
  0x56   : > { %p34_p9 = scmp.ge.s32.totalorder %s1059_s20, 2  ;;  %s409_s5 = sshll.u32 %s711_s18, 3 }
  0x57   : > { %s174_s30 = scalar_lea.vmem [#allocation2], %s407_s24  ;;  %s180_s8 = sadd.s32 %s409_s5, %s408_s29 }
  0x58   : > { %s183_s6 = sshll.u32 %s174_s30, 4  ;;  %s1061_s20 = smov (%p34_p9, %s1059_s20), 0  ;;  %s898_s6 = int_to_ptr.vmem [resolvable:$true] %s183_s6 }
  0x59   : > { %s36_s9 = ssub.s32 %s711_s18, %s1061_s20  ;;  %s410_s10 = sshll.u32 %s180_s8, 7 }
  0x5a   : > { %s38_s22 = sor.u32 %s37_s7, %s36_s9  ;;  %s905_s11 = scalar_lea.hbm %s1016_s0, %s410_s10 }
  0x5b   : > { %p39_p2 = scmp.eq.s32.totalorder %s38_s22, 0  ;;  %s1042_s24 = sadd.s32 1, %s695_s14 }
  0x5c   : > { %s912_s17 = scalar_lea.sflag [#allocation3], %s170_s21  ;;  %s583_s29 = scalar_lea.hbm %s905_s11, 512 }
  0x5d   : > { %s910_s30 = scalar_select %p39_p2, %s695_s14, %s1042_s24  }
  0x5e   : > { %p584_p3 = scmp.ne.s32.totalorder %s905_s11, %s583_s29  ;;  %p1043_p7 = scmp.ne.s32.totalorder %s1037_s4, 0 }
  0x5f   : > { %s588_s7 = scalar_lea.hbm %s1016_s0, 2048  ;;  %p589_p4 = scmp.lt.u32.totalorder %s905_s11, %s1016_s0 }
  0x60   : > { %p585_p8 = pneg %p1043_p7  ;;  %p590_p6 = scmp.lt.u32.totalorder %s588_s7, %s583_s29 }
  0x61   : > { %p592_p11 = scmp.lt.u32.totalorder %s583_s29, %s905_s11 }
  0x62   : > { %p586_p12 = pnand %p585_p8, %p584_p3  ;;  %p591_p10 = por %p590_p6, %p589_p4 }
  0x64   : > { %p587_p1 = pneg %p586_p12  ;;  %p593_p13 = por %p592_p11, %p591_p10 }
  0x66   : > { %p594_p0 = pnand %p593_p13, %p587_p1 }
  0x68   : > { %597 = shalt.err (!%p594_p0)
}
  0x69   : > { %s598_s22 = scalar_lea.vmem %s898_s6, 512  ;;  %s719_s21 = smov [#allocation2]  }
  0x6a   : > { %p599_p5 = scmp.ne.s32.totalorder %s898_s6, %s598_s22  ;;  %s603_s9 = sshll.u32 %s719_s21, 4  ;;  %s604_s9 = int_to_ptr.vmem [resolvable:$false] %s603_s9 }
  0x6b   : > { %s605_s10 = scalar_lea.vmem %s604_s9, 1024  ;;  %p606_p3 = scmp.lt.s32.totalorder %s898_s6, %s604_s9 }
  0x6c   : > { %p601_p9 = pnand %p599_p5, %p585_p8  ;;  %p607_p12 = scmp.lt.s32.totalorder %s605_s10, %s598_s22 }
  0x6e   : > { %p602_p2 = pneg %p601_p9  ;;  %p608_p4 = por %p607_p12, %p606_p3 }
  0x70   : > { %p609_p6 = pnand %p608_p4, %p602_p2 }
  0x72   : > { %612 = shalt.err (!%p609_p6)
}
  0x73   : > { %s720_s24 = smov 128   ;;  %s721_s29 = smov 8  }
  0x74   : > { %446 = dma.hbm_to_vmem [thread:$0]  (!%p1043_p7), %s905_s11, 512, %s898_s6, %s912_s17, %s720_s24, %s720_s24, %s721_s29  }
  0x75   : > { %p1044_p8 = scmp.ne.s32.totalorder %s1036_s28, 0 }
  0x76   : > { %s943_s1 = sand.u32 (!%p1044_p8), 1, %s691_s13   ;;  %p1045_p1 = scmp.ne.s32.totalorder (!%p1044_p8), %s1033_s25, 0 }
  0x77   : > { %195 = sbr.rel (%p1044_p8) target bundleno = 160 (0xa0), region = 32  ;;  %s412_s2 = sshll.u32 (!%p1044_p8), %s943_s1, 5 }
  0x78   : > { %s198_s7 = scalar_lea.sflag (!%p1044_p8), [#allocation3], %s943_s1  ;;  %s201_s5 = scalar_lea.vmem (!%p1044_p8), [#allocation2], %s412_s2 }
  0x7e   : > { %674 = dma.done.wait (%p1045_p1), %s198_s7, 512  }
  0x7f   : > { %676 = vsyncadd (%p1045_p1), %s198_s7, 4294966784  ;;  %p1046_p10 = scmp.ne.s32.totalorder %s1031_s23, 0 }
  0x81   : > { %678 = dma.done.wait (%p1046_p10), [#allocation6], 32  }
  0x82   : > { %680 = vsyncadd (%p1046_p10), [#allocation6], 4294967264  ;;  %s419_s17 = sshll.u32 %s699_s15, 2  ;;  %s420_s28 = sshll.u32 %s703_s16, 3  ;;  %v234_v0 = vld [vmem:[%s201_s5] sm:$0xff]  ;;  %v235_v4 = vld [vmem:[%s201_s5 + $0x8] sm:$0xff] }
  0x83   : > { %v416_v1 = vld [vmem:[#allocation5] ss:$0 sm:$0xff]  ;;  %v417_v2 = vld [vmem:[#allocation7] ss:$0 sm:$0xff]  ;;  %v236_v5 = vld [vmem:[%s201_s5 + $0x10] sm:$0xff]  ;;  %s289_s25 = sadd.s32 %s420_s28, %s419_s17  ;;  %s231_s4 = scalar_lea.vmem [#allocation8], %s412_s2 }
  0x84   : > { %v245_v3 = vmul.f32 %v416_v1, %v234_v0  ;;  %v237_v6 = vld [vmem:[%s201_s5 + $0x18] sm:$0xff]  ;;  %v246_v7 = vmul.f32 %v416_v1, %v235_v4  ;;  %v247_v8 = vmul.f32 %v416_v1, %v236_v5  ;;  %s292_s11 = sshll.u32 %s231_s4, 4  ;;  %s421_s15 = sshll.u32 %s289_s25, 7  ;;  %s957_s11 = int_to_ptr.vmem [resolvable:$true] %s292_s11 }
  0x85   : > { %v248_v9 = vmul.f32 %v416_v1, %v237_v6  ;;  %s962_s6 = scalar_lea.hbm %s1019_s3, %s421_s15  ;;  %s277_s8 = scalar_lea.sflag [#allocation4], %s943_s1 }
  0x86   : > { %v256_v10 = vadd.f32 %v417_v2, %v245_v3  ;;  %v257_v11 = vadd.f32 %v417_v2, %v246_v7  ;;  %v258_v12 = vadd.f32 %v417_v2, %v247_v8  ;;  %s613_s22 = scalar_lea.vmem %s957_s11, 512  ;;  %p1047_p11 = scmp.ne.s32.totalorder %s1034_s26, 0 }
  0x87   : > { %v259_v13 = vadd.f32 %v417_v2, %v248_v9  ;;  %p614_p7 = scmp.ne.s32.totalorder %s957_s11, %s613_s22  ;;  %s722_s21 = smov [#allocation8]  }
  0x88   : > { %vm260_vm0 = vcmp.ge.f32.partialorder %v256_v10, 0.0  ;;  %v264_v14 = vmul.f32 0.2, %v256_v10  ;;  %vm261_vm1 = vcmp.ge.f32.partialorder %v257_v11, 0.0  ;;  %v265_v15 = vmul.f32 0.2, %v257_v11 }
  0x89   : > { %vm262_vm2 = vcmp.ge.f32.partialorder %v258_v12, 0.0  ;;  %v266_v16 = vmul.f32 0.2, %v258_v12  ;;  %vm263_vm3 = vcmp.ge.f32.partialorder %v259_v13, 0.0  ;;  %v267_v18 = vmul.f32 0.2, %v259_v13  ;;  %p615_p13 = pnand %p614_p7, %p1047_p11 }
  0x8a   : > { %v268_v17 = vsel %vm260_vm0, %v256_v10, %v264_v14  ;;  %v269_v19 = vsel %vm261_vm1, %v257_v11, %v265_v15  ;;  %s617_s9 = sshll.u32 %s722_s21, 4  ;;  %s618_s9 = int_to_ptr.vmem [resolvable:$false] %s617_s9 }
  0x8b   : > { %272 = vst [vmem:[%s231_s4] sm:$0xff] %v268_v17  ;;  %v270_v20 = vsel %vm262_vm2, %v258_v12, %v266_v16  ;;  %273 = vst [vmem:[%s231_s4 + $0x8] sm:$0xff] %v269_v19  ;;  %v271_v21 = vsel %vm263_vm3, %v259_v13, %v267_v18  ;;  %p616_p0 = pneg %p615_p13  ;;  %s619_s10 = scalar_lea.vmem %s618_s9, 1024 }
  0x8c   : > { %274 = vst [vmem:[%s231_s4 + $0x10] sm:$0xff] %v270_v20  ;;  %275 = vst [vmem:[%s231_s4 + $0x18] sm:$0xff] %v271_v21  ;;  %p620_p5 = scmp.lt.s32.totalorder %s957_s11, %s618_s9  ;;  %p621_p9 = scmp.lt.s32.totalorder %s619_s10, %s613_s22 }
  0x8e   : > { %p622_p2 = por %p621_p9, %p620_p5 }
  0x90   : > { %p623_p3 = pnand %p622_p2, %p616_p0 }
  0x92   : > { %626 = shalt.err (!%p623_p3)
}
  0x93   : > { %s627_s24 = scalar_lea.hbm %s962_s6, 512  ;;  %s631_s7 = scalar_lea.hbm %s1019_s3, 2048 }
  0x94   : > { %p628_p12 = scmp.ne.s32.totalorder %s962_s6, %s627_s24  ;;  %p632_p8 = scmp.lt.u32.totalorder %s962_s6, %s1019_s3 }
  0x95   : > { %p633_p1 = scmp.lt.u32.totalorder %s631_s7, %s627_s24  ;;  %p635_p7 = scmp.lt.u32.totalorder %s627_s24, %s962_s6 }
  0x96   : > { %p629_p4 = pnand %p628_p12, %p1047_p11 }
  0x97   : > { %p634_p10 = por %p633_p1, %p632_p8 }
  0x98   : > { %p630_p6 = pneg %p629_p4 }
  0x99   : > { %p636_p13 = por %p635_p7, %p634_p10 }
  0x9b   : > { %p637_p0 = pnand %p636_p13, %p630_p6 }
  0x9d   : > { %640 = shalt.err (!%p637_p0)
}
  0x9e   : > { %s723_s28 = smov 128   ;;  %s724_s25 = smov 8  }
  0x9f   : > { %434 = dma.vmem_to_hbm [thread:$0]  (%p1047_p11), %s957_s11, 512, %s962_s6, %s277_s8, %s723_s28, %s723_s28, %s724_s25  }
  0xa0 PF: > { %p456_p5 = scmp.ge.s32.totalorder %s715_s19, 2  ;;  %s307_s4 = sand.u32 1, %s687_s12  }
  0xa1   : > { %p1048_p9 = scmp.ne.s32.totalorder %s1035_s27, 0  ;;  %s308_s15 = scalar_lea.sflag [#allocation4], %s307_s4 }
  0xa3   : > { %p448_p2 = pnand %p456_p5, %p1048_p9 }
  0xa5   : > { %682 = dma.done.wait (!%p448_p2), %s308_s15, 512  }
  0xa6   : > { %684 = vsyncadd (!%p448_p2), %s308_s15, 4294966784  ;;  %s20_s19 = sadd.s32 1, %s715_s19   ;;  %s1049_s15 = sld [smem:[#allocation12_spill]] }
  0xa7   : > { %p17_p3 = scmp.ge.s32.totalorder %s20_s19, 6   ;;  %s1050_s17 = sld [smem:[#allocation13_spill]] }
  0xa8   : > { %s1051_s12 = smov %s691_s13  ;;  %s1052_s13 = smov %s695_s14 }
  0xa9   : > { %s1053_s14 = smov %s910_s30  ;;  %s1054_s16 = smov %s711_s18 }
  0xaa   : > { %s1055_s18 = smov %s1061_s20  ;;  %19 = sbr.rel (!%p17_p3) target bundleno = 11 (0xb), region = 85 }
  0xb1   :  { %313 = vsyncpa [#allocation3], 1 }
  0xb2   :  { %315 = vsyncpa [#allocation3 + $0x1], 1 }
  0xb3   :  { %316 = vsyncpa [#allocation6], 1 }
  0xb4   :  { %317 = vsyncpa [#allocation4], 1 }
  0xb5   :  { %319 = vsyncpa [#allocation4 + $0x1], 1 }

// kernel: down_forward.6
= control target key start
LH: loop header
LB: loop body
LE: loop exit
PB: predicated region body
PF: predicated region fallthrough
CT: control target
= control target key end

     0   :  { %s7693_s0 = inlined_call_operand.hbm [shape: bf16[2,10,10,128], index: 0, kind: input, shape index: {}]   ;;  %s7694_s1 = inlined_call_operand.hbm [shape: bf16[9,128,128], index: 1, kind: input, shape index: {}]   ;;  %s7695_s2 = inlined_call_operand.hbm [shape: f32[1,128], index: 2, kind: input, shape index: {}]   ;;  %s7696_s3 = inlined_call_operand.hbm [shape: f32[2,8,8,128], index: 3, kind: output, shape index: {0}]   ;;  %s7697_s4 = inlined_call_operand.hbm [shape: f32[1,128], index: 4, kind: output, shape index: {1}]   ;;  %s7698_s5 = inlined_call_operand.hbm [shape: f32[1,128], index: 5, kind: output, shape index: {2}]  }
   0x1   :  { %7716 = sst [smem:[#allocation21_spill]] %s7694_s1 }
   0x2   :  { %7717 = sst [smem:[#allocation22_spill]] %s7695_s2 }
   0x3   :  { %7718 = sst [smem:[#allocation23_spill]] %s7697_s4 }
   0x4   :  { %7719 = sst [smem:[#allocation24_spill]] %s7698_s5 }
   0x5   :  { %11 = vsyncpa [#allocation3], 0 }
   0x6   :  { %13 = vsyncpa [#allocation3 + $0x1], 0 }
   0x7   :  { %14 = vsyncpa [#allocation6], 0 }
   0x8   :  { %15 = vsyncpa [#allocation4], 0 }
   0x9   :  { %17 = vsyncpa [#allocation4 + $0x1], 0 }
   0xa   :  { %18 = vsyncpa [#allocation10], 0  ;;  %s6850_s18 = smov 0   ;;  %s6852_s19 = smov 0  }
   0xb   :  { %s6854_s20 = smov 0   ;;  %s6856_s21 = smov 0  }
   0xc   :  { %s6858_s22 = smov 0   ;;  %s6860_s23 = smov 0  }
   0xd   :  { %s6862_s24 = smov 0   ;;  %s6864_s25 = smov 0  }
   0xe   :  { %s6866_s26 = smov 0   ;;  %s6868_s27 = smov 0  }
   0xf   :  { %s6870_s28 = smov 0  }
  0x10 LB: > { %7720 = sst [smem:[#allocation16_spill]] %s6765_s18  ;;  %s4635_s29 = sadd.s32 4294967295, %s6805_s28   ;;  %s6805_s28 = sphi %s6870_s28, %s24_s28   ;;  %s6801_s27 = sphi %s6868_s27, %s7761_s27   ;;  %s6797_s26 = sphi %s6866_s26, %s7753_s26   ;;  %s6793_s25 = sphi %s6864_s25, %s7760_s25   ;;  %s6789_s24 = sphi %s6862_s24, %s7752_s24   ;;  %s6785_s23 = sphi %s6860_s23, %s7759_s23   ;;  %s6781_s22 = sphi %s6858_s22, %s7758_s22   ;;  %s6777_s21 = sphi %s6856_s21, %s7757_s21   ;;  %s6773_s20 = sphi %s6854_s20, %s7756_s20   ;;  %s6769_s19 = sphi %s6852_s19, %s7755_s19   ;;  %s6765_s18 = sphi %s6850_s18, %s7754_s18  }
  0x11   : > { %7721 = sst [smem:[#allocation17_spill]] %s6797_s26  ;;  %s4636_s30 = sadd.s32 4294967294, %s6805_s28  }
  0x12   : > { %p56_p0 = scmp.ne.s32.totalorder %s6781_s22, %s6777_s21  ;;  %p6906_p1 = scmp.eq.s32.totalorder %s4635_s29, 0 }
  0x13   : > { %p123_p2 = scmp.ne.s32.totalorder %s6773_s20, %s6769_s19  ;;  %p6919_p4 = scmp.eq.s32.totalorder %s4635_s29, 3 }
  0x14   : > { %s7722_s6 = scalar_select %p6906_p1, 1, 0 }
  0x15   : > { %p6915_p3 = por %p6906_p1, %p56_p0  ;;  %p129_p5 = scmp.ne.s32.totalorder %s6769_s19, %s6765_s18 }
  0x16   : > { %s7724_s9 = scalar_select %p6919_p4, 1, 0 }
  0x17   : > { %s7723_s8 = scalar_select %p6915_p3, 1, 0 }
  0x18   : > { %7725 = sst [smem:[#allocation18_spill]] %s7724_s9  ;;  %p130_p6 = scmp.eq.s32.totalorder %s4636_s30, 3 }
  0x19   : > { %p6927_p7 = por %p6919_p4, %p123_p2  ;;  %p4637_p8 = scmp.ge.s32.totalorder %s6805_s28, 1 }
  0x1a   : > { %p6932_p9 = por %p130_p6, %p129_p5  ;;  %p179_p10 = scmp.lt.s32.totalorder %s6805_s28, 5 }
  0x1b   : > { %s7726_s10 = scalar_select %p6927_p7, 1, 0 }
  0x1c   : > { %s7727_s11 = scalar_select %p6932_p9, 1, 0 }
  0x1d   : > { %p6937_p11 = pnand %p4637_p8, %p179_p10  ;;  %s6807_s13 = smov [#allocation5]  }
  0x1e   : > { %7728 = sst [smem:[#allocation19_spill]] %s7727_s11  ;;  %s191_s14 = sshll.u32 %s6807_s13, 4  ;;  %s192_s14 = int_to_ptr.vmem [resolvable:$true] %s191_s14 }
  0x1f   : > { %s7729_s12 = scalar_select %p6937_p11, 1, 0 }
  0x20   : > { %p6100_p12 = pneg %p6937_p11  ;;  %s6808_s16 = smov [#allocation7]  }
  0x21   : > { %s205_s17 = sshll.u32 %s6808_s16, 4  ;;  %s7731_s1 = sld [smem:[#allocation21_spill]]  ;;  %s6949_s17 = int_to_ptr.vmem [resolvable:$true] %s205_s17 }
  0x22   : > { %p6945_p13 = pnand %p6100_p12, %p6906_p1 }
  0x24   : > { %p6539_p2 = pneg %p6945_p13 }
  0x27   : > { %s6537_s30 = scalar_lea.hbm %s7731_s1, 9216 }
  0x28   : > { %p6538_p0 = scmp.ne.s32.totalorder %s7731_s1, %s6537_s30  ;;  %p6544_p8 = scmp.lt.u32.totalorder %s6537_s30, %s7731_s1 }
  0x2a   : > { %p6540_p5 = pnand %p6539_p2, %p6538_p0 }
  0x2c   : > { %p6541_p6 = pneg %p6540_p5 }
  0x2e   : > { %p6546_p10 = pnand %p6544_p8, %p6541_p6 }
  0x30   : > { %6549 = shalt.err (!%p6546_p10)
}
  0x31   : > { %s6550_s16 = scalar_lea.vmem %s192_s14, 9216  ;;  %p6558_p7 = scmp.lt.s32.totalorder %s192_s14, %s192_s14 }
  0x32   : > { %p6551_p12 = scmp.ne.s32.totalorder %s192_s14, %s6550_s16  ;;  %p6559_p1 = scmp.lt.s32.totalorder %s6550_s16, %s6550_s16 }
  0x34   : > { %p6553_p9 = pnand %p6551_p12, %p6539_p2  ;;  %p6560_p3 = por %p6559_p1, %p6558_p7 }
  0x36   : > { %p6554_p4 = pneg %p6553_p9 }
  0x38   : > { %p6561_p11 = pnand %p6560_p3, %p6554_p4 }
  0x3a   : > { %6564 = shalt.err (!%p6561_p11)
}
  0x3b   : > { %s7712_s7 = smov 64   ;;  %s7713_s21 = smov 4  }
  0x3c   : > { %6103 = dma.hbm_to_vmem [thread:$0]  (!%p6945_p13), %s7731_s1, 9216, %s192_s14, [#allocation6], %s7712_s7, %s7712_s7, %s7713_s21  }
  0x3d   : > { %s7732_s2 = sld [smem:[#allocation22_spill]] }
  0x43   : > { %s6565_s13 = scalar_lea.hbm %s7732_s2, 16 }
  0x44   : > { %p6566_p1 = scmp.ne.s32.totalorder %s7732_s2, %s6565_s13  ;;  %p6572_p7 = scmp.lt.u32.totalorder %s6565_s13, %s7732_s2 }
  0x46   : > { %p6568_p3 = pnand %p6566_p1, %p6539_p2 }
  0x48   : > { %p6569_p4 = pneg %p6568_p3 }
  0x4a   : > { %p6574_p9 = pnand %p6572_p7, %p6569_p4 }
  0x4c   : > { %6577 = shalt.err (!%p6574_p9)
}
  0x4d   : > { %s6578_s14 = scalar_lea.vmem %s6949_s17, 16  ;;  %s6585_s5 = scalar_lea.vmem %s6949_s17, 32 }
  0x4e   : > { %p6579_p11 = scmp.ne.s32.totalorder %s6949_s17, %s6578_s14  ;;  %p6586_p6 = scmp.lt.s32.totalorder %s6949_s17, %s6949_s17 }
  0x4f   : > { %p6587_p8 = scmp.lt.s32.totalorder %s6585_s5, %s6578_s14 }
  0x50   : > { %p6581_p0 = pnand %p6579_p11, %p6539_p2 }
  0x51   : > { %p6588_p10 = por %p6587_p8, %p6586_p6 }
  0x52   : > { %p6582_p5 = pneg %p6581_p0 }
  0x54   : > { %p6589_p12 = pnand %p6588_p10, %p6582_p5 }
  0x56   : > { %6592 = shalt.err (!%p6589_p12)
}
  0x57   : > { %6106 = dma.hbm_to_vmem [thread:$0]  (!%p6945_p13), %s7732_s2, 16, %s6949_s17, [#allocation6]  }
  0x58   : > { %s33_s18 = sadd.s32 1, %s6797_s26  ;;  %s36_s11 = sadd.s32 1, %s6801_s27 }
  0x59   : > { %p34_p2 = scmp.ge.s32.totalorder %s33_s18, 2  ;;  %s43_s15 = sadd.s32 1, %s6785_s23 }
  0x5a   : > { %p50_p1 = scmp.ne.s32.totalorder %s6785_s23, %s6781_s22  ;;  %p51_p3 = scmp.eq.s32.totalorder %s6805_s28, 0 }
  0x5b   : > { %s7763_s18 = smov (%p34_p2, %s33_s18), 0  ;;  %s7765_s11 = smov (!%p34_p2, %s36_s11), %s6801_s27 }
  0x5c   : > { %7733 = sst [smem:[#allocation20_spill]] %s7763_s18  ;;  %p7011_p4 = por %p51_p3, %p50_p1 }
  0x5d   : > { %s109_s30 = ssub.s32 %s6797_s26, %s7763_s18  ;;  %p38_p13 = scmp.ge.s32.totalorder %s7765_s11, 2 }
  0x5e   : > { %p6117_p7 = scmp.lt.s32.totalorder %s6805_s28, 4  ;;  %s216_s17 = sand.u32 1, %s6785_s23  }
  0x5f   : > { %s6078_s13 = smul.u32 1280, %s6801_s27  ;;  %s7767_s11 = smov (%p38_p13, %s7765_s11), 0 }
  0x60   : > { %s6077_s16 = smul.u32 80, %s216_s17  ;;  %s40_s14 = ssub.s32 %s6801_s27, %s7767_s11 }
  0x61   : > { %s7027_s9 = scalar_lea.hbm %s7693_s0, %s6078_s13  ;;  %p41_p9 = scmp.eq.s32.totalorder %s40_s14, 0 }
  0x62   : > { %s110_s7 = sor.u32 %s109_s30, %s40_s14  ;;  %s7735_s1 = sadd.s32 1, %s6773_s20 }
  0x63   : > { %p111_p11 = scmp.eq.s32.totalorder %s110_s7, 0  ;;  %s220_s18 = scalar_lea.vmem [#allocation2], %s6077_s16 }
  0x64   : > { %s7030_s21 = scalar_select %p41_p9, %s6785_s23, %s43_s15  }
  0x65   : > { %s7035_s2 = scalar_select %p111_p11, %s6773_s20, %s7735_s1  }
  0x66   : > { %s227_s26 = sshll.u32 %s220_s18, 4  ;;  %p7041_p0 = pnand %p6117_p7, %p7011_p4  ;;  %s7045_s26 = int_to_ptr.vmem [resolvable:$true] %s227_s26 }
  0x67   : > { %s7047_s30 = scalar_lea.sflag [#allocation3], %s216_s17  ;;  %s6593_s7 = scalar_lea.hbm %s7027_s9, 1280 }
  0x68   : > { %p6594_p5 = scmp.ne.s32.totalorder %s7027_s9, %s6593_s7  ;;  %p6595_p6 = pneg %p7041_p0 }
  0x69   : > { %s6598_s15 = scalar_lea.hbm %s7693_s0, 2560  ;;  %p6599_p12 = scmp.lt.u32.totalorder %s7027_s9, %s7693_s0 }
  0x6a   : > { %p6596_p8 = pnand %p6595_p6, %p6594_p5  ;;  %p6600_p2 = scmp.lt.u32.totalorder %s6598_s15, %s6593_s7 }
  0x6b   : > { %p6602_p3 = scmp.lt.u32.totalorder %s6593_s7, %s7027_s9 }
  0x6c   : > { %p6597_p10 = pneg %p6596_p8  ;;  %p6601_p1 = por %p6600_p2, %p6599_p12 }
  0x6e   : > { %p6603_p4 = por %p6602_p3, %p6601_p1 }
  0x70   : > { %p6604_p13 = pnand %p6603_p4, %p6597_p10 }
  0x72   : > { %6607 = shalt.err (!%p6604_p13)
}
  0x73   : > { %s6608_s17 = scalar_lea.vmem %s7045_s26, 1280  ;;  %s6811_s16 = smov [#allocation2]  }
  0x74   : > { %p6609_p7 = scmp.ne.s32.totalorder %s7045_s26, %s6608_s17  ;;  %s6613_s14 = sshll.u32 %s6811_s16, 4  ;;  %s6614_s14 = int_to_ptr.vmem [resolvable:$false] %s6613_s14 }
  0x75   : > { %s6615_s4 = scalar_lea.vmem %s6614_s14, 2560  ;;  %p6616_p5 = scmp.lt.s32.totalorder %s7045_s26, %s6614_s14 }
  0x76   : > { %p6611_p9 = pnand %p6609_p7, %p6595_p6  ;;  %p6617_p8 = scmp.lt.s32.totalorder %s6615_s4, %s6608_s17 }
  0x78   : > { %p6612_p11 = pneg %p6611_p9  ;;  %p6618_p12 = por %p6617_p8, %p6616_p5 }
  0x7a   : > { %p6619_p2 = pnand %p6618_p12, %p6612_p11 }
  0x7c   : > { %6622 = shalt.err (!%p6619_p2)
}
  0x7d   : > { %s7737_s7 = smov 4   ;;  %s7738_s1 = smov 64  }
  0x7e   : > { %6110 = dma.hbm_to_vmem [thread:$0]  (!%p7041_p0), %s7027_s9, 1280, %s7045_s26, %s7047_s30, %s7738_s1, %s7738_s1, %s7737_s7  }
  0x7f   : > { %p7739_p6 = scmp.ne.s32.totalorder %s7729_s12, 0 }
  0x80   : > { %s241_s18 = sand.u32 (!%p7739_p6), 1, %s6781_s22   ;;  %p7740_p10 = scmp.ne.s32.totalorder (!%p7739_p6), %s7723_s8, 0 }
  0x81   : > { %239 = sbr.rel (%p7739_p6) target bundleno = 1023 (0x3ff), region = 32  ;;  %s242_s29 = scalar_lea.sflag (!%p7739_p6), [#allocation3], %s241_s18 }
  0x82   : > { %s7081_s15 = smul.u32 (!%p7739_p6), 80, %s241_s18 }
  0x84   : > { %s245_s13 = scalar_lea.vmem (!%p7739_p6), [#allocation2], %s7081_s15 }
  0x88   : > { %6748 = dma.done.wait (%p7740_p10), %s242_s29, 1280  }
  0x89   : > { %6750 = vsyncadd (%p7740_p10), %s242_s29, 4294966016  ;;  %p7741_p1 = scmp.ne.s32.totalorder %s7722_s6, 0 }
  0x8b   : > { %6752 = dma.done.wait (%p7741_p1), [#allocation6], 9232  }
  0x8c   : > { %6754 = vsyncadd (%p7741_p1), [#allocation6], 4294958064  ;;  %s273_s26 = sand.u32 1, %s6769_s19   ;;  %p282_p0 = scmp.eq.s32.totalorder %s6793_s25, 0 }
  0x8d   : > { %s4645_s12 = sshll.u32 %s273_s26, 5  ;;  %p283_p3 = scmp.eq.s32.totalorder %s6789_s24, 0 }
  0x8e   : > { %s7097_s9 = scalar_lea.vmem [#allocation8], %s4645_s12 }
  0x8f   : > { %p284_p4 = pnand %p283_p3, %p282_p0 }
  0x90   : > { %v6812_v0 = vmov (!%p284_p4), 0.0  }
  0x91   : > { %287 = sbr.rel (%p284_p4) target bundleno = 152 (0x98), region = 48  ;;  %288 = vst [vmem:[#allocation9] sm:$0x1] (!%p284_p4), %v6812_v0  ;;  %289 = vst [vmem:[#allocation11] sm:$0x1] (!%p284_p4), %v6812_v0 }
  0x98 PF: > { %v6224_v1 = vld [vmem:[#allocation5 + $0x40] sm:$0xff]   ;;  %v6813_v2 = vmov 0.0   ;;  %v6226_v4 = vld [vmem:[#allocation5 + $0x48] sm:$0xff]   ;;  %vm6814_vm0 = vmmov 0   ;;  %v6228_v6 = vld [vmem:[#allocation5 + $0x50] sm:$0xff]   ;;  %s5027_s6 = sshll.u32 %s6789_s24, 5 }
  0x99   : > { %5357 = vmatprep.subr.bf16.mxu0 %v6813_v2  ;;  %5377 = vmatprep.subr.bf16.mxu1 %v6813_v2  ;;  %v6225_v3 = vld [vmem:[#allocation5] sm:$0xff]   ;;  %v6227_v5 = vld [vmem:[#allocation5 + $0x8] sm:$0xff]   ;;  %v6229_v7 = vld [vmem:[#allocation5 + $0x10] sm:$0xff]   ;;  %s7114_s8 = scalar_lea.vmem %s245_s13, %s5027_s6 [#allocation2]  ;;  %s5017_s5 = sshll.u32 %s6789_s24, 2 }
  0x9a   : > { %5358 = vmatpush3.bf16.msra.mxu0 %v6224_v1  ;;  %5373 = vmatprep.mubr.msk.bf16.mxu0 %vm6814_vm0, %v6813_v2  ;;  %v6230_v8 = vld [vmem:[#allocation5 + $0x58] sm:$0xff]   ;;  %v6232_v10 = vld [vmem:[#allocation5 + $0x60] sm:$0xff]   ;;  %v6234_v15 = vld [vmem:[#allocation5 + $0x68] sm:$0xff]   ;;  %s5018_s30 = sshll.u32 %s6793_s25, 3  ;;  %s4464_s14 = sshll.u32 %s7097_s9, 4  ;;  %s7578_s14 = int_to_ptr.vmem [resolvable:$true] %s4464_s14 }
  0x9b   : > { %5378 = vmatpush3.bf16.msra.mxu1 %v6225_v3  ;;  %5359 = vmatprep.subr.bf16.mxu0 %v6813_v2  ;;  %v6231_v9 = vld [vmem:[#allocation5 + $0x18] sm:$0xff]   ;;  %v6233_v11 = vld [vmem:[#allocation5 + $0x20] sm:$0xff]   ;;  %v6235_v16 = vld [vmem:[#allocation5 + $0x28] sm:$0xff]   ;;  %s4461_s17 = sadd.s32 %s5018_s30, %s5017_s5  ;;  %s7584_s25 = scalar_lea.sflag [#allocation4], %s273_s26 }
  0x9c   : > { %5379 = vmatprep.subr.bf16.mxu1 %v6813_v2  ;;  %5393 = vmatprep.mubr.msk.bf16.mxu1 %vm6814_vm0, %v6813_v2  ;;  %v295_v12 = vld [vmem:[%s7114_s8] sm:$0xf]  ;;  %v7120_v13 = vld [vmem:[%s7114_s8 + $0x4] sm:$0x1]  ;;  %v6236_v18 = vld [vmem:[#allocation5 + $0x70] sm:$0xff]   ;;  %s5019_s16 = sshll.u32 %s4461_s17, 7 }
  0x9d   : > { %v4649_v14 = vcombine.low %v295_v12, %v7120_v13  ;;  %v6237_v19 = vld [vmem:[#allocation5 + $0x30] sm:$0xff]   ;;  %v6238_v22 = vld [vmem:[#allocation5 + $0x78] sm:$0xff]   ;;  %v6241_v25 = vld [vmem:[#allocation5 + $0x80] sm:$0xff]   ;;  %s7576_s24 = scalar_lea.hbm %s7696_s3, %s5019_s16  ;;  %s6623_s1 = scalar_lea.vmem %s7578_s14, 512 }
  0x9e   : > { %5360 = vmatpush3.bf16.msra.mxu0 %v6226_v4  ;;  %v6239_v23 = vld [vmem:[#allocation5 + $0x38] sm:$0xff]   ;;  %v6242_v26 = vld [vmem:[#allocation5 + $0xc0] sm:$0xff]   ;;  %v6243_v27 = vld [vmem:[#allocation5 + $0x88] sm:$0xff]   ;;  %p6624_p13 = scmp.ne.s32.totalorder %s7578_s14, %s6623_s1  ;;  %p7742_p7 = scmp.ne.s32.totalorder %s7726_s10, 0 }
  0x9f   : > { %5380 = vmatpush3.bf16.msra.mxu1 %v6227_v5  ;;  %5361 = vmatprep.subr.bf16.mxu0 %v6813_v2  ;;  %v338_v17 = vshll.u32 %v4649_v14, 16  ;;  %v336_v20 = vshrl.u32 %v4649_v14, 16  ;;  %v6244_v28 = vld [vmem:[#allocation5 + $0xc8] sm:$0xff]   ;;  %v6245_v29 = vld [vmem:[#allocation5 + $0x90] sm:$0xff]   ;;  %v6247_v31 = vld [vmem:[#allocation5 + $0x98] sm:$0xff]   ;;  %s6815_s18 = smov [#allocation8]  }
  0xa0   : > { %5381 = vmatprep.subr.bf16.mxu1 %v6813_v2  ;;  %v6246_v30 = vld [vmem:[#allocation5 + $0xd0] sm:$0xff]   ;;  %v6248_v32 = vld [vmem:[#allocation5 + $0xd8] sm:$0xff]   ;;  %v6249_v33 = vld [vmem:[#allocation5 + $0xa0] sm:$0xff]   ;;  %p6625_p9 = pnand %p6624_p13, %p7742_p7  ;;  %s6627_s15 = sshll.u32 %s6815_s18, 4  ;;  %s6628_s15 = int_to_ptr.vmem [resolvable:$false] %s6627_s15 }
  0xa1   : > { %v340_v21 = vrot.slane %v338_v17, 1  ;;  %v6250_v34 = vld [vmem:[#allocation5 + $0xe0] sm:$0xff]   ;;  %v6251_v35 = vld [vmem:[#allocation5 + $0xa8] sm:$0xff]   ;;  %v6253_v37 = vld [vmem:[#allocation5 + $0xb0] sm:$0xff]   ;;  %s6629_s29 = scalar_lea.vmem %s6628_s15, 1024  ;;  %p6630_p5 = scmp.lt.s32.totalorder %s7578_s14, %s6628_s15 }
  0xa2   : > { %5362 = vmatpush3.bf16.msra.mxu0 %v6228_v6  ;;  %v6252_v36 = vld [vmem:[#allocation5 + $0xe8] sm:$0xff]   ;;  %v6254_v38 = vld [vmem:[#allocation5 + $0xf0] sm:$0xff]   ;;  %v519_v39 = vld [vmem:[%s7114_s8] sm:$0xe]  ;;  %p6626_p11 = pneg %p6625_p9  ;;  %p6631_p8 = scmp.lt.s32.totalorder %s6629_s29, %s6623_s1 }
  0xa3   : > { %5382 = vmatpush3.bf16.msra.mxu1 %v6229_v7  ;;  %5363 = vmatprep.subr.bf16.mxu0 %v6813_v2  ;;  %v341_v24 = vor.u32 %v340_v21, %v336_v20  ;;  %v4666_v40 = vcombine.low %v519_v39, %v7120_v13  ;;  %v6255_v41 = vld [vmem:[#allocation5 + $0xb8] sm:$0xff]   ;;  %v4677_v44 = vld [vmem:[%s7114_s8 + $0x8] sm:$0xf]  ;;  %v6258_v45 = vld [vmem:[#allocation5 + $0x100] sm:$0xff]  }
  0xa4   : > { %5383 = vmatprep.subr.bf16.mxu1 %v6813_v2  ;;  %v6256_v42 = vld [vmem:[#allocation5 + $0xf8] sm:$0xff]   ;;  %v6259_v46 = vld [vmem:[#allocation5 + $0x140] sm:$0xff]   ;;  %v6260_v47 = vld [vmem:[#allocation5 + $0x108] sm:$0xff]   ;;  %p6632_p12 = por %p6631_p8, %p6630_p5 }
  0xa5   : > { %v540_v43 = vrot.slane %v4666_v40, 1  ;;  %v6261_v48 = vld [vmem:[#allocation5 + $0x148] sm:$0xff]   ;;  %v6262_v49 = vld [vmem:[#allocation5 + $0x110] sm:$0xff]   ;;  %v6264_v51 = vld [vmem:[#allocation5 + $0x118] sm:$0xff]  }
  0xa6   : > { %5364 = vmatpush3.bf16.msra.mxu0 %v6230_v8  ;;  %v6263_v50 = vld [vmem:[#allocation5 + $0x150] sm:$0xff]   ;;  %v6265_v52 = vld [vmem:[#allocation5 + $0x158] sm:$0xff]   ;;  %v6266_v53 = vld [vmem:[#allocation5 + $0x120] sm:$0xff]   ;;  %p6633_p2 = pnand %p6632_p12, %p6626_p11 }
  0xa7   : > { %5384 = vmatpush3.bf16.msra.mxu1 %v6231_v9  ;;  %5365 = vmatprep.subr.bf16.mxu0 %v6813_v2  ;;  %v4686_v54 = vld [vmem:[%s7114_s8 + $0x8] sm:$0xf]  ;;  %v4687_v55 = vld [vmem:[%s7114_s8 + $0xc] sm:$0x1]  ;;  %v6267_v56 = vld [vmem:[#allocation5 + $0x160] sm:$0xff]  }
  0xa8   : > { %5385 = vmatprep.subr.bf16.mxu1 %v6813_v2  ;;  %v4688_v57 = vcombine.low %v4686_v54, %v4687_v55  ;;  %v6268_v58 = vld [vmem:[#allocation5 + $0x128] sm:$0xff]   ;;  %v6270_v61 = vld [vmem:[#allocation5 + $0x130] sm:$0xff]   ;;  %v6272_v3 = vld [vmem:[#allocation5 + $0x138] sm:$0xff]  }
  0xa9   : > { %v6269_v59 = vld [vmem:[#allocation5 + $0x168] sm:$0xff]   ;;  %v6271_v62 = vld [vmem:[#allocation5 + $0x170] sm:$0xff]   ;;  %v6273_v5 = vld [vmem:[#allocation5 + $0x178] sm:$0xff]  }
  0xaa   : > { %5366 = vmatpush3.bf16.msra.mxu0 %v6232_v10  ;;  %v769_v60 = vshll.u32 %v4688_v57, 16  ;;  %v4697_v63 = vld [vmem:[%s7114_s8 + $0x8] sm:$0xe]  ;;  %v767_v0 = vshrl.u32 %v4688_v57, 16  ;;  %v6276_v8 = vld [vmem:[#allocation5 + $0x180] sm:$0xff]   ;;  %v6281_v13 = vld [vmem:[#allocation5 + $0x1d0] sm:$0xff]  }
  0xab   : > { %5386 = vmatpush3.bf16.msra.mxu1 %v6233_v11  ;;  %5367 = vmatprep.subr.bf16.mxu0 %v6813_v2  ;;  %v4698_v4 = vcombine.low %v4697_v63, %v4687_v55  ;;  %v6277_v9 = vld [vmem:[#allocation5 + $0x1c0] sm:$0xff]   ;;  %v6278_v10 = vld [vmem:[#allocation5 + $0x188] sm:$0xff]   ;;  %v6282_v14 = vld [vmem:[#allocation5 + $0x198] sm:$0xff]  }
  0xac   : > { %5387 = vmatprep.subr.bf16.mxu1 %v6813_v2  ;;  %v771_v1 = vrot.slane %v769_v60, 1  ;;  %v6279_v11 = vld [vmem:[#allocation5 + $0x1c8] sm:$0xff]   ;;  %v6285_v17 = vld [vmem:[#allocation5 + $0x1e0] sm:$0xff]   ;;  %v6300_v39 = vld [vmem:[#allocation5 + $0x58] sm:$0xff]  }
  0xad   : > { %v884_v7 = vrot.slane %v4698_v4, 1  ;;  %v6286_v20 = vld [vmem:[#allocation5 + $0x1a8] sm:$0xff]   ;;  %v6301_v40 = vld [vmem:[#allocation5 + $0x220] sm:$0xff]   ;;  %v6316_v63 = vld [vmem:[#allocation5 + $0x90] sm:$0xff]  }
  0xae   : > { %5368 = vmatpush3.bf16.msra.mxu0 %v6234_v15  ;;  %v772_v6 = vor.u32 %v771_v1, %v767_v0  ;;  %v6283_v15 = vld [vmem:[#allocation5 + $0x1d8] sm:$0xff]   ;;  %v6311_v57 = vld [vmem:[#allocation5] sm:$0xff]   ;;  %v6313_v60 = vld [vmem:[#allocation5 + $0x8] sm:$0xff]  }
  0xaf   : > { %5388 = vmatpush3.bf16.msra.mxu1 %v6235_v16  ;;  %5369 = vmatprep.subr.bf16.mxu0 %v6813_v2  ;;  %v6284_v16 = vld [vmem:[#allocation5 + $0x1a0] sm:$0xff]   ;;  %v6317_v0 = vld [vmem:[#allocation5 + $0x18] sm:$0xff]  }
  0xb0   : > { %5389 = vmatprep.subr.bf16.mxu1 %v6813_v2  ;;  %v6318_v1 = vld [vmem:[#allocation5 + $0x98] sm:$0xff]   ;;  %v6320_v4 = vld [vmem:[#allocation5 + $0xa0] sm:$0xff]  }
  0xb2   : > { %5370 = vmatpush3.bf16.msra.mxu0 %v6236_v18  ;;  %v4718_v18 = vld [vmem:[%s7114_s8 + $0x10] sm:$0xf] }
  0xb3   : > { %5390 = vmatpush3.bf16.msra.mxu1 %v6237_v19  ;;  %5371 = vmatprep.subr.bf16.mxu0 %v6813_v2  ;;  %v7190_v19 = vld [vmem:[%s7114_s8 + $0x14] sm:$0x1] }
  0xb4   : > { %5391 = vmatprep.subr.bf16.mxu1 %v6813_v2  ;;  %v4720_v21 = vcombine.low %v4718_v18, %v7190_v19  ;;  %v6332_v18 = vld [vmem:[#allocation5 + $0xd0] sm:$0xff]  }
  0xb6   : > { %5372 = vmatpush3.bf16.msra.mxu0 %v6238_v22  ;;  %v6287_v22 = vld [vmem:[#allocation5 + $0x1e8] sm:$0xff]  }
  0xb7   : > { %5392 = vmatpush3.bf16.msra.mxu1 %v6239_v23  ;;  %5397 = vmatprep.subr.bf16.mxu0 %v6813_v2  ;;  %v6288_v23 = vld [vmem:[#allocation5 + $0x1b0] sm:$0xff]  }
  0xb8   : > { %5417 = vmatprep.subr.bf16.mxu1 %v6813_v2 }
  0xb9   : > { %5374 = vmatmul.mubr.bf16.vlgmr.msra.gmra.mrb[0].mxu0 %v341_v24  ;;  %v1113_v24 = vshll.u32 %v4720_v21, 16 }
  0xba   : > { %5394 = vmatmul.mubr.bf16.vlgmr.msra.gmra.mrb[0].mxu1 %v295_v12  ;;  %5398 = vmatpush3.bf16.msra.mxu0 %v6241_v25  ;;  %v6280_v12 = vld [vmem:[#allocation5 + $0x190] sm:$0xff]  }
  0xbb   : > { %5418 = vmatpush3.bf16.msra.mxu1 %v6242_v26  ;;  %5399 = vmatprep.subr.bf16.mxu0 %v6813_v2  ;;  %v6289_v25 = vld [vmem:[#allocation5 + $0x1f0] sm:$0xff]   ;;  %v6290_v26 = vld [vmem:[#allocation5 + $0x1b8] sm:$0xff]  }
  0xbc   : > { %5419 = vmatprep.subr.bf16.mxu1 %v6813_v2  ;;  %5413 = vmatprep.mubr.msk.bf16.mxu0 %vm6814_vm0, %v6813_v2 }
  0xbd   : > { %5433 = vmatprep.mubr.msk.bf16.mxu1 %vm6814_vm0, %v6813_v2 }
  0xbe   : > { %5400 = vmatpush3.bf16.msra.mxu0 %v6243_v27  ;;  %v1111_v27 = vshrl.u32 %v4720_v21, 16  ;;  %v6335_v21 = vld [vmem:[#allocation5 + $0x118] sm:$0xff]  }
  0xbf   : > { %5420 = vmatpush3.bf16.msra.mxu1 %v6244_v28  ;;  %5401 = vmatprep.subr.bf16.mxu0 %v6813_v2  ;;  %v1115_v28 = vrot.slane %v1113_v24, 1  ;;  %v6337_v24 = vld [vmem:[#allocation5 + $0x120] sm:$0xff]  }
  0xc0   : > { %5421 = vmatprep.subr.bf16.mxu1 %v6813_v2 }
  0xc2   : > { %5402 = vmatpush3.bf16.msra.mxu0 %v6245_v29  ;;  %v6291_v29 = vld [vmem:[#allocation5 + $0x1f8] sm:$0xff]  }
  0xc3   : > { %5422 = vmatpush3.bf16.msra.mxu1 %v6246_v30  ;;  %5403 = vmatprep.subr.bf16.mxu0 %v6813_v2  ;;  %v4709_v30 = vld [vmem:[%s7114_s8 + $0x10] sm:$0xf] }
  0xc4   : > { %5423 = vmatprep.subr.bf16.mxu1 %v6813_v2 }
  0xc6   : > { %5404 = vmatpush3.bf16.msra.mxu0 %v6247_v31  ;;  %v1116_v31 = vor.u32 %v1115_v28, %v1111_v27  ;;  %v6339_v27 = vld [vmem:[#allocation5 + $0x128] sm:$0xff]  }
  0xc7   : > { %5424 = vmatpush3.bf16.msra.mxu1 %v6248_v32  ;;  %5405 = vmatprep.subr.bf16.mxu0 %v6813_v2  ;;  %v6293_v32 = vld [vmem:[#allocation5 + $0x200] sm:$0xff]  }
  0xc8   : > { %5425 = vmatprep.subr.bf16.mxu1 %v6813_v2 }
  0xca   : > { %5406 = vmatpush3.bf16.msra.mxu0 %v6249_v33  ;;  %v6294_v33 = vld [vmem:[#allocation5 + $0x40] sm:$0xff]  }
  0xcb   : > { %5426 = vmatpush3.bf16.msra.mxu1 %v6250_v34  ;;  %5407 = vmatprep.subr.bf16.mxu0 %v6813_v2  ;;  %v6295_v34 = vld [vmem:[#allocation5 + $0x208] sm:$0xff]  }
  0xcc   : > { %5427 = vmatprep.subr.bf16.mxu1 %v6813_v2 }
  0xce   : > { %5408 = vmatpush3.bf16.msra.mxu0 %v6251_v35  ;;  %v6296_v35 = vld [vmem:[#allocation5 + $0x48] sm:$0xff]  }
  0xcf   : > { %5428 = vmatpush3.bf16.msra.mxu1 %v6252_v36  ;;  %5409 = vmatprep.subr.bf16.mxu0 %v6813_v2  ;;  %v6297_v36 = vld [vmem:[#allocation5 + $0x210] sm:$0xff]  }
  0xd0   : > { %5429 = vmatprep.subr.bf16.mxu1 %v6813_v2 }
  0xd2   : > { %5410 = vmatpush3.bf16.msra.mxu0 %v6253_v37  ;;  %v6298_v37 = vld [vmem:[#allocation5 + $0x50] sm:$0xff]  }
  0xd3   : > { %5430 = vmatpush3.bf16.msra.mxu1 %v6254_v38  ;;  %5411 = vmatprep.subr.bf16.mxu0 %v6813_v2  ;;  %v6299_v38 = vld [vmem:[#allocation5 + $0x218] sm:$0xff]  }
  0xd4   : > { %5431 = vmatprep.subr.bf16.mxu1 %v6813_v2 }
  0xd6   : > { %5412 = vmatpush3.bf16.msra.mxu0 %v6255_v41  ;;  %v6302_v41 = vld [vmem:[#allocation5 + $0x60] sm:$0xff]  }
  0xd7   : > { %5432 = vmatpush3.bf16.msra.mxu1 %v6256_v42  ;;  %5437 = vmatprep.subr.bf16.mxu0 %v6813_v2  ;;  %v7214_v42 = vld [vmem:[%s7114_s8 + $0x8] sm:$0xf] }
  0xd8   : > { %5457 = vmatprep.subr.bf16.mxu1 %v6813_v2 }
  0xd9   : > { %5414 = vmatmul.mubr.bf16.vlgmr.msra.gmra.mrb[4].mxu0 %v540_v43  ;;  %v7217_v43 = vld [vmem:[%s7114_s8 + $0xc] sm:$0x1] }
  0xda   : > { %5434 = vmatmul.mubr.bf16.vlgmr.msra.gmra.mrb[4].mxu1 %v4677_v44  ;;  %5438 = vmatpush3.bf16.msra.mxu0 %v6258_v45  ;;  %v6303_v44 = vld [vmem:[#allocation5 + $0x228] sm:$0xff]  }
  0xdb   : > { %5458 = vmatpush3.bf16.msra.mxu1 %v6259_v46  ;;  %5439 = vmatprep.subr.bf16.mxu0 %v6813_v2  ;;  %v6304_v45 = vld [vmem:[#allocation5 + $0x68] sm:$0xff]   ;;  %v4742_v46 = vcombine.low %v7214_v42, %v7217_v43 }
  0xdc   : > { %5459 = vmatprep.subr.bf16.mxu1 %v6813_v2  ;;  %5453 = vmatprep.mubr.msk.bf16.mxu0 %vm6814_vm0, %v6813_v2 }
  0xdd   : > { %5473 = vmatprep.mubr.msk.bf16.mxu1 %vm6814_vm0, %v6813_v2  ;;  %v1386_v54 = vshrl.u32 %v4742_v46, 16 }
  0xde   : > { %5440 = vmatpush3.bf16.msra.mxu0 %v6260_v47  ;;  %v6305_v47 = vld [vmem:[#allocation5 + $0x230] sm:$0xff]  }
  0xdf   : > { %5460 = vmatpush3.bf16.msra.mxu1 %v6261_v48  ;;  %5441 = vmatprep.subr.bf16.mxu0 %v6813_v2  ;;  %v6306_v48 = vld [vmem:[#allocation5 + $0x70] sm:$0xff]  }
  0xe0   : > { %5461 = vmatprep.subr.bf16.mxu1 %v6813_v2 }
  0xe2   : > { %5442 = vmatpush3.bf16.msra.mxu0 %v6262_v49  ;;  %v4729_v49 = vld [vmem:[%s7114_s8 + $0x10] sm:$0xe] }
  0xe3   : > { %5462 = vmatpush3.bf16.msra.mxu1 %v6263_v50  ;;  %5443 = vmatprep.subr.bf16.mxu0 %v6813_v2  ;;  %v1388_v50 = vshll.u32 %v4742_v46, 16  ;;  %v6353_v46 = vld [vmem:[#allocation5 + $0x160] sm:$0xff]  }
  0xe4   : > { %5463 = vmatprep.subr.bf16.mxu1 %v6813_v2 }
  0xe5   : > { %v1390_v55 = vrot.slane %v1388_v50, 1 }
  0xe6   : > { %5444 = vmatpush3.bf16.msra.mxu0 %v6264_v51  ;;  %v6307_v51 = vld [vmem:[#allocation5 + $0x238] sm:$0xff]  }
  0xe7   : > { %5464 = vmatpush3.bf16.msra.mxu1 %v6265_v52  ;;  %5445 = vmatprep.subr.bf16.mxu0 %v6813_v2  ;;  %v6308_v52 = vld [vmem:[#allocation5 + $0x78] sm:$0xff]  }
  0xe8   : > { %5465 = vmatprep.subr.bf16.mxu1 %v6813_v2 }
  0xea   : > { %5446 = vmatpush3.bf16.msra.mxu0 %v6266_v53  ;;  %v4730_v53 = vcombine.low %v4729_v49, %v7190_v19  ;;  %v6333_v19 = vld [vmem:[#allocation5 + $0x110] sm:$0xff]   ;;  %v6356_v49 = vld [vmem:[#allocation5 + $0x1a8] sm:$0xff]  }
  0xeb   : > { %5466 = vmatpush3.bf16.msra.mxu1 %v6267_v56  ;;  %5447 = vmatprep.subr.bf16.mxu0 %v6813_v2 }
  0xec   : > { %5467 = vmatprep.subr.bf16.mxu1 %v6813_v2  ;;  %v1228_v56 = vrot.slane %v4730_v53, 1 }
  0xee   : > { %5448 = vmatpush3.bf16.msra.mxu0 %v6268_v58  ;;  %v1391_v58 = vor.u32 %v1390_v55, %v1386_v54  ;;  %v6358_v54 = vld [vmem:[#allocation5 + $0x1b0] sm:$0xff]  }
  0xef   : > { %5468 = vmatpush3.bf16.msra.mxu1 %v6269_v59  ;;  %5449 = vmatprep.subr.bf16.mxu0 %v6813_v2  ;;  %v6312_v59 = vld [vmem:[#allocation5 + $0x80] sm:$0xff]   ;;  %v4789_v55 = vld [vmem:[%s7114_s8 + $0x10] sm:$0xe] }
  0xf0   : > { %5469 = vmatprep.subr.bf16.mxu1 %v6813_v2 }
  0xf2   : > { %5450 = vmatpush3.bf16.msra.mxu0 %v6270_v61  ;;  %v6314_v61 = vld [vmem:[#allocation5 + $0x88] sm:$0xff]  }
  0xf3   : > { %5470 = vmatpush3.bf16.msra.mxu1 %v6271_v62  ;;  %5451 = vmatprep.subr.bf16.mxu0 %v6813_v2  ;;  %v6315_v62 = vld [vmem:[#allocation5 + $0x10] sm:$0xff]  }
  0xf4   : > { %5471 = vmatprep.subr.bf16.mxu1 %v6813_v2 }
  0xf6   : > { %5452 = vmatpush3.bf16.msra.mxu0 %v6272_v3  ;;  %v6319_v3 = vld [vmem:[#allocation5 + $0x20] sm:$0xff]  }
  0xf7   : > { %5472 = vmatpush3.bf16.msra.mxu1 %v6273_v5  ;;  %5477 = vmatprep.subr.bf16.mxu0 %v6813_v2  ;;  %v6321_v5 = vld [vmem:[#allocation5 + $0x28] sm:$0xff]  }
  0xf8   : > { %5497 = vmatprep.subr.bf16.mxu1 %v6813_v2 }
  0xf9   : > { %5454 = vmatmul.mubr.bf16.vlgmr.msra.gmra.mrb[8].mxu0 %v772_v6  ;;  %v6322_v6 = vld [vmem:[#allocation5 + $0xa8] sm:$0xff]  }
  0xfa   : > { %5474 = vmatmul.mubr.bf16.vlgmr.msra.gmra.mrb[8].mxu1 %v884_v7  ;;  %5478 = vmatpush3.bf16.msra.mxu0 %v6276_v8  ;;  %v6323_v7 = vld [vmem:[#allocation5 + $0x30] sm:$0xff]  }
  0xfb   : > { %5498 = vmatpush3.bf16.msra.mxu1 %v6277_v9  ;;  %5479 = vmatprep.subr.bf16.mxu0 %v6813_v2  ;;  %v6324_v8 = vld [vmem:[#allocation5 + $0xb0] sm:$0xff]   ;;  %v4759_v9 = vld [vmem:[%s7114_s8 + $0x8] sm:$0xe] }
  0xfc   : > { %5499 = vmatprep.subr.bf16.mxu1 %v6813_v2  ;;  %5493 = vmatprep.mubr.msk.bf16.mxu0 %vm6814_vm0, %v6813_v2 }
  0xfd   : > { %5513 = vmatprep.mubr.msk.bf16.mxu1 %vm6814_vm0, %v6813_v2 }
  0xfe   : > { %5480 = vmatpush3.bf16.msra.mxu0 %v6278_v10  ;;  %v6325_v10 = vld [vmem:[#allocation5 + $0x38] sm:$0xff]  }
  0xff   : > { %5500 = vmatpush3.bf16.msra.mxu1 %v6279_v11  ;;  %5481 = vmatprep.subr.bf16.mxu0 %v6813_v2  ;;  %v6326_v11 = vld [vmem:[#allocation5 + $0xb8] sm:$0xff]  }
 0x100   : > { %5501 = vmatprep.subr.bf16.mxu1 %v6813_v2 }
 0x102   : > { %5482 = vmatpush3.bf16.msra.mxu0 %v6280_v12  ;;  %v4760_v12 = vcombine.low %v4759_v9, %v7217_v43  ;;  %v6350_v43 = vld [vmem:[#allocation5 + $0x190] sm:$0xff]  }
 0x103   : > { %5502 = vmatpush3.bf16.msra.mxu1 %v6281_v13  ;;  %5483 = vmatprep.subr.bf16.mxu0 %v6813_v2  ;;  %v6328_v13 = vld [vmem:[#allocation5 + $0xc0] sm:$0xff]   ;;  %v6367_v9 = vld [vmem:[#allocation5 + $0x210] sm:$0xff]  }
 0x104   : > { %5503 = vmatprep.subr.bf16.mxu1 %v6813_v2 }
 0x106   : > { %5484 = vmatpush3.bf16.msra.mxu0 %v6282_v14  ;;  %v1589_v14 = vrot.slane %v4760_v12, 1  ;;  %v6370_v12 = vld [vmem:[#allocation5 + $0x1e0] sm:$0xff]  }
 0x107   : > { %5504 = vmatpush3.bf16.msra.mxu1 %v6283_v15  ;;  %5485 = vmatprep.subr.bf16.mxu0 %v6813_v2  ;;  %v6329_v15 = vld [vmem:[#allocation5 + $0x100] sm:$0xff]  }
 0x108   : > { %5505 = vmatprep.subr.bf16.mxu1 %v6813_v2 }
 0x10a   : > { %5486 = vmatpush3.bf16.msra.mxu0 %v6284_v16  ;;  %v6330_v16 = vld [vmem:[#allocation5 + $0xc8] sm:$0xff]  }
 0x10b   : > { %5506 = vmatpush3.bf16.msra.mxu1 %v6285_v17  ;;  %5487 = vmatprep.subr.bf16.mxu0 %v6813_v2  ;;  %v6331_v17 = vld [vmem:[#allocation5 + $0x108] sm:$0xff]  }
 0x10c   : > { %5507 = vmatprep.subr.bf16.mxu1 %v6813_v2 }
 0x10e   : > { %5488 = vmatpush3.bf16.msra.mxu0 %v6286_v20  ;;  %v6334_v20 = vld [vmem:[#allocation5 + $0xd8] sm:$0xff]  }
 0x10f   : > { %5508 = vmatpush3.bf16.msra.mxu1 %v6287_v22  ;;  %5489 = vmatprep.subr.bf16.mxu0 %v6813_v2  ;;  %v6336_v22 = vld [vmem:[#allocation5 + $0xe0] sm:$0xff]  }
 0x110   : > { %5509 = vmatprep.subr.bf16.mxu1 %v6813_v2 }
 0x112   : > { %5490 = vmatpush3.bf16.msra.mxu0 %v6288_v23  ;;  %v4778_v23 = vld [vmem:[%s7114_s8 + $0x10] sm:$0xf] }
 0x113   : > { %5510 = vmatpush3.bf16.msra.mxu1 %v6289_v25  ;;  %5491 = vmatprep.subr.bf16.mxu0 %v6813_v2  ;;  %v7268_v25 = vld [vmem:[%s7114_s8 + $0x14] sm:$0x1] }
 0x114   : > { %5511 = vmatprep.subr.bf16.mxu1 %v6813_v2  ;;  %v4780_v28 = vcombine.low %v4778_v23, %v7268_v25 }
 0x116   : > { %5492 = vmatpush3.bf16.msra.mxu0 %v6290_v26  ;;  %v6338_v26 = vld [vmem:[#allocation5 + $0xe8] sm:$0xff]  }
 0x117   : > { %5512 = vmatpush3.bf16.msra.mxu1 %v6291_v29  ;;  %5517 = vmatprep.subr.bf16.mxu0 %v6813_v2  ;;  %v6340_v29 = vld [vmem:[#allocation5 + $0xf0] sm:$0xff]  }
 0x118   : > { %5537 = vmatprep.subr.bf16.mxu1 %v6813_v2 }
 0x119   : > { %5494 = vmatmul.mubr.bf16.vlgmr.msra.gmra.mrb[12].mxu0 %v4709_v30  ;;  %v6341_v30 = vld [vmem:[#allocation5 + $0x130] sm:$0xff]  }
 0x11a   : > { %5514 = vmatmul.mubr.bf16.vlgmr.msra.gmra.mrb[12].mxu1 %v1116_v31  ;;  %5518 = vmatpush3.bf16.msra.mxu0 %v6293_v32  ;;  %v1812_v31 = vshll.u32 %v4780_v28, 16  ;;  %v6342_v32 = vld [vmem:[#allocation5 + $0xf8] sm:$0xff]  }
 0x11b   : > { %5538 = vmatpush3.bf16.msra.mxu1 %v6294_v33  ;;  %5519 = vmatprep.subr.bf16.mxu0 %v6813_v2  ;;  %v6343_v33 = vld [vmem:[#allocation5 + $0x138] sm:$0xff]  }
 0x11c   : > { %5539 = vmatprep.subr.bf16.mxu1 %v6813_v2  ;;  %5533 = vmatprep.mubr.msk.bf16.mxu0 %vm6814_vm0, %v6813_v2 }
 0x11d   : > { %5553 = vmatprep.mubr.msk.bf16.mxu1 %vm6814_vm0, %v6813_v2 }
 0x11e   : > { %5520 = vmatpush3.bf16.msra.mxu0 %v6295_v34  ;;  %v1810_v34 = vshrl.u32 %v4780_v28, 16 }
 0x11f   : > { %5540 = vmatpush3.bf16.msra.mxu1 %v6296_v35  ;;  %5521 = vmatprep.subr.bf16.mxu0 %v6813_v2  ;;  %v1814_v35 = vrot.slane %v1812_v31, 1  ;;  %v4821_v31 = vld [vmem:[%s7114_s8 + $0x18] sm:$0xe] }
 0x120   : > { %5541 = vmatprep.subr.bf16.mxu1 %v6813_v2 }
 0x122   : > { %5522 = vmatpush3.bf16.msra.mxu0 %v6297_v36  ;;  %v4769_v36 = vld [vmem:[%s7114_s8 + $0x10] sm:$0xf] }
 0x123   : > { %5542 = vmatpush3.bf16.msra.mxu1 %v6298_v37  ;;  %5523 = vmatprep.subr.bf16.mxu0 %v6813_v2  ;;  %v6345_v37 = vld [vmem:[#allocation5 + $0x140] sm:$0xff]  }
 0x124   : > { %5543 = vmatprep.subr.bf16.mxu1 %v6813_v2 }
 0x126   : > { %5524 = vmatpush3.bf16.msra.mxu0 %v6299_v38  ;;  %v6346_v38 = vld [vmem:[#allocation5 + $0x180] sm:$0xff]  }
 0x127   : > { %5544 = vmatpush3.bf16.msra.mxu1 %v6300_v39  ;;  %5525 = vmatprep.subr.bf16.mxu0 %v6813_v2  ;;  %v1815_v39 = vor.u32 %v1814_v35, %v1810_v34  ;;  %v6376_v35 = vld [vmem:[#allocation5 + $0x1f8] sm:$0xff]  }
 0x128   : > { %5545 = vmatprep.subr.bf16.mxu1 %v6813_v2 }
 0x12a   : > { %5526 = vmatpush3.bf16.msra.mxu0 %v6301_v40  ;;  %v6347_v40 = vld [vmem:[#allocation5 + $0x148] sm:$0xff]  }
 0x12b   : > { %5546 = vmatpush3.bf16.msra.mxu1 %v6302_v41  ;;  %5527 = vmatprep.subr.bf16.mxu0 %v6813_v2  ;;  %v6348_v41 = vld [vmem:[#allocation5 + $0x188] sm:$0xff]  }
 0x12c   : > { %5547 = vmatprep.subr.bf16.mxu1 %v6813_v2 }
 0x12e   : > { %5528 = vmatpush3.bf16.msra.mxu0 %v6303_v44  ;;  %v6351_v44 = vld [vmem:[#allocation5 + $0x158] sm:$0xff]  }
 0x12f   : > { %5548 = vmatpush3.bf16.msra.mxu1 %v6304_v45  ;;  %5529 = vmatprep.subr.bf16.mxu0 %v6813_v2  ;;  %v6352_v45 = vld [vmem:[#allocation5 + $0x198] sm:$0xff]  }
 0x130   : > { %5549 = vmatprep.subr.bf16.mxu1 %v6813_v2 }
 0x132   : > { %5530 = vmatpush3.bf16.msra.mxu0 %v6305_v47  ;;  %v6354_v47 = vld [vmem:[#allocation5 + $0x1a0] sm:$0xff]  }
 0x133   : > { %5550 = vmatpush3.bf16.msra.mxu1 %v6306_v48  ;;  %5531 = vmatprep.subr.bf16.mxu0 %v6813_v2  ;;  %v6355_v48 = vld [vmem:[#allocation5 + $0x168] sm:$0xff]  }
 0x134   : > { %5551 = vmatprep.subr.bf16.mxu1 %v6813_v2 }
 0x136   : > { %5532 = vmatpush3.bf16.msra.mxu0 %v6307_v51  ;;  %v6357_v51 = vld [vmem:[#allocation5 + $0x170] sm:$0xff]  }
 0x137   : > { %5552 = vmatpush3.bf16.msra.mxu1 %v6308_v52  ;;  %5557 = vmatprep.subr.bf16.mxu0 %v6813_v2 }
 0x138   : > { %5577 = vmatprep.subr.bf16.mxu1 %v6813_v2 }
 0x139   : > { %5534 = vmatmul.mubr.bf16.vlgmr.msra.gmra.mrb[16].mxu0 %v1228_v56 }
 0x13a   : > { %5554 = vmatmul.mubr.bf16.vlgmr.msra.gmra.mrb[16].mxu1 %v1391_v58  ;;  %5558 = vmatpush3.bf16.msra.mxu0 %v6311_v57 }
 0x13b   : > { %5578 = vmatpush3.bf16.msra.mxu1 %v6312_v59  ;;  %5559 = vmatprep.subr.bf16.mxu0 %v6813_v2 }
 0x13c   : > { %5579 = vmatprep.subr.bf16.mxu1 %v6813_v2  ;;  %5573 = vmatprep.mubr.msk.bf16.mxu0 %vm6814_vm0, %v6813_v2 }
 0x13d   : > { %5593 = vmatprep.mubr.msk.bf16.mxu1 %vm6814_vm0, %v6813_v2 }
 0x13e   : > { %5560 = vmatpush3.bf16.msra.mxu0 %v6313_v60 }
 0x13f   : > { %5580 = vmatpush3.bf16.msra.mxu1 %v6314_v61  ;;  %5561 = vmatprep.subr.bf16.mxu0 %v6813_v2 }
 0x140   : > { %5581 = vmatprep.subr.bf16.mxu1 %v6813_v2 }
 0x142   : > { %5562 = vmatpush3.bf16.msra.mxu0 %v6315_v62  ;;  %v6359_v62 = vld [vmem:[#allocation5 + $0x178] sm:$0xff]  }
 0x143   : > { %5582 = vmatpush3.bf16.msra.mxu1 %v6316_v63  ;;  %5563 = vmatprep.subr.bf16.mxu0 %v6813_v2  ;;  %v4790_v63 = vcombine.low %v4789_v55, %v7268_v25 }
 0x144   : > { %5583 = vmatprep.subr.bf16.mxu1 %v6813_v2 }
 0x146   : > { %5564 = vmatpush3.bf16.msra.mxu0 %v6317_v0  ;;  %v6360_v0 = vld [vmem:[#allocation5 + $0x1b8] sm:$0xff]  }
 0x147   : > { %5584 = vmatpush3.bf16.msra.mxu1 %v6318_v1  ;;  %5565 = vmatprep.subr.bf16.mxu0 %v6813_v2  ;;  %v1926_v1 = vrot.slane %v4790_v63, 1 }
 0x148   : > { %5585 = vmatprep.subr.bf16.mxu1 %v6813_v2 }
 0x14a   : > { %5566 = vmatpush3.bf16.msra.mxu0 %v6319_v3  ;;  %v4801_v3 = vld [vmem:[%s7114_s8 + $0x18] sm:$0xf] }
 0x14b   : > { %5586 = vmatpush3.bf16.msra.mxu1 %v6320_v4  ;;  %5567 = vmatprep.subr.bf16.mxu0 %v6813_v2  ;;  %v6362_v4 = vld [vmem:[#allocation5 + $0x1c0] sm:$0xff]  }
 0x14c   : > { %5587 = vmatprep.subr.bf16.mxu1 %v6813_v2 }
 0x14e   : > { %5568 = vmatpush3.bf16.msra.mxu0 %v6321_v5  ;;  %v6363_v5 = vld [vmem:[#allocation5 + $0x200] sm:$0xff]  }
 0x14f   : > { %5588 = vmatpush3.bf16.msra.mxu1 %v6322_v6  ;;  %5569 = vmatprep.subr.bf16.mxu0 %v6813_v2  ;;  %v6364_v6 = vld [vmem:[#allocation5 + $0x1c8] sm:$0xff]  }
 0x150   : > { %5589 = vmatprep.subr.bf16.mxu1 %v6813_v2 }
 0x152   : > { %5570 = vmatpush3.bf16.msra.mxu0 %v6323_v7  ;;  %v6365_v7 = vld [vmem:[#allocation5 + $0x208] sm:$0xff]  }
 0x153   : > { %5590 = vmatpush3.bf16.msra.mxu1 %v6324_v8  ;;  %5571 = vmatprep.subr.bf16.mxu0 %v6813_v2  ;;  %v6366_v8 = vld [vmem:[#allocation5 + $0x1d0] sm:$0xff]  }
 0x154   : > { %5591 = vmatprep.subr.bf16.mxu1 %v6813_v2 }
 0x156   : > { %5572 = vmatpush3.bf16.msra.mxu0 %v6325_v10  ;;  %v6368_v10 = vld [vmem:[#allocation5 + $0x1d8] sm:$0xff]  }
 0x157   : > { %5592 = vmatpush3.bf16.msra.mxu1 %v6326_v11  ;;  %5597 = vmatprep.subr.bf16.mxu0 %v6813_v2  ;;  %v6369_v11 = vld [vmem:[#allocation5 + $0x218] sm:$0xff]  }
 0x158   : > { %5617 = vmatprep.subr.bf16.mxu1 %v6813_v2 }
 0x159   : > { %5574 = vmatmul.mubr.bf16.vlgmr.msra.gmra.mrb[20].mxu0 %v7214_v42  ;;  %v6349_v42 = vld [vmem:[#allocation5 + $0x150] sm:$0xff]  }
 0x15a   : > { %5594 = vmatmul.mubr.bf16.vlgmr.msra.gmra.mrb[20].mxu1 %v1589_v14  ;;  %5598 = vmatpush3.bf16.msra.mxu0 %v6328_v13  ;;  %v4810_v13 = vld [vmem:[%s7114_s8 + $0x18] sm:$0xf]  ;;  %v6371_v14 = vld [vmem:[#allocation5 + $0x220] sm:$0xff]  }
 0x15b   : > { %5618 = vmatpush3.bf16.msra.mxu1 %v6329_v15  ;;  %5599 = vmatprep.subr.bf16.mxu0 %v6813_v2  ;;  %v4811_v15 = vld [vmem:[%s7114_s8 + $0x1c] sm:$0x1] }
 0x15c   : > { %5619 = vmatprep.subr.bf16.mxu1 %v6813_v2  ;;  %5613 = vmatprep.mubr.msk.bf16.mxu0 %vm6814_vm0, %v6813_v2 }
 0x15d   : > { %5633 = vmatprep.mubr.msk.bf16.mxu1 %vm6814_vm0, %v6813_v2 }
 0x15e   : > { %5600 = vmatpush3.bf16.msra.mxu0 %v6330_v16  ;;  %v4812_v16 = vcombine.low %v4810_v13, %v4811_v15  ;;  %v6400_v13 = vld [vmem:[#allocation5 + $0xc8] sm:$0xff]  }
 0x15f   : > { %5620 = vmatpush3.bf16.msra.mxu1 %v6331_v17  ;;  %5601 = vmatprep.subr.bf16.mxu0 %v6813_v2  ;;  %v6372_v17 = vld [vmem:[#allocation5 + $0x1e8] sm:$0xff]  }
 0x160   : > { %5621 = vmatprep.subr.bf16.mxu1 %v6813_v2  ;;  %v2153_v23 = vshll.u32 %v4812_v16, 16 }
 0x162   : > { %5602 = vmatpush3.bf16.msra.mxu0 %v6332_v18  ;;  %v6373_v18 = vld [vmem:[#allocation5 + $0x228] sm:$0xff]   ;;  %v2155_v34 = vrot.slane %v2153_v23, 1 }
 0x163   : > { %5622 = vmatpush3.bf16.msra.mxu1 %v6333_v19  ;;  %5603 = vmatprep.subr.bf16.mxu0 %v6813_v2 }
 0x164   : > { %5623 = vmatprep.subr.bf16.mxu1 %v6813_v2 }
 0x166   : > { %5604 = vmatpush3.bf16.msra.mxu0 %v6334_v20 }
 0x167   : > { %5624 = vmatpush3.bf16.msra.mxu1 %v6335_v21  ;;  %5605 = vmatprep.subr.bf16.mxu0 %v6813_v2 }
 0x168   : > { %5625 = vmatprep.subr.bf16.mxu1 %v6813_v2 }
 0x16a   : > { %5606 = vmatpush3.bf16.msra.mxu0 %v6336_v22 }
 0x16b   : > { %5626 = vmatpush3.bf16.msra.mxu1 %v6337_v24  ;;  %5607 = vmatprep.subr.bf16.mxu0 %v6813_v2 }
 0x16c   : > { %5627 = vmatprep.subr.bf16.mxu1 %v6813_v2 }
 0x16e   : > { %5608 = vmatpush3.bf16.msra.mxu0 %v6338_v26  ;;  %v6374_v26 = vld [vmem:[#allocation5 + $0x1f0] sm:$0xff]  }
 0x16f   : > { %5628 = vmatpush3.bf16.msra.mxu1 %v6339_v27  ;;  %5609 = vmatprep.subr.bf16.mxu0 %v6813_v2 }
 0x170   : > { %5629 = vmatprep.subr.bf16.mxu1 %v6813_v2 }
 0x172   : > { %5610 = vmatpush3.bf16.msra.mxu0 %v6340_v29 }
 0x173   : > { %5630 = vmatpush3.bf16.msra.mxu1 %v6341_v30  ;;  %5611 = vmatprep.subr.bf16.mxu0 %v6813_v2  ;;  %v6375_v30 = vld [vmem:[#allocation5 + $0x230] sm:$0xff]  }
 0x174   : > { %5631 = vmatprep.subr.bf16.mxu1 %v6813_v2 }
 0x176   : > { %5612 = vmatpush3.bf16.msra.mxu0 %v6342_v32 }
 0x177   : > { %5632 = vmatpush3.bf16.msra.mxu1 %v6343_v33  ;;  %5637 = vmatprep.subr.bf16.mxu0 %v6813_v2  ;;  %v2151_v33 = vshrl.u32 %v4812_v16, 16  ;;  %v6403_v16 = vld [vmem:[#allocation5 + $0x98] sm:$0xff]  }
 0x178   : > { %5657 = vmatprep.subr.bf16.mxu1 %v6813_v2 }
 0x179   : > { %5614 = vmatmul.mubr.bf16.vlgmr.msra.gmra.mrb[24].mxu0 %v4769_v36  ;;  %v4822_v36 = vcombine.low %v4821_v31, %v4811_v15  ;;  %v6402_v15 = vld [vmem:[#allocation5 + $0xd0] sm:$0xff]  }
 0x17a   : > { %5634 = vmatmul.mubr.bf16.vlgmr.msra.gmra.mrb[24].mxu1 %v1815_v39  ;;  %5638 = vmatpush3.bf16.msra.mxu0 %v6345_v37  ;;  %v6377_v37 = vld [vmem:[#allocation5 + $0x238] sm:$0xff]  }
 0x17b   : > { %5658 = vmatpush3.bf16.msra.mxu1 %v6346_v38  ;;  %5639 = vmatprep.subr.bf16.mxu0 %v6813_v2  ;;  %v2156_v38 = vor.u32 %v2155_v34, %v2151_v33  ;;  %v2267_v39 = vrot.slane %v4822_v36, 1  ;;  %v6410_v33 = vld [vmem:[#allocation5 + $0xf0] sm:$0xff]   ;;  %v6411_v36 = vld [vmem:[#allocation5 + $0xb8] sm:$0xff]  }
 0x17c   : > { %5659 = vmatprep.subr.bf16.mxu1 %v6813_v2  ;;  %5653 = vmatprep.mubr.msk.bf16.mxu0 %vm6814_vm0, %v6813_v2 }
 0x17d   : > { %5673 = vmatprep.mubr.msk.bf16.mxu1 %vm6814_vm0, %v6813_v2 }
 0x17e   : > { %5640 = vmatpush3.bf16.msra.mxu0 %v6347_v40  ;;  %v6380_v40 = vld [vmem:[#allocation5 + $0x40] sm:$0xff]  }
 0x17f   : > { %5660 = vmatpush3.bf16.msra.mxu1 %v6348_v41  ;;  %5641 = vmatprep.subr.bf16.mxu0 %v6813_v2  ;;  %v6381_v41 = vld [vmem:[#allocation5] sm:$0xff]  }
 0x180   : > { %5661 = vmatprep.subr.bf16.mxu1 %v6813_v2 }
 0x182   : > { %5642 = vmatpush3.bf16.msra.mxu0 %v6349_v42  ;;  %v6382_v42 = vld [vmem:[#allocation5 + $0x48] sm:$0xff]  }
 0x183   : > { %5662 = vmatpush3.bf16.msra.mxu1 %v6350_v43  ;;  %5643 = vmatprep.subr.bf16.mxu0 %v6813_v2  ;;  %v6383_v43 = vld [vmem:[#allocation5 + $0x8] sm:$0xff]  }
 0x184   : > { %5663 = vmatprep.subr.bf16.mxu1 %v6813_v2 }
 0x186   : > { %5644 = vmatpush3.bf16.msra.mxu0 %v6351_v44  ;;  %v6384_v44 = vld [vmem:[#allocation5 + $0x50] sm:$0xff]  }
 0x187   : > { %5664 = vmatpush3.bf16.msra.mxu1 %v6352_v45  ;;  %5645 = vmatprep.subr.bf16.mxu0 %v6813_v2  ;;  %v6385_v45 = vld [vmem:[#allocation5 + $0x10] sm:$0xff]  }
 0x188   : > { %5665 = vmatprep.subr.bf16.mxu1 %v6813_v2 }
 0x18a   : > { %5646 = vmatpush3.bf16.msra.mxu0 %v6353_v46  ;;  %v6386_v46 = vld [vmem:[#allocation5 + $0x58] sm:$0xff]  }
 0x18b   : > { %5666 = vmatpush3.bf16.msra.mxu1 %v6354_v47  ;;  %5647 = vmatprep.subr.bf16.mxu0 %v6813_v2  ;;  %v6387_v47 = vld [vmem:[#allocation5 + $0x18] sm:$0xff]  }
 0x18c   : > { %v425_v50 = vpop.f32.mrb[0].mxu0  ;;  %5667 = vmatprep.subr.bf16.mxu1 %v6813_v2 }
 0x18d   : > { %v513_v52 = vpop.f32.mrb[0].mxu1  ;;  %v5375_v53 = vpop.f32.mrb[1].mxu0 }
 0x18e   : > { %v7297_v56 = vadd.f32 %v513_v52, %v425_v50  ;;  %v5395_v57 = vpop.f32.mrb[1].mxu1  ;;  %v428_v58 = vpop.f32.mrb[2].mxu0  ;;  %5648 = vmatpush3.bf16.msra.mxu0 %v6355_v48  ;;  %v6388_v48 = vld [vmem:[#allocation5 + $0x60] sm:$0xff]   ;;  %v7345_v50 = vld [vmem:[%s7114_s8 + $0x14] sm:$0x1]  ;;  %v6390_v53 = vld [vmem:[#allocation5 + $0x68] sm:$0xff]  }
 0x18f   : > { %v516_v59 = vpop.f32.mrb[2].mxu1  ;;  %5668 = vmatpush3.bf16.msra.mxu1 %v6356_v49  ;;  %v5376_v60 = vpop.f32.mrb[3].mxu0  ;;  %5649 = vmatprep.subr.bf16.mxu0 %v6813_v2  ;;  %v4832_v49 = vld [vmem:[%s7114_s8 + $0x10] sm:$0xf] }
 0x190   : > { %v5396_v61 = vpop.f32.mrb[3].mxu1  ;;  %5669 = vmatprep.subr.bf16.mxu1 %v6813_v2  ;;  %v4834_v52 = vcombine.low %v4832_v49, %v7345_v50 }
 0x192   : > { %5650 = vmatpush3.bf16.msra.mxu0 %v6357_v51  ;;  %v6389_v51 = vld [vmem:[#allocation5 + $0x20] sm:$0xff]   ;;  %v2422_v59 = vshll.u32 %v4834_v52, 16 }
 0x193   : > { %5670 = vmatpush3.bf16.msra.mxu1 %v6358_v54  ;;  %5651 = vmatprep.subr.bf16.mxu0 %v6813_v2  ;;  %v6391_v54 = vld [vmem:[#allocation5 + $0x28] sm:$0xff]  }
 0x194   : > { %5671 = vmatprep.subr.bf16.mxu1 %v6813_v2 }
 0x196   : > { %5652 = vmatpush3.bf16.msra.mxu0 %v6359_v62  ;;  %v6392_v62 = vld [vmem:[#allocation5 + $0x70] sm:$0xff]  }
 0x197   : > { %5672 = vmatpush3.bf16.msra.mxu1 %v6360_v0  ;;  %5677 = vmatprep.subr.bf16.mxu0 %v6813_v2 }
 0x198   : > { %5697 = vmatprep.subr.bf16.mxu1 %v6813_v2 }
 0x199   : > { %5654 = vmatmul.mubr.bf16.vlgmr.msra.gmra.mrb[28].mxu0 %v1926_v1 }
 0x19a   : > { %5674 = vmatmul.mubr.bf16.vlgmr.msra.gmra.mrb[28].mxu1 %v4801_v3  ;;  %5678 = vmatpush3.bf16.msra.mxu0 %v6362_v4  ;;  %v6393_v3 = vld [vmem:[#allocation5 + $0x30] sm:$0xff]  }
 0x19b   : > { %5698 = vmatpush3.bf16.msra.mxu1 %v6363_v5  ;;  %5679 = vmatprep.subr.bf16.mxu0 %v6813_v2  ;;  %v2420_v5 = vshrl.u32 %v4834_v52, 16 }
 0x19c   : > { %5699 = vmatprep.subr.bf16.mxu1 %v6813_v2  ;;  %5693 = vmatprep.mubr.msk.bf16.mxu0 %vm6814_vm0, %v6813_v2 }
 0x19d   : > { %5713 = vmatprep.mubr.msk.bf16.mxu1 %vm6814_vm0, %v6813_v2 }
 0x19e   : > { %5680 = vmatpush3.bf16.msra.mxu0 %v6364_v6  ;;  %v2424_v6 = vrot.slane %v2422_v59, 1 }
 0x19f   : > { %5700 = vmatpush3.bf16.msra.mxu1 %v6365_v7  ;;  %5681 = vmatprep.subr.bf16.mxu0 %v6813_v2  ;;  %v6394_v7 = vld [vmem:[#allocation5 + $0x78] sm:$0xff]  }
 0x1a0   : > { %5701 = vmatprep.subr.bf16.mxu1 %v6813_v2 }
 0x1a2   : > { %5682 = vmatpush3.bf16.msra.mxu0 %v6366_v8  ;;  %v6395_v8 = vld [vmem:[#allocation5 + $0x38] sm:$0xff]  }
 0x1a3   : > { %5702 = vmatpush3.bf16.msra.mxu1 %v6367_v9  ;;  %5683 = vmatprep.subr.bf16.mxu0 %v6813_v2  ;;  %v2425_v9 = vor.u32 %v2424_v6, %v2420_v5  ;;  %v4881_v5 = vld [vmem:[%s7114_s8 + $0x18] sm:$0xe] }
 0x1a4   : > { %5703 = vmatprep.subr.bf16.mxu1 %v6813_v2 }
 0x1a6   : > { %5684 = vmatpush3.bf16.msra.mxu0 %v6368_v10  ;;  %v6397_v10 = vld [vmem:[#allocation5 + $0x80] sm:$0xff]  }
 0x1a7   : > { %5704 = vmatpush3.bf16.msra.mxu1 %v6369_v11  ;;  %5685 = vmatprep.subr.bf16.mxu0 %v6813_v2  ;;  %v6398_v11 = vld [vmem:[#allocation5 + $0xc0] sm:$0xff]  }
 0x1a8   : > { %5705 = vmatprep.subr.bf16.mxu1 %v6813_v2 }
 0x1aa   : > { %5686 = vmatpush3.bf16.msra.mxu0 %v6370_v12  ;;  %v6399_v12 = vld [vmem:[#allocation5 + $0x88] sm:$0xff]  }
 0x1ab   : > { %5706 = vmatpush3.bf16.msra.mxu1 %v6371_v14  ;;  %5687 = vmatprep.subr.bf16.mxu0 %v6813_v2  ;;  %v6401_v14 = vld [vmem:[#allocation5 + $0x90] sm:$0xff]  }
 0x1ac   : > { %v624_v19 = vpop.f32.mrb[4].mxu0  ;;  %5707 = vmatprep.subr.bf16.mxu1 %v6813_v2 }
 0x1ad   : > { %v630_v20 = vadd.f32 %v624_v19, %v7297_v56  ;;  %v735_v21 = vpop.f32.mrb[4].mxu1  ;;  %v5415_v22 = vpop.f32.mrb[5].mxu0  ;;  %v6406_v19 = vld [vmem:[#allocation5 + $0xe0] sm:$0xff]  }
 0x1ae   : > { %v5435_v24 = vpop.f32.mrb[5].mxu1  ;;  %v627_v25 = vpop.f32.mrb[6].mxu0  ;;  %5688 = vmatpush3.bf16.msra.mxu0 %v6372_v17  ;;  %v6404_v17 = vld [vmem:[#allocation5 + $0xd8] sm:$0xff]  }
 0x1af   : > { %v7324_v27 = vadd.f32 %v735_v21, %v630_v20  ;;  %v738_v28 = vpop.f32.mrb[6].mxu1  ;;  %5708 = vmatpush3.bf16.msra.mxu1 %v6373_v18  ;;  %v5416_v29 = vpop.f32.mrb[7].mxu0  ;;  %5689 = vmatprep.subr.bf16.mxu0 %v6813_v2  ;;  %v6405_v18 = vld [vmem:[#allocation5 + $0xa0] sm:$0xff]   ;;  %v6407_v20 = vld [vmem:[#allocation5 + $0xa8] sm:$0xff]  }
 0x1b0   : > { %v5436_v32 = vpop.f32.mrb[7].mxu1  ;;  %5709 = vmatprep.subr.bf16.mxu1 %v6813_v2  ;;  %v6408_v21 = vld [vmem:[#allocation5 + $0xe8] sm:$0xff]   ;;  %v6409_v28 = vld [vmem:[#allocation5 + $0xb0] sm:$0xff]  }
 0x1b1   : > { %v4851_v29 = vld [vmem:[%s7114_s8 + $0x10] sm:$0xe] }
 0x1b2   : > { %5690 = vmatpush3.bf16.msra.mxu0 %v6374_v26 }
 0x1b3   : > { %5710 = vmatpush3.bf16.msra.mxu1 %v6375_v30  ;;  %5691 = vmatprep.subr.bf16.mxu0 %v6813_v2 }
 0x1b4   : > { %5711 = vmatprep.subr.bf16.mxu1 %v6813_v2 }
 0x1b6   : > { %5692 = vmatpush3.bf16.msra.mxu0 %v6376_v35  ;;  %v4852_v35 = vcombine.low %v4851_v29, %v7345_v50  ;;  %v4871_v50 = vld [vmem:[%s7114_s8 + $0x1c] sm:$0x1] }
 0x1b7   : > { %5712 = vmatpush3.bf16.msra.mxu1 %v6377_v37  ;;  %5717 = vmatprep.subr.bf16.mxu0 %v6813_v2  ;;  %v6412_v37 = vld [vmem:[#allocation5 + $0xf8] sm:$0xff]  }
 0x1b8   : > { %5737 = vmatprep.subr.bf16.mxu1 %v6813_v2 }
 0x1b9   : > { %5694 = vmatmul.mubr.bf16.vlgmr.msra.gmra.mrb[32].mxu0 %v2156_v38  ;;  %v2623_v38 = vrot.slane %v4852_v35, 1  ;;  %v6437_v35 = vld [vmem:[#allocation5 + $0x1d0] sm:$0xff]  }
 0x1ba   : > { %5714 = vmatmul.mubr.bf16.vlgmr.msra.gmra.mrb[32].mxu1 %v2267_v39  ;;  %5718 = vmatpush3.bf16.msra.mxu0 %v6380_v40  ;;  %v6414_v39 = vld [vmem:[#allocation5 + $0x100] sm:$0xff]   ;;  %v4861_v40 = vld [vmem:[%s7114_s8 + $0x18] sm:$0xf] }
 0x1bb   : > { %5738 = vmatpush3.bf16.msra.mxu1 %v6381_v41  ;;  %5719 = vmatprep.subr.bf16.mxu0 %v6813_v2  ;;  %v6415_v41 = vld [vmem:[#allocation5 + $0x140] sm:$0xff]  }
 0x1bc   : > { %5739 = vmatprep.subr.bf16.mxu1 %v6813_v2  ;;  %5733 = vmatprep.mubr.msk.bf16.mxu0 %vm6814_vm0, %v6813_v2 }
 0x1bd   : > { %5753 = vmatprep.mubr.msk.bf16.mxu1 %vm6814_vm0, %v6813_v2 }
 0x1be   : > { %5720 = vmatpush3.bf16.msra.mxu0 %v6382_v42  ;;  %v6416_v42 = vld [vmem:[#allocation5 + $0x108] sm:$0xff]  }
 0x1bf   : > { %5740 = vmatpush3.bf16.msra.mxu1 %v6383_v43  ;;  %5721 = vmatprep.subr.bf16.mxu0 %v6813_v2  ;;  %v6417_v43 = vld [vmem:[#allocation5 + $0x148] sm:$0xff]  }
 0x1c0   : > { %5741 = vmatprep.subr.bf16.mxu1 %v6813_v2 }
 0x1c2   : > { %5722 = vmatpush3.bf16.msra.mxu0 %v6384_v44  ;;  %v6418_v44 = vld [vmem:[#allocation5 + $0x110] sm:$0xff]  }
 0x1c3   : > { %5742 = vmatpush3.bf16.msra.mxu1 %v6385_v45  ;;  %5723 = vmatprep.subr.bf16.mxu0 %v6813_v2  ;;  %v6419_v45 = vld [vmem:[#allocation5 + $0x150] sm:$0xff]  }
 0x1c4   : > { %5743 = vmatprep.subr.bf16.mxu1 %v6813_v2 }
 0x1c6   : > { %5724 = vmatpush3.bf16.msra.mxu0 %v6386_v46  ;;  %v6420_v46 = vld [vmem:[#allocation5 + $0x118] sm:$0xff]  }
 0x1c7   : > { %5744 = vmatpush3.bf16.msra.mxu1 %v6387_v47  ;;  %5725 = vmatprep.subr.bf16.mxu0 %v6813_v2  ;;  %v6421_v47 = vld [vmem:[#allocation5 + $0x158] sm:$0xff]  }
 0x1c8   : > { %5745 = vmatprep.subr.bf16.mxu1 %v6813_v2 }
 0x1ca   : > { %5726 = vmatpush3.bf16.msra.mxu0 %v6388_v48  ;;  %v6422_v48 = vld [vmem:[#allocation5 + $0x120] sm:$0xff]  }
 0x1cb   : > { %5746 = vmatpush3.bf16.msra.mxu1 %v6389_v51  ;;  %5727 = vmatprep.subr.bf16.mxu0 %v6813_v2  ;;  %v6423_v51 = vld [vmem:[#allocation5 + $0x160] sm:$0xff]  }
 0x1cc   : > { %v856_v55 = vpop.f32.mrb[8].mxu0  ;;  %5747 = vmatprep.subr.bf16.mxu1 %v6813_v2 }
 0x1cd   : > { %v862_v56 = vadd.f32 %v856_v55, %v7324_v27  ;;  %v968_v57 = vpop.f32.mrb[8].mxu1  ;;  %v5455_v58 = vpop.f32.mrb[9].mxu0  ;;  %v7397_v55 = vld [vmem:[#allocation7] ss:$0 sm:$0xff] }
 0x1ce   : > { %v5475_v60 = vpop.f32.mrb[9].mxu1  ;;  %v859_v61 = vpop.f32.mrb[10].mxu0  ;;  %5728 = vmatpush3.bf16.msra.mxu0 %v6390_v53  ;;  %v6424_v53 = vld [vmem:[#allocation5 + $0x128] sm:$0xff]  }
 0x1cf   : > { %v974_v63 = vadd.f32 %v968_v57, %v862_v56  ;;  %v971_v0 = vpop.f32.mrb[10].mxu1  ;;  %5748 = vmatpush3.bf16.msra.mxu1 %v6391_v54  ;;  %v5456_v1 = vpop.f32.mrb[11].mxu0  ;;  %5729 = vmatprep.subr.bf16.mxu0 %v6813_v2  ;;  %v6425_v54 = vld [vmem:[#allocation5 + $0x168] sm:$0xff]  }
 0x1d0   : > { %v5476_v4 = vpop.f32.mrb[11].mxu1  ;;  %5749 = vmatprep.subr.bf16.mxu1 %v6813_v2 }
 0x1d1   : > { %v6427_v4 = vld [vmem:[#allocation5 + $0x170] sm:$0xff]  }
 0x1d2   : > { %5730 = vmatpush3.bf16.msra.mxu0 %v6392_v62 }
 0x1d3   : > { %5750 = vmatpush3.bf16.msra.mxu1 %v6393_v3  ;;  %5731 = vmatprep.subr.bf16.mxu0 %v6813_v2 }
 0x1d4   : > { %5751 = vmatprep.subr.bf16.mxu1 %v6813_v2 }
 0x1d6   : > { %5732 = vmatpush3.bf16.msra.mxu0 %v6394_v7 }
 0x1d7   : > { %5752 = vmatpush3.bf16.msra.mxu1 %v6395_v8  ;;  %5757 = vmatprep.subr.bf16.mxu0 %v6813_v2 }
 0x1d8   : > { %5777 = vmatprep.subr.bf16.mxu1 %v6813_v2 }
 0x1d9   : > { %5734 = vmatmul.mubr.bf16.vlgmr.msra.gmra.mrb[36].mxu0 %v2425_v9 }
 0x1da   : > { %5754 = vmatmul.mubr.bf16.vlgmr.msra.gmra.mrb[36].mxu1 %v4832_v49  ;;  %5758 = vmatpush3.bf16.msra.mxu0 %v6397_v10  ;;  %v4870_v49 = vld [vmem:[%s7114_s8 + $0x18] sm:$0xf] }
 0x1db   : > { %5778 = vmatpush3.bf16.msra.mxu1 %v6398_v11  ;;  %5759 = vmatprep.subr.bf16.mxu0 %v6813_v2  ;;  %v4872_v52 = vcombine.low %v4870_v49, %v4871_v50  ;;  %v6428_v11 = vld [vmem:[#allocation5 + $0x138] sm:$0xff]  }
 0x1dc   : > { %5779 = vmatprep.subr.bf16.mxu1 %v6813_v2  ;;  %5773 = vmatprep.mubr.msk.bf16.mxu0 %vm6814_vm0, %v6813_v2 }
 0x1dd   : > { %5793 = vmatprep.mubr.msk.bf16.mxu1 %vm6814_vm0, %v6813_v2  ;;  %v2846_v60 = vshll.u32 %v4872_v52, 16  ;;  %v2844_v9 = vshrl.u32 %v4872_v52, 16  ;;  %v6444_v52 = vld [vmem:[#allocation5 + $0x1b0] sm:$0xff]  }
 0x1de   : > { %5760 = vmatpush3.bf16.msra.mxu0 %v6399_v12  ;;  %v4882_v12 = vcombine.low %v4881_v5, %v4871_v50  ;;  %v6451_v5 = vld [vmem:[#allocation5 + $0x208] sm:$0xff]  }
 0x1df   : > { %5780 = vmatpush3.bf16.msra.mxu1 %v6400_v13  ;;  %5761 = vmatprep.subr.bf16.mxu0 %v6813_v2  ;;  %v2848_v10 = vrot.slane %v2846_v60, 1 }
 0x1e0   : > { %5781 = vmatprep.subr.bf16.mxu1 %v6813_v2 }
 0x1e2   : > { %5762 = vmatpush3.bf16.msra.mxu0 %v6401_v14 }
 0x1e3   : > { %5782 = vmatpush3.bf16.msra.mxu1 %v6402_v15  ;;  %5763 = vmatprep.subr.bf16.mxu0 %v6813_v2  ;;  %v6429_v15 = vld [vmem:[#allocation5 + $0x178] sm:$0xff]  }
 0x1e4   : > { %5783 = vmatprep.subr.bf16.mxu1 %v6813_v2 }
 0x1e6   : > { %5764 = vmatpush3.bf16.msra.mxu0 %v6403_v16 }
 0x1e7   : > { %5784 = vmatpush3.bf16.msra.mxu1 %v6404_v17  ;;  %5765 = vmatprep.subr.bf16.mxu0 %v6813_v2 }
 0x1e8   : > { %5785 = vmatprep.subr.bf16.mxu1 %v6813_v2 }
 0x1ea   : > { %5766 = vmatpush3.bf16.msra.mxu0 %v6405_v18  ;;  %v2849_v18 = vor.u32 %v2848_v10, %v2844_v9  ;;  %v6455_v9 = vld [vmem:[#allocation5 + $0x218] sm:$0xff]  }
 0x1eb   : > { %5786 = vmatpush3.bf16.msra.mxu1 %v6406_v19  ;;  %5767 = vmatprep.subr.bf16.mxu0 %v6813_v2  ;;  %v2960_v19 = vrot.slane %v4882_v12, 1  ;;  %v6456_v10 = vld [vmem:[#allocation5 + $0x58] sm:$0xff]   ;;  %v6458_v12 = vld [vmem:[#allocation5 + $0x60] sm:$0xff]  }
 0x1ec   : > { %v1079_v22 = vpop.f32.mrb[12].mxu0  ;;  %5787 = vmatprep.subr.bf16.mxu1 %v6813_v2 }
 0x1ed   : > { %v1085_v23 = vadd.f32 %v1079_v22, %v974_v63  ;;  %v1200_v24 = vpop.f32.mrb[12].mxu1  ;;  %v5495_v25 = vpop.f32.mrb[13].mxu0  ;;  %v6426_v63 = vld [vmem:[#allocation5 + $0x130] sm:$0xff]  }
 0x1ee   : > { %v5515_v26 = vpop.f32.mrb[13].mxu1  ;;  %v1082_v27 = vpop.f32.mrb[14].mxu0  ;;  %5768 = vmatpush3.bf16.msra.mxu0 %v6407_v20  ;;  %v6432_v20 = vld [vmem:[#allocation5 + $0x180] sm:$0xff]  }
 0x1ef   : > { %v1206_v30 = vadd.f32 %v1200_v24, %v1085_v23  ;;  %v1203_v31 = vpop.f32.mrb[14].mxu1  ;;  %5788 = vmatpush3.bf16.msra.mxu1 %v6408_v21  ;;  %v5496_v32 = vpop.f32.mrb[15].mxu0  ;;  %5769 = vmatprep.subr.bf16.mxu0 %v6813_v2  ;;  %v6433_v23 = vld [vmem:[#allocation5 + $0x1c0] sm:$0xff]   ;;  %v6434_v26 = vld [vmem:[#allocation5 + $0x188] sm:$0xff]  }
 0x1f0   : > { %v5516_v34 = vpop.f32.mrb[15].mxu1  ;;  %5789 = vmatprep.subr.bf16.mxu1 %v6813_v2  ;;  %v1327_v27 = vld [vmem:[#allocation9] sm:$0x1]  ;;  %v1336_v31 = vld [vmem:[#allocation11] sm:$0x1] }
 0x1f1   : > { %v6436_v34 = vld [vmem:[#allocation5 + $0x190] sm:$0xff]  }
 0x1f2   : > { %5770 = vmatpush3.bf16.msra.mxu0 %v6409_v28 }
 0x1f3   : > { %5790 = vmatpush3.bf16.msra.mxu1 %v6410_v33  ;;  %5771 = vmatprep.subr.bf16.mxu0 %v6813_v2 }
 0x1f4   : > { %5791 = vmatprep.subr.bf16.mxu1 %v6813_v2 }
 0x1f6   : > { %5772 = vmatpush3.bf16.msra.mxu0 %v6411_v36 }
 0x1f7   : > { %5792 = vmatpush3.bf16.msra.mxu1 %v6412_v37  ;;  %5797 = vmatprep.subr.bf16.mxu0 %v6813_v2  ;;  %v6438_v37 = vld [vmem:[#allocation5 + $0x198] sm:$0xff]  }
 0x1f8   : > { %5817 = vmatprep.subr.bf16.mxu1 %v6813_v2 }
 0x1f9   : > { %5774 = vmatmul.mubr.bf16.vlgmr.msra.gmra.mrb[40].mxu0 %v2623_v38  ;;  %v6439_v38 = vld [vmem:[#allocation5 + $0x1d8] sm:$0xff]  }
 0x1fa   : > { %5794 = vmatmul.mubr.bf16.vlgmr.msra.gmra.mrb[40].mxu1 %v4861_v40  ;;  %5798 = vmatpush3.bf16.msra.mxu0 %v6414_v39  ;;  %v6440_v39 = vld [vmem:[#allocation5 + $0x1a0] sm:$0xff]  }
 0x1fb   : > { %5818 = vmatpush3.bf16.msra.mxu1 %v6415_v41  ;;  %5799 = vmatprep.subr.bf16.mxu0 %v6813_v2  ;;  %v6441_v40 = vld [vmem:[#allocation5 + $0x1e0] sm:$0xff]  }
 0x1fc   : > { %5819 = vmatprep.subr.bf16.mxu1 %v6813_v2  ;;  %5813 = vmatprep.mubr.msk.bf16.mxu0 %vm6814_vm0, %v6813_v2  ;;  %v4902_v41 = vld [vmem:[%s7114_s8 + $0x20] sm:$0xf] }
 0x1fd   : > { %5833 = vmatprep.mubr.msk.bf16.mxu1 %vm6814_vm0, %v6813_v2 }
 0x1fe   : > { %5800 = vmatpush3.bf16.msra.mxu0 %v6416_v42  ;;  %v7424_v42 = vld [vmem:[%s7114_s8 + $0x24] sm:$0x1] }
 0x1ff   : > { %5820 = vmatpush3.bf16.msra.mxu1 %v6417_v43  ;;  %5801 = vmatprep.subr.bf16.mxu0 %v6813_v2  ;;  %v6442_v43 = vld [vmem:[#allocation5 + $0x1a8] sm:$0xff]  }
 0x200   : > { %5821 = vmatprep.subr.bf16.mxu1 %v6813_v2 }
 0x202   : > { %5802 = vmatpush3.bf16.msra.mxu0 %v6418_v44  ;;  %v4904_v44 = vcombine.low %v4902_v41, %v7424_v42  ;;  %v6469_v41 = vld [vmem:[#allocation5 + $0x8] sm:$0xff]  }
 0x203   : > { %5822 = vmatpush3.bf16.msra.mxu1 %v6419_v45  ;;  %5803 = vmatprep.subr.bf16.mxu0 %v6813_v2  ;;  %v6443_v45 = vld [vmem:[#allocation5 + $0x1e8] sm:$0xff]  }
 0x204   : > { %5823 = vmatprep.subr.bf16.mxu1 %v6813_v2 }
 0x206   : > { %5804 = vmatpush3.bf16.msra.mxu0 %v6420_v46 }
 0x207   : > { %5824 = vmatpush3.bf16.msra.mxu1 %v6421_v47  ;;  %5805 = vmatprep.subr.bf16.mxu0 %v6813_v2 }
 0x208   : > { %5825 = vmatprep.subr.bf16.mxu1 %v6813_v2 }
 0x20a   : > { %5806 = vmatpush3.bf16.msra.mxu0 %v6422_v48 }
 0x20b   : > { %5826 = vmatpush3.bf16.msra.mxu1 %v6423_v51  ;;  %5807 = vmatprep.subr.bf16.mxu0 %v6813_v2 }
 0x20c   : > { %v1312_v56 = vpop.f32.mrb[16].mxu0  ;;  %5827 = vmatprep.subr.bf16.mxu1 %v6813_v2 }
 0x20d   : > { %v1318_v57 = vadd.f32 %v1312_v56, %v1206_v30  ;;  %v7400_v58 = vpop.f32.mrb[16].mxu1  ;;  %v5535_v59 = vpop.f32.mrb[17].mxu0  ;;  %v6435_v30 = vld [vmem:[#allocation5 + $0x1c8] sm:$0xff]  }
 0x20e   : > { %v5555_v61 = vpop.f32.mrb[17].mxu1  ;;  %v1315_v62 = vpop.f32.mrb[18].mxu0  ;;  %5808 = vmatpush3.bf16.msra.mxu0 %v6424_v53  ;;  %v3187_v53 = vshll.u32 %v4904_v44, 16  ;;  %v6445_v59 = vld [vmem:[#allocation5 + $0x1f0] sm:$0xff]  }
 0x20f   : > { %v1325_v0 = vadd.f32 %v7397_v55, %v1318_v57  ;;  %v1478_v1 = vpop.f32.mrb[18].mxu1  ;;  %5828 = vmatpush3.bf16.msra.mxu1 %v6425_v54  ;;  %v5536_v3 = vpop.f32.mrb[19].mxu0  ;;  %5809 = vmatprep.subr.bf16.mxu0 %v6813_v2  ;;  %v3185_v61 = vshrl.u32 %v4904_v44, 16  ;;  %v6472_v44 = vld [vmem:[#allocation5 + $0x90] sm:$0xff]  }
 0x210   : > { %v5556_v6 = vpop.f32.mrb[19].mxu1  ;;  %5829 = vmatprep.subr.bf16.mxu1 %v6813_v2  ;;  %v3189_v62 = vrot.slane %v3187_v53, 1  ;;  %v6449_v3 = vld [vmem:[#allocation5 + $0x200] sm:$0xff]  }
 0x211   : > { %1326 = vst [vmem:[%s7097_s9] sm:$0xff] %v1325_v0  ;;  %v1328_v7 = vrot.slane %v1325_v0, 4  ;;  %v1337_v8 = vmul.f32 %v1325_v0, %v1325_v0  ;;  %v6452_v6 = vld [vmem:[#allocation5 + $0x48] sm:$0xff]  }
 0x212   : > { %5810 = vmatpush3.bf16.msra.mxu0 %v6426_v63  ;;  %v6447_v63 = vld [vmem:[#allocation5 + $0x1f8] sm:$0xff]   ;;  %v3190_v1 = vor.u32 %v3189_v62, %v3185_v61  ;;  %v6480_v62 = vld [vmem:[#allocation5 + $0xb0] sm:$0xff]  }
 0x213   : > { %v1329_v13 = vadd.f32 %v1328_v7, %v1325_v0  ;;  %v1338_v14 = vrot.slane %v1337_v8, 4  ;;  %5830 = vmatpush3.bf16.msra.mxu1 %v6427_v4  ;;  %5811 = vmatprep.subr.bf16.mxu0 %v6813_v2  ;;  %v4893_v0 = vld [vmem:[%s7114_s8 + $0x20] sm:$0xf]  ;;  %v6453_v7 = vld [vmem:[#allocation5 + $0x210] sm:$0xff]  }
 0x214   : > { %5831 = vmatprep.subr.bf16.mxu1 %v6813_v2  ;;  %v6450_v4 = vld [vmem:[#allocation5 + $0x40] sm:$0xff]  }
 0x215   : > { %v1330_v16 = vrot.slane %v1329_v13, 2  ;;  %v1339_v17 = vadd.f32 %v1338_v14, %v1337_v8  ;;  %v6454_v8 = vld [vmem:[#allocation5 + $0x50] sm:$0xff]   ;;  %v7453_v14 = vld [vmem:[%s7114_s8 + $0x1c] sm:$0x1] }
 0x216   : > { %5812 = vmatpush3.bf16.msra.mxu0 %v6428_v11  ;;  %v6457_v11 = vld [vmem:[#allocation5 + $0x220] sm:$0xff]  }
 0x217   : > { %v1331_v21 = vadd.f32 %v1330_v16, %v1329_v13  ;;  %v1340_v22 = vrot.slane %v1339_v17, 2  ;;  %5832 = vmatpush3.bf16.msra.mxu1 %v6429_v15  ;;  %5837 = vmatprep.subr.bf16.mxu0 %v6813_v2  ;;  %v7450_v13 = vld [vmem:[%s7114_s8 + $0x18] sm:$0xf]  ;;  %v6459_v15 = vld [vmem:[#allocation5 + $0x228] sm:$0xff]  }
 0x218   : > { %5857 = vmatprep.subr.bf16.mxu1 %v6813_v2  ;;  %v4926_v16 = vcombine.low %v7450_v13, %v7453_v14 }
 0x219   : > { %v1332_v24 = vrot.slane %v1331_v21, 1  ;;  %v1341_v25 = vadd.f32 %v1340_v22, %v1339_v17  ;;  %5814 = vmatmul.mubr.bf16.vlgmr.msra.gmra.mrb[44].mxu0 %v2849_v18  ;;  %v6460_v17 = vld [vmem:[#allocation5 + $0x68] sm:$0xff]  }
 0x21a   : > { %5834 = vmatmul.mubr.bf16.vlgmr.msra.gmra.mrb[44].mxu1 %v2960_v19  ;;  %5838 = vmatpush3.bf16.msra.mxu0 %v6432_v20 }
 0x21b   : > { %v1333_v28 = vadd.f32 %v1332_v24, %v1331_v21  ;;  %v1342_v29 = vrot.slane %v1341_v25, 1  ;;  %5858 = vmatpush3.bf16.msra.mxu1 %v6433_v23  ;;  %5839 = vmatprep.subr.bf16.mxu0 %v6813_v2  ;;  %v6461_v24 = vld [vmem:[#allocation5 + $0x230] sm:$0xff]  }
 0x21c   : > { %5859 = vmatprep.subr.bf16.mxu1 %v6813_v2  ;;  %5853 = vmatprep.mubr.msk.bf16.mxu0 %vm6814_vm0, %v6813_v2 }
 0x21d   : > { %v1343_v32 = vadd.f32 %v1342_v29, %v1341_v25  ;;  %5873 = vmatprep.mubr.msk.bf16.mxu1 %vm6814_vm0, %v6813_v2  ;;  %v1334_v33 = vadd.f32 %v1333_v28, %v1327_v27  ;;  %v4913_v25 = vld [vmem:[%s7114_s8 + $0x20] sm:$0xe] }
 0x21e   : > { %5840 = vmatpush3.bf16.msra.mxu0 %v6434_v26  ;;  %v3456_v26 = vshll.u32 %v4926_v16, 16 }
 0x21f   : > { %5860 = vmatpush3.bf16.msra.mxu1 %v6435_v30  ;;  %5841 = vmatprep.subr.bf16.mxu0 %v6813_v2  ;;  %1335 = vst [vmem:[#allocation9] sm:$0x1] %v1334_v33  ;;  %v1344_v36 = vadd.f32 %v1343_v32, %v1336_v31  ;;  %v6462_v30 = vld [vmem:[#allocation5 + $0x70] sm:$0xff]   ;;  %v4914_v32 = vcombine.low %v4913_v25, %v7424_v42  ;;  %v6463_v33 = vld [vmem:[#allocation5 + $0x238] sm:$0xff]   ;;  %v6470_v42 = vld [vmem:[#allocation5 + $0x88] sm:$0xff]  }
 0x220   : > { %5861 = vmatprep.subr.bf16.mxu1 %v6813_v2 }
 0x221   : > { %1345 = vst [vmem:[#allocation11] sm:$0x1] %v1344_v36  ;;  %v6464_v36 = vld [vmem:[#allocation5 + $0x78] sm:$0xff]  }
 0x222   : > { %5842 = vmatpush3.bf16.msra.mxu0 %v6436_v34  ;;  %v3454_v34 = vshrl.u32 %v4926_v16, 16  ;;  %v4962_v16 = vld [vmem:[%s7114_s8 + $0x20] sm:$0xf] }
 0x223   : > { %5862 = vmatpush3.bf16.msra.mxu1 %v6437_v35  ;;  %5843 = vmatprep.subr.bf16.mxu0 %v6813_v2  ;;  %v3458_v35 = vrot.slane %v3456_v26, 1 }
 0x224   : > { %5863 = vmatprep.subr.bf16.mxu1 %v6813_v2 }
 0x226   : > { %5844 = vmatpush3.bf16.msra.mxu0 %v6438_v37  ;;  %v3301_v37 = vrot.slane %v4914_v32, 1  ;;  %v6497_v32 = vld [vmem:[#allocation5 + $0x130] sm:$0xff]  }
 0x227   : > { %5864 = vmatpush3.bf16.msra.mxu1 %v6439_v38  ;;  %5845 = vmatprep.subr.bf16.mxu0 %v6813_v2  ;;  %v3459_v38 = vor.u32 %v3458_v35, %v3454_v34  ;;  %v6498_v35 = vld [vmem:[#allocation5 + $0xf8] sm:$0xff]  }
 0x228   : > { %5865 = vmatprep.subr.bf16.mxu1 %v6813_v2 }
 0x22a   : > { %5846 = vmatpush3.bf16.msra.mxu0 %v6440_v39  ;;  %v6467_v39 = vld [vmem:[#allocation5] sm:$0xff]  }
 0x22b   : > { %5866 = vmatpush3.bf16.msra.mxu1 %v6441_v40  ;;  %5847 = vmatprep.subr.bf16.mxu0 %v6813_v2  ;;  %v6468_v40 = vld [vmem:[#allocation5 + $0x80] sm:$0xff]  }
 0x22c   : > { %v1563_v46 = vpop.f32.mrb[20].mxu0  ;;  %5867 = vmatprep.subr.bf16.mxu1 %v6813_v2 }
 0x22d   : > { %v1564_v47 = vadd.f32 %v1563_v46, %v7400_v58  ;;  %v1673_v48 = vpop.f32.mrb[20].mxu1  ;;  %v5575_v49 = vpop.f32.mrb[21].mxu0  ;;  %v6446_v58 = vld [vmem:[#allocation5 + $0x1b8] sm:$0xff]  }
 0x22e   : > { %v5595_v50 = vpop.f32.mrb[21].mxu1  ;;  %v1566_v51 = vpop.f32.mrb[22].mxu0  ;;  %5848 = vmatpush3.bf16.msra.mxu0 %v6442_v43  ;;  %v6471_v43 = vld [vmem:[#allocation5 + $0x10] sm:$0xff]   ;;  %v6474_v46 = vld [vmem:[#allocation5 + $0x98] sm:$0xff]   ;;  %v6477_v49 = vld [vmem:[#allocation5 + $0x28] sm:$0xff]  }
 0x22f   : > { %v1679_v54 = vadd.f32 %v1673_v48, %v1564_v47  ;;  %v1676_v56 = vpop.f32.mrb[22].mxu1  ;;  %5868 = vmatpush3.bf16.msra.mxu1 %v6443_v45  ;;  %v5576_v57 = vpop.f32.mrb[23].mxu0  ;;  %5849 = vmatprep.subr.bf16.mxu0 %v6813_v2  ;;  %v6473_v45 = vld [vmem:[#allocation5 + $0x18] sm:$0xff]   ;;  %v6475_v47 = vld [vmem:[#allocation5 + $0x20] sm:$0xff]   ;;  %v6478_v50 = vld [vmem:[#allocation5 + $0xa8] sm:$0xff]  }
 0x230   : > { %v5596_v60 = vpop.f32.mrb[23].mxu1  ;;  %5869 = vmatprep.subr.bf16.mxu1 %v6813_v2  ;;  %v6476_v48 = vld [vmem:[#allocation5 + $0xa0] sm:$0xff]  }
 0x232   : > { %5850 = vmatpush3.bf16.msra.mxu0 %v6444_v52 }
 0x233   : > { %5870 = vmatpush3.bf16.msra.mxu1 %v6445_v59  ;;  %5851 = vmatprep.subr.bf16.mxu0 %v6813_v2  ;;  %v6479_v59 = vld [vmem:[#allocation5 + $0x30] sm:$0xff]  }
 0x234   : > { %5871 = vmatprep.subr.bf16.mxu1 %v6813_v2 }
 0x236   : > { %5852 = vmatpush3.bf16.msra.mxu0 %v6446_v58 }
 0x237   : > { %5872 = vmatpush3.bf16.msra.mxu1 %v6447_v63  ;;  %5877 = vmatprep.subr.bf16.mxu0 %v6813_v2  ;;  %v4943_v63 = vld [vmem:[%s7114_s8 + $0x18] sm:$0xe] }
 0x238   : > { %5897 = vmatprep.subr.bf16.mxu1 %v6813_v2 }
 0x239   : > { %5854 = vmatmul.mubr.bf16.vlgmr.msra.gmra.mrb[48].mxu0 %v4893_v0 }
 0x23a   : > { %5874 = vmatmul.mubr.bf16.vlgmr.msra.gmra.mrb[48].mxu1 %v3190_v1  ;;  %5878 = vmatpush3.bf16.msra.mxu0 %v6449_v3  ;;  %v6481_v1 = vld [vmem:[#allocation5 + $0x38] sm:$0xff]   ;;  %v4944_v3 = vcombine.low %v4943_v63, %v7453_v14  ;;  %v6492_v14 = vld [vmem:[#allocation5 + $0xe0] sm:$0xff]  }
 0x23b   : > { %5898 = vmatpush3.bf16.msra.mxu1 %v6450_v4  ;;  %5879 = vmatprep.subr.bf16.mxu0 %v6813_v2  ;;  %v6482_v4 = vld [vmem:[#allocation5 + $0xb8] sm:$0xff]  }
 0x23c   : > { %5899 = vmatprep.subr.bf16.mxu1 %v6813_v2  ;;  %5893 = vmatprep.mubr.msk.bf16.mxu0 %vm6814_vm0, %v6813_v2 }
 0x23d   : > { %5913 = vmatprep.mubr.msk.bf16.mxu1 %vm6814_vm0, %v6813_v2 }
 0x23e   : > { %5880 = vmatpush3.bf16.msra.mxu0 %v6451_v5  ;;  %v3657_v5 = vrot.slane %v4944_v3, 1  ;;  %v6509_v3 = vld [vmem:[#allocation5 + $0x160] sm:$0xff]  }
 0x23f   : > { %5900 = vmatpush3.bf16.msra.mxu1 %v6452_v6  ;;  %5881 = vmatprep.subr.bf16.mxu0 %v6813_v2  ;;  %v6484_v6 = vld [vmem:[#allocation5 + $0xc0] sm:$0xff]  }
 0x240   : > { %5901 = vmatprep.subr.bf16.mxu1 %v6813_v2 }
 0x242   : > { %5882 = vmatpush3.bf16.msra.mxu0 %v6453_v7  ;;  %v6485_v7 = vld [vmem:[#allocation5 + $0x100] sm:$0xff]  }
 0x243   : > { %5902 = vmatpush3.bf16.msra.mxu1 %v6454_v8  ;;  %5883 = vmatprep.subr.bf16.mxu0 %v6813_v2  ;;  %v6486_v8 = vld [vmem:[#allocation5 + $0xc8] sm:$0xff]  }
 0x244   : > { %5903 = vmatprep.subr.bf16.mxu1 %v6813_v2 }
 0x246   : > { %5884 = vmatpush3.bf16.msra.mxu0 %v6455_v9  ;;  %v6487_v9 = vld [vmem:[#allocation5 + $0x108] sm:$0xff]  }
 0x247   : > { %5904 = vmatpush3.bf16.msra.mxu1 %v6456_v10  ;;  %5885 = vmatprep.subr.bf16.mxu0 %v6813_v2  ;;  %v6488_v10 = vld [vmem:[#allocation5 + $0xd0] sm:$0xff]  }
 0x248   : > { %5905 = vmatprep.subr.bf16.mxu1 %v6813_v2 }
 0x24a   : > { %5886 = vmatpush3.bf16.msra.mxu0 %v6457_v11  ;;  %v6489_v11 = vld [vmem:[#allocation5 + $0x110] sm:$0xff]  }
 0x24b   : > { %5906 = vmatpush3.bf16.msra.mxu1 %v6458_v12  ;;  %5887 = vmatprep.subr.bf16.mxu0 %v6813_v2  ;;  %v6490_v12 = vld [vmem:[#allocation5 + $0xd8] sm:$0xff]  }
 0x24c   : > { %v1779_v18 = vpop.f32.mrb[24].mxu0  ;;  %5907 = vmatprep.subr.bf16.mxu1 %v6813_v2 }
 0x24d   : > { %v1785_v19 = vadd.f32 %v1779_v18, %v1679_v54  ;;  %v1899_v20 = vpop.f32.mrb[24].mxu1  ;;  %v5615_v21 = vpop.f32.mrb[25].mxu0  ;;  %v6494_v18 = vld [vmem:[#allocation5 + $0xe8] sm:$0xff]  }
 0x24e   : > { %v5635_v22 = vpop.f32.mrb[25].mxu1  ;;  %v1782_v23 = vpop.f32.mrb[26].mxu0  ;;  %5888 = vmatpush3.bf16.msra.mxu0 %v6459_v15  ;;  %v6493_v15 = vld [vmem:[#allocation5 + $0x120] sm:$0xff]  }
 0x24f   : > { %v1905_v27 = vadd.f32 %v1899_v20, %v1785_v19  ;;  %v1902_v28 = vpop.f32.mrb[26].mxu1  ;;  %5908 = vmatpush3.bf16.msra.mxu1 %v6460_v17  ;;  %v5616_v29 = vpop.f32.mrb[27].mxu0  ;;  %5889 = vmatprep.subr.bf16.mxu0 %v6813_v2  ;;  %v7504_v17 = vld [vmem:[%s7114_s8 + $0x24] sm:$0x1]  ;;  %v6495_v20 = vld [vmem:[#allocation5 + $0x128] sm:$0xff]  }
 0x250   : > { %v5636_v31 = vpop.f32.mrb[27].mxu1  ;;  %5909 = vmatprep.subr.bf16.mxu1 %v6813_v2  ;;  %v4964_v19 = vcombine.low %v4962_v16, %v7504_v17 }
 0x252   : > { %5890 = vmatpush3.bf16.msra.mxu0 %v6461_v24  ;;  %v3880_v28 = vshll.u32 %v4964_v19, 16 }
 0x253   : > { %5910 = vmatpush3.bf16.msra.mxu1 %v6462_v30  ;;  %5891 = vmatprep.subr.bf16.mxu0 %v6813_v2 }
 0x254   : > { %5911 = vmatprep.subr.bf16.mxu1 %v6813_v2 }
 0x256   : > { %5892 = vmatpush3.bf16.msra.mxu0 %v6463_v33 }
 0x257   : > { %5912 = vmatpush3.bf16.msra.mxu1 %v6464_v36  ;;  %5917 = vmatprep.subr.bf16.mxu0 %v6813_v2  ;;  %v3878_v36 = vshrl.u32 %v4964_v19, 16 }
 0x258   : > { %5937 = vmatprep.subr.bf16.mxu1 %v6813_v2 }
 0x259   : > { %5894 = vmatmul.mubr.bf16.vlgmr.msra.gmra.mrb[52].mxu0 %v3301_v37  ;;  %v3882_v37 = vrot.slane %v3880_v28, 1  ;;  %v6522_v28 = vld [vmem:[#allocation5 + $0x1d0] sm:$0xff]  }
 0x25a   : > { %5914 = vmatmul.mubr.bf16.vlgmr.msra.gmra.mrb[52].mxu1 %v3459_v38  ;;  %5918 = vmatpush3.bf16.msra.mxu0 %v6467_v39 }
 0x25b   : > { %5938 = vmatpush3.bf16.msra.mxu1 %v6468_v40  ;;  %5919 = vmatprep.subr.bf16.mxu0 %v6813_v2  ;;  %v6499_v40 = vld [vmem:[#allocation5 + $0x138] sm:$0xff]  }
 0x25c   : > { %5939 = vmatprep.subr.bf16.mxu1 %v6813_v2  ;;  %5933 = vmatprep.mubr.msk.bf16.mxu0 %vm6814_vm0, %v6813_v2 }
 0x25d   : > { %5953 = vmatprep.mubr.msk.bf16.mxu1 %vm6814_vm0, %v6813_v2 }
 0x25e   : > { %5920 = vmatpush3.bf16.msra.mxu0 %v6469_v41 }
 0x25f   : > { %5940 = vmatpush3.bf16.msra.mxu1 %v6470_v42  ;;  %5921 = vmatprep.subr.bf16.mxu0 %v6813_v2 }
 0x260   : > { %5941 = vmatprep.subr.bf16.mxu1 %v6813_v2 }
 0x262   : > { %5922 = vmatpush3.bf16.msra.mxu0 %v6471_v43  ;;  %v4953_v43 = vld [vmem:[%s7114_s8 + $0x20] sm:$0xf] }
 0x263   : > { %5942 = vmatpush3.bf16.msra.mxu1 %v6472_v44  ;;  %5923 = vmatprep.subr.bf16.mxu0 %v6813_v2  ;;  %v3883_v44 = vor.u32 %v3882_v37, %v3878_v36  ;;  %v6528_v37 = vld [vmem:[#allocation5 + $0x1e8] sm:$0xff]  }
 0x264   : > { %5943 = vmatprep.subr.bf16.mxu1 %v6813_v2 }
 0x266   : > { %5924 = vmatpush3.bf16.msra.mxu0 %v6473_v45  ;;  %v6501_v45 = vld [vmem:[#allocation5 + $0x140] sm:$0xff]  }
 0x267   : > { %5944 = vmatpush3.bf16.msra.mxu1 %v6474_v46  ;;  %5925 = vmatprep.subr.bf16.mxu0 %v6813_v2 }
 0x268   : > { %5945 = vmatprep.subr.bf16.mxu1 %v6813_v2 }
 0x26a   : > { %5926 = vmatpush3.bf16.msra.mxu0 %v6475_v47  ;;  %v6502_v47 = vld [vmem:[#allocation5 + $0x180] sm:$0xff]  }
 0x26b   : > { %5946 = vmatpush3.bf16.msra.mxu1 %v6476_v48  ;;  %5927 = vmatprep.subr.bf16.mxu0 %v6813_v2 }
 0x26c   : > { %v2010_v51 = vpop.f32.mrb[28].mxu0  ;;  %5947 = vmatprep.subr.bf16.mxu1 %v6813_v2 }
 0x26d   : > { %v2016_v52 = vadd.f32 %v2010_v51, %v1905_v27  ;;  %v2120_v53 = vpop.f32.mrb[28].mxu1  ;;  %v5655_v54 = vpop.f32.mrb[29].mxu0  ;;  %v6496_v27 = vld [vmem:[#allocation5 + $0xf0] sm:$0xff]  }
 0x26e   : > { %v5675_v56 = vpop.f32.mrb[29].mxu1  ;;  %v2013_v57 = vpop.f32.mrb[30].mxu0  ;;  %5928 = vmatpush3.bf16.msra.mxu0 %v6477_v49 }
 0x26f   : > { %v2126_v60 = vadd.f32 %v2120_v53, %v2016_v52  ;;  %v2123_v58 = vpop.f32.mrb[30].mxu1  ;;  %5948 = vmatpush3.bf16.msra.mxu1 %v6478_v50  ;;  %v5656_v61 = vpop.f32.mrb[31].mxu0  ;;  %5929 = vmatprep.subr.bf16.mxu0 %v6813_v2  ;;  %v6503_v50 = vld [vmem:[#allocation5 + $0x148] sm:$0xff]   ;;  %v6505_v57 = vld [vmem:[#allocation5 + $0x150] sm:$0xff]  }
 0x270   : > { %v5676_v0 = vpop.f32.mrb[31].mxu1  ;;  %5949 = vmatprep.subr.bf16.mxu1 %v6813_v2  ;;  %v6504_v53 = vld [vmem:[#allocation5 + $0x188] sm:$0xff]   ;;  %v6506_v58 = vld [vmem:[#allocation5 + $0x190] sm:$0xff]  }
 0x271   : > { %v6507_v0 = vld [vmem:[#allocation5 + $0x158] sm:$0xff]  }
 0x272   : > { %5930 = vmatpush3.bf16.msra.mxu0 %v6479_v59  ;;  %v2361_v59 = vld [vmem:[#allocation9] sm:$0x1] }
 0x273   : > { %5950 = vmatpush3.bf16.msra.mxu1 %v6480_v62  ;;  %5931 = vmatprep.subr.bf16.mxu0 %v6813_v2  ;;  %v2370_v62 = vld [vmem:[#allocation11] sm:$0x1] }
 0x274   : > { %5951 = vmatprep.subr.bf16.mxu1 %v6813_v2 }
 0x276   : > { %5932 = vmatpush3.bf16.msra.mxu0 %v6481_v1  ;;  %v6508_v1 = vld [vmem:[#allocation5 + $0x198] sm:$0xff]  }
 0x277   : > { %5952 = vmatpush3.bf16.msra.mxu1 %v6482_v4  ;;  %5957 = vmatprep.subr.bf16.mxu0 %v6813_v2  ;;  %v6510_v4 = vld [vmem:[#allocation5 + $0x1a0] sm:$0xff]  }
 0x278   : > { %5977 = vmatprep.subr.bf16.mxu1 %v6813_v2 }
 0x279   : > { %5934 = vmatmul.mubr.bf16.vlgmr.msra.gmra.mrb[56].mxu0 %v7450_v13  ;;  %v6491_v13 = vld [vmem:[#allocation5 + $0x118] sm:$0xff]  }
 0x27a   : > { %5954 = vmatmul.mubr.bf16.vlgmr.msra.gmra.mrb[56].mxu1 %v3657_v5  ;;  %5958 = vmatpush3.bf16.msra.mxu0 %v6484_v6  ;;  %v6511_v5 = vld [vmem:[#allocation5 + $0x168] sm:$0xff]  }
 0x27b   : > { %5978 = vmatpush3.bf16.msra.mxu1 %v6485_v7  ;;  %5959 = vmatprep.subr.bf16.mxu0 %v6813_v2  ;;  %v6512_v6 = vld [vmem:[#allocation5 + $0x1a8] sm:$0xff]  }
 0x27c   : > { %5979 = vmatprep.subr.bf16.mxu1 %v6813_v2  ;;  %5973 = vmatprep.mubr.msk.bf16.mxu0 %vm6814_vm0, %v6813_v2 }
 0x27d   : > { %5993 = vmatprep.mubr.msk.bf16.mxu1 %vm6814_vm0, %v6813_v2 }
 0x27e   : > { %5960 = vmatpush3.bf16.msra.mxu0 %v6486_v8 }
 0x27f   : > { %5980 = vmatpush3.bf16.msra.mxu1 %v6487_v9  ;;  %5961 = vmatprep.subr.bf16.mxu0 %v6813_v2 }
 0x280   : > { %5981 = vmatprep.subr.bf16.mxu1 %v6813_v2 }
 0x282   : > { %5962 = vmatpush3.bf16.msra.mxu0 %v6488_v10 }
 0x283   : > { %5982 = vmatpush3.bf16.msra.mxu1 %v6489_v11  ;;  %5963 = vmatprep.subr.bf16.mxu0 %v6813_v2 }
 0x284   : > { %5983 = vmatprep.subr.bf16.mxu1 %v6813_v2 }
 0x286   : > { %5964 = vmatpush3.bf16.msra.mxu0 %v6490_v12 }
 0x287   : > { %5984 = vmatpush3.bf16.msra.mxu1 %v6491_v13  ;;  %5965 = vmatprep.subr.bf16.mxu0 %v6813_v2  ;;  %v6513_v13 = vld [vmem:[#allocation5 + $0x170] sm:$0xff]  }
 0x288   : > { %5985 = vmatprep.subr.bf16.mxu1 %v6813_v2 }
 0x28a   : > { %5966 = vmatpush3.bf16.msra.mxu0 %v6492_v14  ;;  %v4973_v14 = vld [vmem:[%s7114_s8 + $0x20] sm:$0xe] }
 0x28b   : > { %5986 = vmatpush3.bf16.msra.mxu1 %v6493_v15  ;;  %5967 = vmatprep.subr.bf16.mxu0 %v6813_v2 }
 0x28c   : > { %v2240_v21 = vpop.f32.mrb[32].mxu0  ;;  %5987 = vmatprep.subr.bf16.mxu1 %v6813_v2 }
 0x28d   : > { %v2246_v22 = vadd.f32 %v2240_v21, %v2126_v60  ;;  %v2351_v23 = vpop.f32.mrb[32].mxu1  ;;  %v5695_v24 = vpop.f32.mrb[33].mxu0  ;;  %v6515_v21 = vld [vmem:[#allocation5 + $0x178] sm:$0xff]  }
 0x28e   : > { %v5715_v25 = vpop.f32.mrb[33].mxu1  ;;  %v2243_v26 = vpop.f32.mrb[34].mxu0  ;;  %5968 = vmatpush3.bf16.msra.mxu0 %v6494_v18  ;;  %v6514_v18 = vld [vmem:[#allocation5 + $0x1b0] sm:$0xff]   ;;  %v6518_v24 = vld [vmem:[#allocation5 + $0x1c0] sm:$0xff]  }
 0x28f   : > { %v2357_v29 = vadd.f32 %v2351_v23, %v2246_v22  ;;  %v2354_v30 = vpop.f32.mrb[34].mxu1  ;;  %5988 = vmatpush3.bf16.msra.mxu1 %v6495_v20  ;;  %v5696_v31 = vpop.f32.mrb[35].mxu0  ;;  %5969 = vmatprep.subr.bf16.mxu0 %v6813_v2  ;;  %v4974_v20 = vcombine.low %v4973_v14, %v7504_v17  ;;  %v6516_v22 = vld [vmem:[#allocation5 + $0x1b8] sm:$0xff]   ;;  %v4985_v25 = vld [vmem:[%s7114_s8 + $0x28] sm:$0xf]  ;;  %v6519_v26 = vld [vmem:[#allocation5 + $0x200] sm:$0xff]  }
 0x290   : > { %v5716_v33 = vpop.f32.mrb[35].mxu1  ;;  %5989 = vmatprep.subr.bf16.mxu1 %v6813_v2  ;;  %v6520_v17 = vld [vmem:[#allocation5 + $0x1c8] sm:$0xff]   ;;  %v6524_v30 = vld [vmem:[#allocation5 + $0x1d8] sm:$0xff]  }
 0x291   : > { %v2358_v34 = vadd.f32 %v7397_v55, %v2357_v29  ;;  %v3994_v23 = vrot.slane %v4974_v20, 1  ;;  %v6523_v29 = vld [vmem:[#allocation5 + $0x210] sm:$0xff]   ;;  %v6525_v31 = vld [vmem:[#allocation5 + $0x218] sm:$0xff]   ;;  %v4994_v33 = vld [vmem:[%s7114_s8 + $0x28] sm:$0xf] }
 0x292   : > { %5970 = vmatpush3.bf16.msra.mxu0 %v6496_v27  ;;  %v6521_v27 = vld [vmem:[#allocation5 + $0x208] sm:$0xff]  }
 0x293   : > { %4831 = vst [vmem:[%s7097_s9 + $0x8] sm:$0xff] %v2358_v34  ;;  %v2362_v38 = vrot.slane %v2358_v34, 4  ;;  %v2371_v39 = vmul.f32 %v2358_v34, %v2358_v34  ;;  %5990 = vmatpush3.bf16.msra.mxu1 %v6497_v32  ;;  %5971 = vmatprep.subr.bf16.mxu0 %v6813_v2  ;;  %v6526_v32 = vld [vmem:[#allocation5 + $0x1e0] sm:$0xff]  }
 0x294   : > { %5991 = vmatprep.subr.bf16.mxu1 %v6813_v2 }
 0x295   : > { %v2363_v41 = vadd.f32 %v2362_v38, %v2358_v34  ;;  %v2372_v42 = vrot.slane %v2371_v39, 4  ;;  %v4995_v34 = vld [vmem:[%s7114_s8 + $0x2c] sm:$0x1] }
 0x296   : > { %5972 = vmatpush3.bf16.msra.mxu0 %v6498_v35  ;;  %v6527_v35 = vld [vmem:[#allocation5 + $0x220] sm:$0xff]   ;;  %v4996_v36 = vcombine.low %v4994_v33, %v4995_v34  ;;  %v6529_v38 = vld [vmem:[#allocation5 + $0x228] sm:$0xff]  }
 0x297   : > { %v2364_v55 = vrot.slane %v2363_v41, 2  ;;  %v2373_v46 = vadd.f32 %v2372_v42, %v2371_v39  ;;  %5992 = vmatpush3.bf16.msra.mxu1 %v6499_v40  ;;  %5997 = vmatprep.subr.bf16.mxu0 %v6813_v2 }
 0x298   : > { %6017 = vmatprep.subr.bf16.mxu1 %v6813_v2 }
 0x299   : > { %v2365_v48 = vadd.f32 %v2364_v55, %v2363_v41  ;;  %v2374_v49 = vrot.slane %v2373_v46, 2  ;;  %5974 = vmatmul.mubr.bf16.vlgmr.msra.gmra.mrb[60].mxu0 %v4953_v43  ;;  %v4221_v43 = vshll.u32 %v4996_v36, 16  ;;  %v6530_v55 = vld [vmem:[#allocation5 + $0x1f0] sm:$0xff]  }
 0x29a   : > { %5994 = vmatmul.mubr.bf16.vlgmr.msra.gmra.mrb[60].mxu1 %v3883_v44  ;;  %5998 = vmatpush3.bf16.msra.mxu0 %v6501_v45 }
 0x29b   : > { %v2366_v51 = vrot.slane %v2365_v48, 1  ;;  %v2375_v52 = vadd.f32 %v2374_v49, %v2373_v46  ;;  %6018 = vmatpush3.bf16.msra.mxu1 %v6502_v47  ;;  %5999 = vmatprep.subr.bf16.mxu0 %v6813_v2  ;;  %v6531_v49 = vld [vmem:[#allocation5 + $0x230] sm:$0xff]  }
 0x29c   : > { %6019 = vmatprep.subr.bf16.mxu1 %v6813_v2  ;;  %6013 = vmatprep.mubr.msk.bf16.mxu0 %vm6814_vm0, %v6813_v2 }
 0x29d   : > { %v2367_v54 = vadd.f32 %v2366_v51, %v2365_v48  ;;  %v2376_v56 = vrot.slane %v2375_v52, 1  ;;  %6033 = vmatprep.mubr.msk.bf16.mxu1 %vm6814_vm0, %v6813_v2 }
 0x29e   : > { %6000 = vmatpush3.bf16.msra.mxu0 %v6503_v50  ;;  %v5005_v50 = vld [vmem:[%s7114_s8 + $0x28] sm:$0xe] }
 0x29f   : > { %v2377_v60 = vadd.f32 %v2376_v56, %v2375_v52  ;;  %6020 = vmatpush3.bf16.msra.mxu1 %v6504_v53  ;;  %6001 = vmatprep.subr.bf16.mxu0 %v6813_v2  ;;  %v2368_v61 = vadd.f32 %v2367_v54, %v2361_v59  ;;  %v4219_v52 = vshrl.u32 %v4996_v36, 16  ;;  %v4223_v53 = vrot.slane %v4221_v43, 1  ;;  %v6532_v54 = vld [vmem:[#allocation5 + $0x1f8] sm:$0xff]  }
 0x2a0   : > { %6021 = vmatprep.subr.bf16.mxu1 %v6813_v2  ;;  %v5006_v56 = vcombine.low %v5005_v50, %v4995_v34 }
 0x2a1   : > { %2369 = vst [vmem:[#allocation9] sm:$0x1] %v2368_v61  ;;  %v2378_v63 = vadd.f32 %v2377_v60, %v2370_v62  ;;  %v4224_v59 = vor.u32 %v4223_v53, %v4219_v52 }
 0x2a2   : > { %6002 = vmatpush3.bf16.msra.mxu0 %v6505_v57  ;;  %v6533_v57 = vld [vmem:[#allocation5 + $0x238] sm:$0xff]   ;;  %v4335_v60 = vrot.slane %v5006_v56, 1 }
 0x2a3   : > { %6022 = vmatpush3.bf16.msra.mxu1 %v6506_v58  ;;  %6003 = vmatprep.subr.bf16.mxu0 %v6813_v2  ;;  %2379 = vst [vmem:[#allocation11] sm:$0x1] %v2378_v63 }
 0x2a4   : > { %6023 = vmatprep.subr.bf16.mxu1 %v6813_v2 }
 0x2a6   : > { %6004 = vmatpush3.bf16.msra.mxu0 %v6507_v0 }
 0x2a7   : > { %6024 = vmatpush3.bf16.msra.mxu1 %v6508_v1  ;;  %6005 = vmatprep.subr.bf16.mxu0 %v6813_v2 }
 0x2a8   : > { %6025 = vmatprep.subr.bf16.mxu1 %v6813_v2 }
 0x2aa   : > { %6006 = vmatpush3.bf16.msra.mxu0 %v6509_v3 }
 0x2ab   : > { %6026 = vmatpush3.bf16.msra.mxu1 %v6510_v4  ;;  %6007 = vmatprep.subr.bf16.mxu0 %v6813_v2 }
 0x2ac   : > { %v2509_v7 = vpop.f32.mrb[36].mxu0  ;;  %6027 = vmatprep.subr.bf16.mxu1 %v6813_v2 }
 0x2ad   : > { %v2597_v8 = vpop.f32.mrb[36].mxu1  ;;  %v5735_v9 = vpop.f32.mrb[37].mxu0 }
 0x2ae   : > { %v7533_v10 = vadd.f32 %v2597_v8, %v2509_v7  ;;  %v5755_v11 = vpop.f32.mrb[37].mxu1  ;;  %v2512_v12 = vpop.f32.mrb[38].mxu0  ;;  %6008 = vmatpush3.bf16.msra.mxu0 %v6511_v5 }
 0x2af   : > { %v2600_v15 = vpop.f32.mrb[38].mxu1  ;;  %6028 = vmatpush3.bf16.msra.mxu1 %v6512_v6  ;;  %v5736_v16 = vpop.f32.mrb[39].mxu0  ;;  %6009 = vmatprep.subr.bf16.mxu0 %v6813_v2 }
 0x2b0   : > { %v5756_v19 = vpop.f32.mrb[39].mxu1  ;;  %6029 = vmatprep.subr.bf16.mxu1 %v6813_v2 }
 0x2b2   : > { %6010 = vmatpush3.bf16.msra.mxu0 %v6513_v13 }
 0x2b3   : > { %6030 = vmatpush3.bf16.msra.mxu1 %v6514_v18  ;;  %6011 = vmatprep.subr.bf16.mxu0 %v6813_v2 }
 0x2b4   : > { %6031 = vmatprep.subr.bf16.mxu1 %v6813_v2 }
 0x2b6   : > { %6012 = vmatpush3.bf16.msra.mxu0 %v6515_v21 }
 0x2b7   : > { %6032 = vmatpush3.bf16.msra.mxu1 %v6516_v22  ;;  %6037 = vmatprep.subr.bf16.mxu0 %v6813_v2 }
 0x2b8   : > { %6057 = vmatprep.subr.bf16.mxu1 %v6813_v2 }
 0x2b9   : > { %6014 = vmatmul.mubr.bf16.vlgmr.msra.gmra.mrb[64].mxu0 %v3994_v23  ;;  %v7566_v23 = vld [vmem:[#allocation7] ss:$0 sm:$0xff] }
 0x2ba   : > { %6034 = vmatmul.mubr.bf16.vlgmr.msra.gmra.mrb[64].mxu1 %v4985_v25  ;;  %6038 = vmatpush3.bf16.msra.mxu0 %v6518_v24 }
 0x2bb   : > { %6058 = vmatpush3.bf16.msra.mxu1 %v6519_v26  ;;  %6039 = vmatprep.subr.bf16.mxu0 %v6813_v2 }
 0x2bc   : > { %6059 = vmatprep.subr.bf16.mxu1 %v6813_v2  ;;  %6053 = vmatprep.mubr.msk.bf16.mxu0 %vm6814_vm0, %v6813_v2 }
 0x2bd   : > { %6073 = vmatprep.mubr.msk.bf16.mxu1 %vm6814_vm0, %v6813_v2 }
 0x2be   : > { %6040 = vmatpush3.bf16.msra.mxu0 %v6520_v17 }
 0x2bf   : > { %6060 = vmatpush3.bf16.msra.mxu1 %v6521_v27  ;;  %6041 = vmatprep.subr.bf16.mxu0 %v6813_v2 }
 0x2c0   : > { %6061 = vmatprep.subr.bf16.mxu1 %v6813_v2 }
 0x2c2   : > { %6042 = vmatpush3.bf16.msra.mxu0 %v6522_v28 }
 0x2c3   : > { %6062 = vmatpush3.bf16.msra.mxu1 %v6523_v29  ;;  %6043 = vmatprep.subr.bf16.mxu0 %v6813_v2 }
 0x2c4   : > { %6063 = vmatprep.subr.bf16.mxu1 %v6813_v2 }
 0x2c6   : > { %6044 = vmatpush3.bf16.msra.mxu0 %v6524_v30 }
 0x2c7   : > { %6064 = vmatpush3.bf16.msra.mxu1 %v6525_v31  ;;  %6045 = vmatprep.subr.bf16.mxu0 %v6813_v2 }
 0x2c8   : > { %6065 = vmatprep.subr.bf16.mxu1 %v6813_v2 }
 0x2ca   : > { %6046 = vmatpush3.bf16.msra.mxu0 %v6526_v32 }
 0x2cb   : > { %6066 = vmatpush3.bf16.msra.mxu1 %v6527_v35  ;;  %6047 = vmatprep.subr.bf16.mxu0 %v6813_v2 }
 0x2cc   : > { %v2707_v39 = vpop.f32.mrb[40].mxu0  ;;  %6067 = vmatprep.subr.bf16.mxu1 %v6813_v2 }
 0x2cd   : > { %v2713_v40 = vadd.f32 %v2707_v39, %v7533_v10  ;;  %v2813_v41 = vpop.f32.mrb[40].mxu1  ;;  %v5775_v42 = vpop.f32.mrb[41].mxu0  ;;  %v3395_v39 = vld [vmem:[#allocation9] sm:$0x1] }
 0x2ce   : > { %v5795_v44 = vpop.f32.mrb[41].mxu1  ;;  %v2710_v45 = vpop.f32.mrb[42].mxu0  ;;  %6048 = vmatpush3.bf16.msra.mxu0 %v6528_v37  ;;  %v3404_v42 = vld [vmem:[#allocation11] sm:$0x1] }
 0x2cf   : > { %v2819_v46 = vadd.f32 %v2813_v41, %v2713_v40  ;;  %v2816_v47 = vpop.f32.mrb[42].mxu1  ;;  %6068 = vmatpush3.bf16.msra.mxu1 %v6529_v38  ;;  %v5776_v48 = vpop.f32.mrb[43].mxu0  ;;  %6049 = vmatprep.subr.bf16.mxu0 %v6813_v2 }
 0x2d0   : > { %v5796_v51 = vpop.f32.mrb[43].mxu1  ;;  %6069 = vmatprep.subr.bf16.mxu1 %v6813_v2 }
 0x2d2   : > { %6050 = vmatpush3.bf16.msra.mxu0 %v6530_v55 }
 0x2d3   : > { %6070 = vmatpush3.bf16.msra.mxu1 %v6531_v49  ;;  %6051 = vmatprep.subr.bf16.mxu0 %v6813_v2 }
 0x2d4   : > { %6071 = vmatprep.subr.bf16.mxu1 %v6813_v2 }
 0x2d6   : > { %6052 = vmatpush3.bf16.msra.mxu0 %v6532_v54 }
 0x2d7   : > { %6072 = vmatpush3.bf16.msra.mxu1 %v6533_v57 }
 0x2d9   : > { %6054 = vmatmul.mubr.bf16.vlgmr.msra.gmra.mrb[68].mxu0 %v4224_v59 }
 0x2da   : > { %6074 = vmatmul.mubr.bf16.vlgmr.msra.gmra.mrb[68].mxu1 %v4335_v60 }
 0x2ec   : > { %v2933_v58 = vpop.f32.mrb[44].mxu0 }
 0x2ed   : > { %v2939_v61 = vadd.f32 %v2933_v58, %v2819_v46  ;;  %v3044_v62 = vpop.f32.mrb[44].mxu1  ;;  %v5815_v63 = vpop.f32.mrb[45].mxu0 }
 0x2ee   : > { %v5835_v0 = vpop.f32.mrb[45].mxu1  ;;  %v2936_v1 = vpop.f32.mrb[46].mxu0 }
 0x2ef   : > { %v3050_v3 = vadd.f32 %v3044_v62, %v2939_v61  ;;  %v3047_v4 = vpop.f32.mrb[46].mxu1  ;;  %v5816_v5 = vpop.f32.mrb[47].mxu0 }
 0x2f0   : > { %v5836_v6 = vpop.f32.mrb[47].mxu1 }
 0x30c   : > { %v3154_v7 = vpop.f32.mrb[48].mxu0 }
 0x30d   : > { %v3160_v8 = vadd.f32 %v3154_v7, %v3050_v3  ;;  %v3274_v9 = vpop.f32.mrb[48].mxu1  ;;  %v5855_v2 = vpop.f32.mrb[49].mxu0 }
 0x30e   : > { %v5875_v10 = vpop.f32.mrb[49].mxu1  ;;  %v3157_v11 = vpop.f32.mrb[50].mxu0 }
 0x30f   : > { %v3280_v12 = vadd.f32 %v3274_v9, %v3160_v8  ;;  %v3277_v13 = vpop.f32.mrb[50].mxu1  ;;  %v5856_v14 = vpop.f32.mrb[51].mxu0 }
 0x310   : > { %v5876_v15 = vpop.f32.mrb[51].mxu1 }
 0x32c   : > { %v3385_v16 = vpop.f32.mrb[52].mxu0 }
 0x32d   : > { %v3391_v18 = vadd.f32 %v3385_v16, %v3280_v12  ;;  %v3543_v19 = vpop.f32.mrb[52].mxu1  ;;  %v5895_v20 = vpop.f32.mrb[53].mxu0 }
 0x32e   : > { %v5915_v21 = vpop.f32.mrb[53].mxu1  ;;  %v3388_v22 = vpop.f32.mrb[54].mxu0 }
 0x32f   : > { %v3392_v24 = vadd.f32 %v7566_v23, %v3391_v18  ;;  %v3546_v25 = vpop.f32.mrb[54].mxu1  ;;  %v5896_v26 = vpop.f32.mrb[55].mxu0 }
 0x330   : > { %v5916_v17 = vpop.f32.mrb[55].mxu1 }
 0x331   : > { %4923 = vst [vmem:[%s7097_s9 + $0x10] sm:$0xff] %v3392_v24  ;;  %v3396_v27 = vrot.slane %v3392_v24, 4  ;;  %v3405_v28 = vmul.f32 %v3392_v24, %v3392_v24 }
 0x333   : > { %v3397_v29 = vadd.f32 %v3396_v27, %v3392_v24  ;;  %v3406_v30 = vrot.slane %v3405_v28, 4 }
 0x335   : > { %v3398_v31 = vrot.slane %v3397_v29, 2  ;;  %v3407_v32 = vadd.f32 %v3406_v30, %v3405_v28 }
 0x337   : > { %v3399_v33 = vadd.f32 %v3398_v31, %v3397_v29  ;;  %v3408_v34 = vrot.slane %v3407_v32, 2 }
 0x339   : > { %v3400_v35 = vrot.slane %v3399_v33, 1  ;;  %v3409_v36 = vadd.f32 %v3408_v34, %v3407_v32 }
 0x33b   : > { %v3410_v37 = vrot.slane %v3409_v36, 1  ;;  %v3401_v38 = vadd.f32 %v3400_v35, %v3399_v33 }
 0x33d   : > { %v3402_v40 = vadd.f32 %v3401_v38, %v3395_v39  ;;  %v3411_v41 = vadd.f32 %v3410_v37, %v3409_v36 }
 0x33f   : > { %3403 = vst [vmem:[#allocation9] sm:$0x1] %v3402_v40  ;;  %v3412_v43 = vadd.f32 %v3411_v41, %v3404_v42 }
 0x341   : > { %3413 = vst [vmem:[#allocation11] sm:$0x1] %v3412_v43 }
 0x34c   : > { %v3631_v44 = vpop.f32.mrb[56].mxu0 }
 0x34d   : > { %v3632_v45 = vadd.f32 %v3631_v44, %v3543_v19  ;;  %v3741_v55 = vpop.f32.mrb[56].mxu1  ;;  %v5935_v46 = vpop.f32.mrb[57].mxu0 }
 0x34e   : > { %v5955_v47 = vpop.f32.mrb[57].mxu1  ;;  %v3634_v48 = vpop.f32.mrb[58].mxu0 }
 0x34f   : > { %v3747_v49 = vadd.f32 %v3741_v55, %v3632_v45  ;;  %v3744_v50 = vpop.f32.mrb[58].mxu1  ;;  %v5936_v51 = vpop.f32.mrb[59].mxu0 }
 0x350   : > { %v5956_v52 = vpop.f32.mrb[59].mxu1 }
 0x36c   : > { %v3847_v53 = vpop.f32.mrb[60].mxu0 }
 0x36d   : > { %v3853_v54 = vadd.f32 %v3847_v53, %v3747_v49  ;;  %v3967_v56 = vpop.f32.mrb[60].mxu1  ;;  %v5975_v57 = vpop.f32.mrb[61].mxu0 }
 0x36e   : > { %v5995_v59 = vpop.f32.mrb[61].mxu1  ;;  %v3850_v60 = vpop.f32.mrb[62].mxu0 }
 0x36f   : > { %v3973_v58 = vadd.f32 %v3967_v56, %v3853_v54  ;;  %v3970_v61 = vpop.f32.mrb[62].mxu1  ;;  %v5976_v62 = vpop.f32.mrb[63].mxu0 }
 0x370   : > { %v5996_v63 = vpop.f32.mrb[63].mxu1 }
 0x38c   : > { %v4078_v0 = vpop.f32.mrb[64].mxu0 }
 0x38d   : > { %v4084_v1 = vadd.f32 %v4078_v0, %v3973_v58  ;;  %v4188_v3 = vpop.f32.mrb[64].mxu1  ;;  %v6015_v4 = vpop.f32.mrb[65].mxu0 }
 0x38e   : > { %v6035_v5 = vpop.f32.mrb[65].mxu1  ;;  %v4081_v6 = vpop.f32.mrb[66].mxu0 }
 0x38f   : > { %v4194_v7 = vadd.f32 %v4188_v3, %v4084_v1  ;;  %v4191_v8 = vpop.f32.mrb[66].mxu1  ;;  %v6016_v9 = vpop.f32.mrb[67].mxu0 }
 0x390   : > { %v6036_v2 = vpop.f32.mrb[67].mxu1 }
 0x3ac   : > { %v4308_v10 = vpop.f32.mrb[68].mxu0 }
 0x3ad   : > { %v4314_v11 = vadd.f32 %v4308_v10, %v4194_v7  ;;  %v4419_v12 = vpop.f32.mrb[68].mxu1  ;;  %v6055_v13 = vpop.f32.mrb[69].mxu0 }
 0x3ae   : > { %v6075_v14 = vpop.f32.mrb[69].mxu1  ;;  %v4311_v15 = vpop.f32.mrb[70].mxu0 }
 0x3af   : > { %v4425_v16 = vadd.f32 %v4419_v12, %v4314_v11  ;;  %v4422_v18 = vpop.f32.mrb[70].mxu1  ;;  %v6056_v19 = vpop.f32.mrb[71].mxu0 }
 0x3b0   : > { %v6076_v20 = vpop.f32.mrb[71].mxu1 }
 0x3b1   : > { %v4426_v21 = vadd.f32 %v7566_v23, %v4425_v16 }
 0x3b3   : > { %5015 = vst [vmem:[%s7097_s9 + $0x18] sm:$0xff] %v4426_v21  ;;  %v4430_v22 = vrot.slane %v4426_v21, 4  ;;  %v4439_v24 = vmul.f32 %v4426_v21, %v4426_v21 }
 0x3b4   : > { %6636 = shalt.err (!%p6633_p2)
}
 0x3b5   : > { %s6637_s13 = scalar_lea.hbm %s7576_s24, 512  ;;  %s6641_s9 = scalar_lea.hbm %s7696_s3, 2048 }
 0x3b6   : > { %p6638_p6 = scmp.ne.s32.totalorder %s7576_s24, %s6637_s13  ;;  %p6642_p0 = scmp.lt.u32.totalorder %s7576_s24, %s7696_s3 }
 0x3b7   : > { %p6643_p3 = scmp.lt.u32.totalorder %s6641_s9, %s6637_s13  ;;  %p6645_p13 = scmp.lt.u32.totalorder %s6637_s13, %s7576_s24 }
 0x3b8   : > { %p6639_p10 = pnand %p6638_p6, %p7742_p7 }
 0x3b9   : > { %p6644_p4 = por %p6643_p3, %p6642_p0 }
 0x3ba   : > { %p6640_p1 = pneg %p6639_p10 }
 0x3bb   : > { %p6646_p9 = por %p6645_p13, %p6644_p4 }
 0x3bd   : > { %p6647_p11 = pnand %p6646_p9, %p6640_p1 }
 0x3bf   : > { %6650 = shalt.err (!%p6647_p11)
}
 0x3c0   : > { %s6816_s5 = smov 128   ;;  %s6817_s30 = smov 8   ;;  %v4431_v23 = vadd.f32 %v4430_v22, %v4426_v21  ;;  %v4440_v25 = vrot.slane %v4439_v24, 4  ;;  %v4429_v33 = vld [vmem:[#allocation9] sm:$0x1] }
 0x3c1   : > { %6090 = dma.vmem_to_hbm [thread:$0]  (%p7742_p7), %s7578_s14, 512, %s7576_s24, %s7584_s25, %s6816_s5, %s6816_s5, %s6817_s30   ;;  %v4438_v36 = vld [vmem:[#allocation11] sm:$0x1] }
 0x3c2   : > { %v4432_v26 = vrot.slane %v4431_v23, 2  ;;  %v4441_v17 = vadd.f32 %v4440_v25, %v4439_v24  ;;  %s6818_s17 = smov [#allocation9]   ;;  %s7743_s16 = sld [smem:[#allocation18_spill]] }
 0x3c3   : > { %s4478_s4 = sshll.u32 %s6818_s17, 4  ;;  %s6819_s7 = smov [#allocation11]   ;;  %s4479_s4 = int_to_ptr.vmem [resolvable:$true] %s4478_s4 }
 0x3c4   : > { %v4433_v27 = vadd.f32 %v4432_v26, %v4431_v23  ;;  %v4442_v28 = vrot.slane %v4441_v17, 2  ;;  %s4489_s1 = sshll.u32 %s6819_s7, 4  ;;  %s6651_s10 = scalar_lea.vmem %s4479_s4, 16  ;;  %s7608_s1 = int_to_ptr.vmem [resolvable:$true] %s4489_s1 }
 0x3c5   : > { %p6652_p7 = scmp.ne.s32.totalorder %s4479_s4, %s6651_s10  ;;  %s6657_s14 = scalar_lea.vmem %s4479_s4, 32 }
 0x3c6   : > { %v4443_v29 = vadd.f32 %v4442_v28, %v4441_v17  ;;  %v4434_v30 = vrot.slane %v4433_v27, 1  ;;  %p6658_p2 = scmp.lt.s32.totalorder %s4479_s4, %s4479_s4  ;;  %p6659_p6 = scmp.lt.s32.totalorder %s6657_s14, %s6651_s10 }
 0x3c8   : > { %v4435_v31 = vadd.f32 %v4434_v30, %v4433_v27  ;;  %v4444_v32 = vrot.slane %v4443_v29, 1  ;;  %p7744_p5 = scmp.ne.s32.totalorder %s7743_s16, 0  ;;  %p6660_p10 = por %p6659_p6, %p6658_p2 }
 0x3ca   : > { %v4436_v34 = vadd.f32 %v4435_v31, %v4429_v33  ;;  %v4445_v35 = vadd.f32 %v4444_v32, %v4443_v29  ;;  %p6653_p8 = pnand %p6652_p7, %p7744_p5 }
 0x3cc   : > { %4437 = vst [vmem:[#allocation9] sm:$0x1] %v4436_v34  ;;  %v4446_v37 = vadd.f32 %v4445_v35, %v4438_v36  ;;  %p6654_p12 = pneg %p6653_p8 }
 0x3ce   : > { %p6661_p1 = pnand %p6660_p10, %p6654_p12 }
 0x3d0   : > { %6664 = shalt.err (!%p6661_p1)
}
 0x3d1   : > { %s7745_s18 = sld [smem:[#allocation23_spill]] }
 0x3d7   : > { %s7746_s15 = smov %s7745_s18  ;;  %s6665_s29 = scalar_lea.hbm %s7745_s18, 16 }
 0x3d8   : > { %p6666_p0 = scmp.ne.s32.totalorder %s7746_s15, %s6665_s29  ;;  %p6671_p13 = scmp.lt.u32.totalorder %s6665_s29, %s7746_s15 }
 0x3da   : > { %p6667_p3 = pnand %p6666_p0, %p7744_p5 }
 0x3dc   : > { %p6668_p4 = pneg %p6667_p3 }
 0x3de   : > { %p6673_p9 = pnand %p6671_p13, %p6668_p4 }
 0x3e0   : > { %6676 = shalt.err (!%p6673_p9)
}
 0x3e1   : > { %6092 = dma.vmem_to_hbm [thread:$0]  (%p7744_p5), %s4479_s4, 16, %s7746_s15, [#allocation10]   ;;  %4447 = vst [vmem:[#allocation11] sm:$0x1] %v4446_v37 }
 0x3e2   : > { %s6677_s5 = scalar_lea.vmem %s7608_s1, 16  ;;  %s6683_s30 = scalar_lea.vmem %s7608_s1, 32 }
 0x3e3   : > { %p6678_p11 = scmp.ne.s32.totalorder %s7608_s1, %s6677_s5  ;;  %p6684_p12 = scmp.lt.s32.totalorder %s7608_s1, %s7608_s1 }
 0x3e4   : > { %p6685_p2 = scmp.lt.s32.totalorder %s6683_s30, %s6677_s5 }
 0x3e5   : > { %p6679_p7 = pnand %p6678_p11, %p7744_p5 }
 0x3e6   : > { %p6686_p6 = por %p6685_p2, %p6684_p12 }
 0x3e7   : > { %p6680_p8 = pneg %p6679_p7 }
 0x3e9   : > { %p6687_p10 = pnand %p6686_p6, %p6680_p8 }
 0x3eb   : > { %6690 = shalt.err (!%p6687_p10)
}
 0x3ec   : > { %s7747_s10 = sld [smem:[#allocation24_spill]] }
 0x3f2   : > { %s6691_s14 = scalar_lea.hbm %s7747_s10, 16 }
 0x3f3   : > { %p6692_p1 = scmp.ne.s32.totalorder %s7747_s10, %s6691_s14  ;;  %p6697_p4 = scmp.lt.u32.totalorder %s6691_s14, %s7747_s10 }
 0x3f5   : > { %p6693_p0 = pnand %p6692_p1, %p7744_p5 }
 0x3f7   : > { %p6694_p3 = pneg %p6693_p0 }
 0x3f9   : > { %p6699_p13 = pnand %p6697_p4, %p6694_p3 }
 0x3fb   : > { %6702 = shalt.err (!%p6699_p13)
}
 0x3fc   : > { %6094 = dma.vmem_to_hbm [thread:$0]  (%p7744_p5), %s7608_s1, 16, %s7747_s10, [#allocation10]  }
 0x3fd   : > { %6756 = dma.done.wait (%p7744_p5), [#allocation10], 32  }
 0x3fe   : > { %6758 = vsyncadd (%p7744_p5), [#allocation10], 4294967264 }
 0x3ff PF: > { %s7748_s26 = sld [smem:[#allocation16_spill]]  ;;  %s7749_s12 = sld [smem:[#allocation19_spill]] }
 0x400   : > { %p6124_p9 = scmp.ge.s32.totalorder %s6805_s28, 2 }
 0x405   : > { %s4509_s9 = sand.u32 1, %s7748_s26   ;;  %p7750_p11 = scmp.ne.s32.totalorder %s7749_s12, 0 }
 0x406   : > { %s4510_s6 = scalar_lea.sflag [#allocation4], %s4509_s9 }
 0x407   : > { %p6112_p7 = pnand %p6124_p9, %p7750_p11 }
 0x409   : > { %6760 = dma.done.wait (!%p6112_p7), %s4510_s6, 512  }
 0x40a   : > { %6762 = vsyncadd (!%p6112_p7), %s4510_s6, 4294966784  ;;  %s24_s28 = sadd.s32 1, %s6805_s28   ;;  %s7751_s16 = smov %s7030_s21 }
 0x40b   : > { %p21_p8 = scmp.ge.s32.totalorder %s24_s28, 6   ;;  %s7752_s24 = sld [smem:[#allocation17_spill]] }
 0x40c   : > { %s7753_s26 = sld [smem:[#allocation20_spill]]  ;;  %s7754_s18 = smov %s6769_s19 }
 0x40d   : > { %s7755_s19 = smov %s6773_s20  ;;  %s7756_s20 = smov %s7035_s2 }
 0x40e   : > { %s7757_s21 = smov %s6781_s22  ;;  %s7758_s22 = smov %s6785_s23 }
 0x40f   : > { %s7759_s23 = smov %s7751_s16  ;;  %s7760_s25 = smov %s6801_s27 }
 0x410   : > { %s7761_s27 = smov %s7767_s11  ;;  %23 = sbr.rel (!%p21_p8) target bundleno = 16 (0x10), region = 122 }
 0x417   :  { %4515 = vsyncpa [#allocation3], 1 }
 0x418   :  { %4517 = vsyncpa [#allocation3 + $0x1], 1 }
 0x419   :  { %4518 = vsyncpa [#allocation6], 1 }
 0x41a   :  { %4519 = vsyncpa [#allocation4], 1 }
 0x41b   :  { %4521 = vsyncpa [#allocation4 + $0x1], 1 }
 0x41c   :  { %4522 = vsyncpa [#allocation10], 1 }

</bundles_post_ra>
